<compile_context>
chip_gen: v6e
topology: v6e:2x2x1
jax: 0.10.0
libtpu: 0.0.40
codegen_flags: <defaults>
</compile_context>

<pallas_src>
import math

import jax
import jax.numpy as jnp
from jax.experimental import pallas as pl
from jax.experimental.pallas import tpu as pltpu


# ----------------------------------------------------------------------------
# Fused forward kernel
# ----------------------------------------------------------------------------

def make_vq_bert_kernel(*, C, Psz, T, D, H, dh, conv_k, BB, lamda=5.0):
    """Builds the fused kernel for one batch-block of BB examples (static config)."""
    M = 2 * T - 1
    BT = BB * T
    pad = (conv_k - 1) // 2
    scale = 1.0 / math.sqrt(dh)
    inv_tp = 1.0 / (T * Psz)

    def layer_norm(v, g, b):
        mu = jnp.mean(v, axis=-1, keepdims=True)
        var = jnp.mean((v - mu) ** 2, axis=-1, keepdims=True)
        return (v - mu) * jax.lax.rsqrt(var + 1e-5) * g + b

    def mean_all(v):
        s = jnp.sum(jnp.sum(v, axis=-1, keepdims=True), axis=0, keepdims=True)
        return s * (1.0 / (v.shape[0] * v.shape[1]))

    def kernel(*refs):
        (patches_ref, pos_t_ref,
         tok_w, tok_b,
         ln1g, ln1b, f1w1, f1b1, f1w2, f1b2,
         lnag, lnab, wqkv, bqkv, pos_u, pos_v, wo, bo,
         lncg, lncb, pw1w, pw1b, dww, dwb, pw2w, pw2b,
         ln2g, ln2b, f2w1, f2b1, f2w2, f2b2,
         lnog, lnob, projw, projb,
         o_ref) = refs

        x_p = patches_ref[...]                                     # (BB*T, C*P)

        # ---- InstanceNorm1d (affine=False, eps=1e-5), per (batch, channel) --------
        # Channel c of batch b occupies rows [b*T,(b+1)*T), lanes [c*P,(c+1)*P) of the
        # patchified layout — exactly that channel's L samples.
        rows = []
        for b in range(BB):
            chans = []
            for c in range(C):
                blk = x_p[b * T:(b + 1) * T, c * Psz:(c + 1) * Psz]   # (T, P)
                mu = mean_all(blk)
                d0 = blk - mu
                var = mean_all(d0 * d0)
                chans.append(d0 * jax.lax.rsqrt(var + 1e-5))
            rows.append(jnp.concatenate(chans, axis=-1))
        x_n = jnp.concatenate(rows, axis=0)                        # (BT, C*P)

        # ---- Tokenizer: Linear(C*P -> D), shared over the whole batch block -------
        x = jnp.dot(x_n, tok_w[...], preferred_element_type=jnp.float32) + tok_b[...]

        # ---- Macaron FF #1 (0.5 already folded into f1w2 / f1b2) -----------------
        h = layer_norm(x, ln1g[...], ln1b[...])
        h = jnp.dot(h, f1w1[...], preferred_element_type=jnp.float32) + f1b1[...]
        h = h * jax.nn.sigmoid(h)                                  # swish
        h = jnp.dot(h, f1w2[...], preferred_element_type=jnp.float32) + f1b2[...]
        x = x + h

        # ---- Relative-position multi-head self-attention -------------------------
        hn = layer_norm(x, lnag[...], lnab[...])
        qkv = jnp.dot(hn, wqkv[...], preferred_element_type=jnp.float32) + bqkv[...]
        q = qkv[:, 0:D]
        k = qkv[:, D:2 * D]
        v = qkv[:, 2 * D:3 * D]
        pos_t = pos_t_ref[...]                                     # (D, 2T-1), host-folded

        # In-kernel rel-shift (bd[t,u] = bd_full[t, T-1-t+u]) via one-hot reduce —
        # avoids take_along_axis / gather entirely.
        t_idx = jax.lax.broadcasted_iota(jnp.int32, (T, T, M), 0)
        u_idx = jax.lax.broadcasted_iota(jnp.int32, (T, T, M), 1)
        m_idx = jax.lax.broadcasted_iota(jnp.int32, (T, T, M), 2)
        sel = (m_idx == (T - 1) - t_idx + u_idx).astype(jnp.float32)

        pu = pos_u[...]
        pv = pos_v[...]
        batch_attn = []
        for b in range(BB):                                        # BB static, unrolled
            rs = slice(b * T, (b + 1) * T)
            head_outs = []
            for hh in range(H):                                    # H static, unrolled
                cs = slice(hh * dh, (hh + 1) * dh)
                q_h, k_h, v_h = q[rs, cs], k[rs, cs], v[rs, cs]
                p_h_t = pos_t[hh * dh:(hh + 1) * dh, :]            # (dh, 2T-1)
                ac = jnp.dot(q_h + pu[hh:hh + 1, :], k_h.T,
                             preferred_element_type=jnp.float32)   # (T, T)
                bd_full = jnp.dot(q_h + pv[hh:hh + 1, :], p_h_t,
                                  preferred_element_type=jnp.float32)  # (T, 2T-1)
                bd = jnp.sum(bd_full[:, None, :] * sel, axis=-1)   # (T, T)
                s = (ac + bd) * scale
                s = s - jnp.max(s, axis=-1, keepdims=True)
                e = jnp.exp(s)
                p_attn = e * pl.reciprocal(jnp.sum(e, axis=-1, keepdims=True),
                                           approx=True)
                head_outs.append(jnp.dot(p_attn, v_h,
                                         preferred_element_type=jnp.float32))
            batch_attn.append(jnp.concatenate(head_outs, axis=-1))  # (T, D)
        attn = jnp.concatenate(batch_attn, axis=0)                 # (BT, D)
        attn = jnp.dot(attn, wo[...], preferred_element_type=jnp.float32) + bo[...]
        x = x + attn

        # ---- Conv module: pw1 -> GLU -> depthwise (batch-masked) -> BN(folded)
        #      -> swish -> pw2 ------------------------------------------------------
        hc = layer_norm(x, lncg[...], lncb[...])
        hc = jnp.dot(hc, pw1w[...], preferred_element_type=jnp.float32) + pw1b[...]
        hc = hc[:, 0:D] * jax.nn.sigmoid(hc[:, D:2 * D])           # GLU
        zp = jnp.zeros((pad, D), jnp.float32)
        hp = jnp.concatenate([zp, hc, zp], axis=0)                 # (BT + K - 1, D)
        r_iota = jax.lax.broadcasted_iota(jnp.int32, (BT, 1), 0)
        tmod = r_iota % T                                          # within-batch time idx
        dw = dww[...]

        def conv_term(kk):
            off = kk - pad
            valid = jnp.logical_and(tmod + off >= 0,
                                    tmod + off < T).astype(jnp.float32)
            return (hp[kk:kk + BT, :] * valid) * dw[kk:kk + 1, :]

        acc = conv_term(0)
        for kk in range(1, conv_k):                                # K static, unrolled
            acc = acc + conv_term(kk)
        hc = acc + dwb[...]                                        # BN scale pre-folded
        hc = hc * jax.nn.sigmoid(hc)                               # swish
        hc = jnp.dot(hc, pw2w[...], preferred_element_type=jnp.float32) + pw2b[...]
        x = x + hc

        # ---- Macaron FF #2 (0.5 folded) + final LayerNorm -------------------------
        h = layer_norm(x, ln2g[...], ln2b[...])
        h = jnp.dot(h, f2w1[...], preferred_element_type=jnp.float32) + f2b1[...]
        h = h * jax.nn.sigmoid(h)
        h = jnp.dot(h, f2w2[...], preferred_element_type=jnp.float32) + f2b2[...]
        x = x + h
        xm = layer_norm(x, lnog[...], lnob[...])                   # (BT, D)

        # ---- Final projection (D -> 1) + anomaly-detection aggregation ------------
        logits = jnp.sum(xm * projw[...], axis=-1, keepdims=True) + projb[...]  # (BT, 1)
        for b in range(BB):
            lb = logits[b * T:(b + 1) * T, :]                      # (T, 1)
            mmax = jnp.max(lb, axis=0, keepdims=True)              # (1, 1)
            temp = lamda * (1.0 - jax.nn.sigmoid(mmax)) + 1e-8
            sc = lb * pl.reciprocal(temp, approx=True)
            sc = sc - jnp.max(sc, axis=0, keepdims=True)
            ec = jnp.exp(sc)
            score = ec * pl.reciprocal(jnp.sum(ec, axis=0, keepdims=True), approx=True)
            o_ref[b] = jnp.sum(lb * score, axis=0, keepdims=True)  # (1, 1)

    return kernel


# ----------------------------------------------------------------------------
# Parameter preparation (one-time, outside jit): constant folds + flattening
# ----------------------------------------------------------------------------

def rel_positional_encoding(T, D):
    """Sinusoidal table for relative positions T-1 ... -(T-1), shape (2T-1, D)."""
    pos = jnp.arange(T - 1, -T, -1, dtype=jnp.float32)
    div = jnp.exp(jnp.arange(0, D, 2, dtype=jnp.float32) * (-math.log(10000.0) / D))
    pe = jnp.zeros((2 * T - 1, D), jnp.float32)
    pe = pe.at[:, 0::2].set(jnp.sin(pos[:, None] * div[None, :]))
    pe = pe.at[:, 1::2].set(jnp.cos(pos[:, None] * div[None, :]))
    return pe


def prepare_params(params, cfg):
    """Fold constants into weights and flatten into the kernel's input order.

    Exploits the reference quirk that the transformer loop never chains `token`,
    so only the LAST layer contributes to the output (identical result).
    """
    assert len(params["layers"]) >= 1
    D, T = cfg["d_model"], cfg["patch_num"]
    lp = params["layers"][-1]

    bn_scale = 1.0 / math.sqrt(1.0 + 1e-5)   # BatchNorm1d eval, default running stats
    half = 0.5                               # Macaron 0.5 * FF residual scale

    pe = rel_positional_encoding(T, D)                       # (2T-1, D)
    pos_t = jnp.dot(pe, lp["w_pos"]).T                       # (D, 2T-1)  input-independent

    def row(v):
        return v.reshape(1, -1)

    weights = [
        pos_t,
        params["tok_w"], row(params["tok_b"]),
        row(lp["ln_ff1_g"]), row(lp["ln_ff1_b"]),
        lp["ff1_w1"], row(lp["ff1_b1"]),
        lp["ff1_w2"] * half, row(lp["ff1_b2"]) * half,
        row(lp["ln_attn_g"]), row(lp["ln_attn_b"]),
        jnp.concatenate([lp["wq"], lp["wk"], lp["wv"]], axis=1),     # (D, 3D) fused QKV
        row(jnp.concatenate([lp["bq"], lp["bk"], lp["bv"]], axis=0)),
        lp["pos_u"], lp["pos_v"],
        lp["wo"], row(lp["bo"]),
        row(lp["ln_conv_g"]), row(lp["ln_conv_b"]),
        lp["pw1_w"], row(lp["pw1_b"]),
        lp["dw_w"] * bn_scale, row(lp["dw_b"]) * bn_scale,
        lp["pw2_w"], row(lp["pw2_b"]),
        row(lp["ln_ff2_g"]), row(lp["ln_ff2_b"]),
        lp["ff2_w1"], row(lp["ff2_b1"]),
        lp["ff2_w2"] * half, row(lp["ff2_b2"]) * half,
        row(lp["ln_out_g"]), row(lp["ln_out_b"]),
        params["proj_w"].T,                                          # (1, D)
        params["proj_b"].reshape(1, 1),
    ]
    return [jnp.asarray(w, jnp.float32) for w in weights]


# ----------------------------------------------------------------------------
# Forward wrapper: one pallas_call, one grid step for the whole (small) batch
# ----------------------------------------------------------------------------

def _pick_batch_block(B, T, max_bb=8):
    """Largest batch block <= max_bb dividing B (rows per block stay 8-aligned)."""
    for bb in range(min(B, max_bb), 0, -1):
        if B % bb == 0 and (bb == B or (bb * T) % 8 == 0):
            return bb
    return B


def vq_bert_forward(weights, x, cfg):
    """task_name='anomaly_detection' forward pass (eval mode).  x: (B, C, L)."""
    B, C, L = x.shape
    P = cfg["patch_size"]
    T = L // P
    CP = C * P
    D = cfg["d_model"]
    BB = _pick_batch_block(B, T)
    BT = BB * T

    # Patchify is a pure relayout; let XLA do it while materializing the kernel input.
    patches = x.reshape(B, C, T, P).transpose(0, 2, 1, 3).reshape(B * T, CP)

    kernel = make_vq_bert_kernel(C=C, Psz=P, T=T, D=D, H=cfg["H"], dh=cfg["dh"],
                                 conv_k=cfg["conv_k"], BB=BB)

    in_specs = [pl.BlockSpec((BT, CP), lambda i: (i, 0))]
    for w in weights:
        assert w.ndim == 2
        in_specs.append(pl.BlockSpec(w.shape, lambda i: (0, 0)))    # full-array block

    out = pl.pallas_call(
        kernel,
        grid=(B // BB,),
        in_specs=in_specs,
        out_specs=pl.BlockSpec((BB, 1, 1), lambda i: (i, 0, 0)),
        out_shape=jax.ShapeDtypeStruct((B, 1, 1), jnp.float32),
        compiler_params=pltpu.CompilerParams(
            dimension_semantics=("parallel",),   # batch blocks independent (v7x 2 TCs)
        ),
    )(patches, *weights)
    return out.reshape(B, 1)


# ----------------------------------------------------------------------------
# Deterministic parameter init (mirrors the torch module's parameterization)
# ----------------------------------------------------------------------------

def init_params(key, cfg):
    C, P, D, H = cfg["in_channel"], cfg["patch_size"], cfg["d_model"], cfg["H"]
    dh, n_layers, conv_k = cfg["dh"], cfg["n_layers"], cfg["conv_k"]
    ffh = 4 * D

    keys = iter(jax.random.split(key, 512))

    def w(shape):
        return jax.random.normal(next(keys), shape, jnp.float32) * 0.02

    def zeros(shape):
        return jnp.zeros(shape, jnp.float32)

    def ones(shape):
        return jnp.ones(shape, jnp.float32)

    params = {
        "tok_w": w((C * P, D)),
        "tok_b": zeros((D,)),
        "proj_w": w((D, 1)),
        "proj_b": zeros((1,)),
        "layers": [],
    }
    for _ in range(n_layers):
        params["layers"].append({
            "ln_ff1_g": ones((D,)), "ln_ff1_b": zeros((D,)),
            "ff1_w1": w((D, ffh)), "ff1_b1": zeros((ffh,)),
            "ff1_w2": w((ffh, D)), "ff1_b2": zeros((D,)),
            "ln_attn_g": ones((D,)), "ln_attn_b": zeros((D,)),
            "wq": w((D, D)), "bq": zeros((D,)),
            "wk": w((D, D)), "bk": zeros((D,)),
            "wv": w((D, D)), "bv": zeros((D,)),
            "wo": w((D, D)), "bo": zeros((D,)),
            "w_pos": w((D, D)),
            "pos_u": w((H, dh)), "pos_v": w((H, dh)),
            "ln_conv_g": ones((D,)), "ln_conv_b": zeros((D,)),
            "pw1_w": w((D, 2 * D)), "pw1_b": zeros((2 * D,)),
            "dw_w": w((conv_k, D)), "dw_b": zeros((D,)),
            "pw2_w": w((D, D)), "pw2_b": zeros((D,)),
            "ln_ff2_g": ones((D,)), "ln_ff2_b": zeros((D,)),
            "ff2_w1": w((D, ffh)), "ff2_b1": zeros((ffh,)),
            "ff2_w2": w((ffh, D)), "ff2_b2": zeros((D,)),
            "ln_out_g": ones((D,)), "ln_out_b": zeros((D,)),
        })
    return params


# ----------------------------------------------------------------------------
# main
# ----------------------------------------------------------------------------

if __name__ == "__main__":
    cfg = dict(
        in_channel=4,
        patch_size=8,
        patch_num=8,          # L / patch_size
        d_model=32,
        n_layers=2,
        H=4,                  # attn_heads
        dh=8,                 # d_model / attn_heads
        conv_k=5,             # conv_kernel_size
        codebook_item=16,     # unused in anomaly_detection path
        vq_dim=16,            # unused in anomaly_detection path
        codebook_num=2,       # unused in anomaly_detection path
    )

    key = jax.random.PRNGKey(0)
    k_param, k_x = jax.random.split(key)

    params = init_params(k_param, cfg)
    weights = prepare_params(params, cfg)     # one-time constant-folding / flattening

    B, C, L = 2, cfg["in_channel"], cfg["patch_size"] * cfg["patch_num"]
    x = jax.random.normal(k_x, (B, C, L), jnp.float32)   # layout: (B, C, L)

    fwd = jax.jit(lambda ws, xx: vq_bert_forward(ws, xx, cfg))
    out = fwd(weights, x)
    jax.block_until_ready(out)

    assert out.shape == (B, 1)
    print("KERNEL_OK")
</pallas_src>

<mosaic_0001>
module attributes {stable_mosaic.version = 11 : i64} {
  func.func @kernel(%arg0: i32, %arg1: memref<16x32xf32, #tpu.memory_space<vmem>>, %arg2: memref<32x15xf32, #tpu.memory_space<vmem>>, %arg3: memref<32x32xf32, #tpu.memory_space<vmem>>, %arg4: memref<1x32xf32, #tpu.memory_space<vmem>>, %arg5: memref<1x32xf32, #tpu.memory_space<vmem>>, %arg6: memref<1x32xf32, #tpu.memory_space<vmem>>, %arg7: memref<32x128xf32, #tpu.memory_space<vmem>>, %arg8: memref<1x128xf32, #tpu.memory_space<vmem>>, %arg9: memref<128x32xf32, #tpu.memory_space<vmem>>, %arg10: memref<1x32xf32, #tpu.memory_space<vmem>>, %arg11: memref<1x32xf32, #tpu.memory_space<vmem>>, %arg12: memref<1x32xf32, #tpu.memory_space<vmem>>, %arg13: memref<32x96xf32, #tpu.memory_space<vmem>>, %arg14: memref<1x96xf32, #tpu.memory_space<vmem>>, %arg15: memref<4x8xf32, #tpu.memory_space<vmem>>, %arg16: memref<4x8xf32, #tpu.memory_space<vmem>>, %arg17: memref<32x32xf32, #tpu.memory_space<vmem>>, %arg18: memref<1x32xf32, #tpu.memory_space<vmem>>, %arg19: memref<1x32xf32, #tpu.memory_space<vmem>>, %arg20: memref<1x32xf32, #tpu.memory_space<vmem>>, %arg21: memref<32x64xf32, #tpu.memory_space<vmem>>, %arg22: memref<1x64xf32, #tpu.memory_space<vmem>>, %arg23: memref<5x32xf32, #tpu.memory_space<vmem>>, %arg24: memref<1x32xf32, #tpu.memory_space<vmem>>, %arg25: memref<32x32xf32, #tpu.memory_space<vmem>>, %arg26: memref<1x32xf32, #tpu.memory_space<vmem>>, %arg27: memref<1x32xf32, #tpu.memory_space<vmem>>, %arg28: memref<1x32xf32, #tpu.memory_space<vmem>>, %arg29: memref<32x128xf32, #tpu.memory_space<vmem>>, %arg30: memref<1x128xf32, #tpu.memory_space<vmem>>, %arg31: memref<128x32xf32, #tpu.memory_space<vmem>>, %arg32: memref<1x32xf32, #tpu.memory_space<vmem>>, %arg33: memref<1x32xf32, #tpu.memory_space<vmem>>, %arg34: memref<1x32xf32, #tpu.memory_space<vmem>>, %arg35: memref<1x32xf32, #tpu.memory_space<vmem>>, %arg36: memref<1x1xf32, #tpu.memory_space<vmem>>, %arg37: memref<2x1x1xf32, #tpu.memory_space<vmem>>) attributes {dimension_semantics = [#tpu.dimension_semantics<parallel>], iteration_bounds = array<i64: 1>, scalar_prefetch = 0 : i64, scratch_operands = 0 : i64, tpu.core_type = #tpu.core_type<tc>, window_params = [{transform_indices = @transform_0, window_bounds = array<i64: 16, 32>}, {pipeline_mode = #tpu.pipeline_mode<synchronous>, transform_indices = @transform_1, window_bounds = array<i64: 32, 15>}, {pipeline_mode = #tpu.pipeline_mode<synchronous>, transform_indices = @transform_2, window_bounds = array<i64: 32, 32>}, {pipeline_mode = #tpu.pipeline_mode<synchronous>, transform_indices = @transform_3, window_bounds = array<i64: 1, 32>}, {pipeline_mode = #tpu.pipeline_mode<synchronous>, transform_indices = @transform_4, window_bounds = array<i64: 1, 32>}, {pipeline_mode = #tpu.pipeline_mode<synchronous>, transform_indices = @transform_5, window_bounds = array<i64: 1, 32>}, {pipeline_mode = #tpu.pipeline_mode<synchronous>, transform_indices = @transform_6, window_bounds = array<i64: 32, 128>}, {pipeline_mode = #tpu.pipeline_mode<synchronous>, transform_indices = @transform_7, window_bounds = array<i64: 1, 128>}, {pipeline_mode = #tpu.pipeline_mode<synchronous>, transform_indices = @transform_8, window_bounds = array<i64: 128, 32>}, {pipeline_mode = #tpu.pipeline_mode<synchronous>, transform_indices = @transform_9, window_bounds = array<i64: 1, 32>}, {pipeline_mode = #tpu.pipeline_mode<synchronous>, transform_indices = @transform_10, window_bounds = array<i64: 1, 32>}, {pipeline_mode = #tpu.pipeline_mode<synchronous>, transform_indices = @transform_11, window_bounds = array<i64: 1, 32>}, {pipeline_mode = #tpu.pipeline_mode<synchronous>, transform_indices = @transform_12, window_bounds = array<i64: 32, 96>}, {pipeline_mode = #tpu.pipeline_mode<synchronous>, transform_indices = @transform_13, window_bounds = array<i64: 1, 96>}, {pipeline_mode = #tpu.pipeline_mode<synchronous>, transform_indices = @transform_14, window_bounds = array<i64: 4, 8>}, {pipeline_mode = #tpu.pipeline_mode<synchronous>, transform_indices = @transform_15, window_bounds = array<i64: 4, 8>}, {pipeline_mode = #tpu.pipeline_mode<synchronous>, transform_indices = @transform_16, window_bounds = array<i64: 32, 32>}, {pipeline_mode = #tpu.pipeline_mode<synchronous>, transform_indices = @transform_17, window_bounds = array<i64: 1, 32>}, {pipeline_mode = #tpu.pipeline_mode<synchronous>, transform_indices = @transform_18, window_bounds = array<i64: 1, 32>}, {pipeline_mode = #tpu.pipeline_mode<synchronous>, transform_indices = @transform_19, window_bounds = array<i64: 1, 32>}, {pipeline_mode = #tpu.pipeline_mode<synchronous>, transform_indices = @transform_20, window_bounds = array<i64: 32, 64>}, {pipeline_mode = #tpu.pipeline_mode<synchronous>, transform_indices = @transform_21, window_bounds = array<i64: 1, 64>}, {pipeline_mode = #tpu.pipeline_mode<synchronous>, transform_indices = @transform_22, window_bounds = array<i64: 5, 32>}, {pipeline_mode = #tpu.pipeline_mode<synchronous>, transform_indices = @transform_23, window_bounds = array<i64: 1, 32>}, {pipeline_mode = #tpu.pipeline_mode<synchronous>, transform_indices = @transform_24, window_bounds = array<i64: 32, 32>}, {pipeline_mode = #tpu.pipeline_mode<synchronous>, transform_indices = @transform_25, window_bounds = array<i64: 1, 32>}, {pipeline_mode = #tpu.pipeline_mode<synchronous>, transform_indices = @transform_26, window_bounds = array<i64: 1, 32>}, {pipeline_mode = #tpu.pipeline_mode<synchronous>, transform_indices = @transform_27, window_bounds = array<i64: 1, 32>}, {pipeline_mode = #tpu.pipeline_mode<synchronous>, transform_indices = @transform_28, window_bounds = array<i64: 32, 128>}, {pipeline_mode = #tpu.pipeline_mode<synchronous>, transform_indices = @transform_29, window_bounds = array<i64: 1, 128>}, {pipeline_mode = #tpu.pipeline_mode<synchronous>, transform_indices = @transform_30, window_bounds = array<i64: 128, 32>}, {pipeline_mode = #tpu.pipeline_mode<synchronous>, transform_indices = @transform_31, window_bounds = array<i64: 1, 32>}, {pipeline_mode = #tpu.pipeline_mode<synchronous>, transform_indices = @transform_32, window_bounds = array<i64: 1, 32>}, {pipeline_mode = #tpu.pipeline_mode<synchronous>, transform_indices = @transform_33, window_bounds = array<i64: 1, 32>}, {pipeline_mode = #tpu.pipeline_mode<synchronous>, transform_indices = @transform_34, window_bounds = array<i64: 1, 32>}, {pipeline_mode = #tpu.pipeline_mode<synchronous>, transform_indices = @transform_35, window_bounds = array<i64: 1, 1>}, {transform_indices = @transform_36, window_bounds = array<i64: 2, 1, 1>}]} {
    %c0 = arith.constant 0 : index
    %c0_0 = arith.constant 0 : index
    %0 = vector.load %arg1[%c0, %c0_0] : memref<16x32xf32, #tpu.memory_space<vmem>>, vector<16x32xf32>
    %1 = vector.extract_strided_slice %0 {offsets = [0, 0], sizes = [8, 8], strides = [1, 1]} : vector<16x32xf32> to vector<8x8xf32>
    %cst = arith.constant dense<0.000000e+00> : vector<8xf32>
    %2 = vector.multi_reduction <add>, %1, %cst [1] : vector<8x8xf32> to vector<8xf32>
    %3 = vector.shape_cast %2 : vector<8xf32> to vector<8x1xf32>
    %cst_1 = arith.constant dense<0.000000e+00> : vector<1xf32>
    %4 = vector.multi_reduction <add>, %3, %cst_1 [0] : vector<8x1xf32> to vector<1xf32>
    %5 = vector.shape_cast %4 : vector<1xf32> to vector<1x1xf32>
    %cst_2 = arith.constant 1.562500e-02 : f32
    %6 = vector.broadcast %cst_2 : f32 to vector<1x1xf32>
    %7 = arith.mulf %5, %6 : vector<1x1xf32>
    %8 = vector.broadcast %7 : vector<1x1xf32> to vector<8x8xf32>
    %9 = arith.subf %1, %8 : vector<8x8xf32>
    %10 = arith.mulf %9, %9 : vector<8x8xf32>
    %cst_3 = arith.constant dense<0.000000e+00> : vector<8xf32>
    %11 = vector.multi_reduction <add>, %10, %cst_3 [1] : vector<8x8xf32> to vector<8xf32>
    %12 = vector.shape_cast %11 : vector<8xf32> to vector<8x1xf32>
    %cst_4 = arith.constant dense<0.000000e+00> : vector<1xf32>
    %13 = vector.multi_reduction <add>, %12, %cst_4 [0] : vector<8x1xf32> to vector<1xf32>
    %14 = vector.shape_cast %13 : vector<1xf32> to vector<1x1xf32>
    %cst_5 = arith.constant 1.562500e-02 : f32
    %15 = vector.broadcast %cst_5 : f32 to vector<1x1xf32>
    %16 = arith.mulf %14, %15 : vector<1x1xf32>
    %cst_6 = arith.constant 9.99999974E-6 : f32
    %17 = vector.broadcast %cst_6 : f32 to vector<1x1xf32>
    %18 = arith.addf %16, %17 : vector<1x1xf32>
    %19 = math.rsqrt %18 : vector<1x1xf32>
    %20 = vector.broadcast %19 : vector<1x1xf32> to vector<8x8xf32>
    %21 = arith.mulf %9, %20 : vector<8x8xf32>
    %22 = vector.extract_strided_slice %0 {offsets = [0, 8], sizes = [8, 8], strides = [1, 1]} : vector<16x32xf32> to vector<8x8xf32>
    %cst_7 = arith.constant dense<0.000000e+00> : vector<8xf32>
    %23 = vector.multi_reduction <add>, %22, %cst_7 [1] : vector<8x8xf32> to vector<8xf32>
    %24 = vector.shape_cast %23 : vector<8xf32> to vector<8x1xf32>
    %cst_8 = arith.constant dense<0.000000e+00> : vector<1xf32>
    %25 = vector.multi_reduction <add>, %24, %cst_8 [0] : vector<8x1xf32> to vector<1xf32>
    %26 = vector.shape_cast %25 : vector<1xf32> to vector<1x1xf32>
    %cst_9 = arith.constant 1.562500e-02 : f32
    %27 = vector.broadcast %cst_9 : f32 to vector<1x1xf32>
    %28 = arith.mulf %26, %27 : vector<1x1xf32>
    %29 = vector.broadcast %28 : vector<1x1xf32> to vector<8x8xf32>
    %30 = arith.subf %22, %29 : vector<8x8xf32>
    %31 = arith.mulf %30, %30 : vector<8x8xf32>
    %cst_10 = arith.constant dense<0.000000e+00> : vector<8xf32>
    %32 = vector.multi_reduction <add>, %31, %cst_10 [1] : vector<8x8xf32> to vector<8xf32>
    %33 = vector.shape_cast %32 : vector<8xf32> to vector<8x1xf32>
    %cst_11 = arith.constant dense<0.000000e+00> : vector<1xf32>
    %34 = vector.multi_reduction <add>, %33, %cst_11 [0] : vector<8x1xf32> to vector<1xf32>
    %35 = vector.shape_cast %34 : vector<1xf32> to vector<1x1xf32>
    %cst_12 = arith.constant 1.562500e-02 : f32
    %36 = vector.broadcast %cst_12 : f32 to vector<1x1xf32>
    %37 = arith.mulf %35, %36 : vector<1x1xf32>
    %cst_13 = arith.constant 9.99999974E-6 : f32
    %38 = vector.broadcast %cst_13 : f32 to vector<1x1xf32>
    %39 = arith.addf %37, %38 : vector<1x1xf32>
    %40 = math.rsqrt %39 : vector<1x1xf32>
    %41 = vector.broadcast %40 : vector<1x1xf32> to vector<8x8xf32>
    %42 = arith.mulf %30, %41 : vector<8x8xf32>
    %43 = vector.extract_strided_slice %0 {offsets = [0, 16], sizes = [8, 8], strides = [1, 1]} : vector<16x32xf32> to vector<8x8xf32>
    %cst_14 = arith.constant dense<0.000000e+00> : vector<8xf32>
    %44 = vector.multi_reduction <add>, %43, %cst_14 [1] : vector<8x8xf32> to vector<8xf32>
    %45 = vector.shape_cast %44 : vector<8xf32> to vector<8x1xf32>
    %cst_15 = arith.constant dense<0.000000e+00> : vector<1xf32>
    %46 = vector.multi_reduction <add>, %45, %cst_15 [0] : vector<8x1xf32> to vector<1xf32>
    %47 = vector.shape_cast %46 : vector<1xf32> to vector<1x1xf32>
    %cst_16 = arith.constant 1.562500e-02 : f32
    %48 = vector.broadcast %cst_16 : f32 to vector<1x1xf32>
    %49 = arith.mulf %47, %48 : vector<1x1xf32>
    %50 = vector.broadcast %49 : vector<1x1xf32> to vector<8x8xf32>
    %51 = arith.subf %43, %50 : vector<8x8xf32>
    %52 = arith.mulf %51, %51 : vector<8x8xf32>
    %cst_17 = arith.constant dense<0.000000e+00> : vector<8xf32>
    %53 = vector.multi_reduction <add>, %52, %cst_17 [1] : vector<8x8xf32> to vector<8xf32>
    %54 = vector.shape_cast %53 : vector<8xf32> to vector<8x1xf32>
    %cst_18 = arith.constant dense<0.000000e+00> : vector<1xf32>
    %55 = vector.multi_reduction <add>, %54, %cst_18 [0] : vector<8x1xf32> to vector<1xf32>
    %56 = vector.shape_cast %55 : vector<1xf32> to vector<1x1xf32>
    %cst_19 = arith.constant 1.562500e-02 : f32
    %57 = vector.broadcast %cst_19 : f32 to vector<1x1xf32>
    %58 = arith.mulf %56, %57 : vector<1x1xf32>
    %cst_20 = arith.constant 9.99999974E-6 : f32
    %59 = vector.broadcast %cst_20 : f32 to vector<1x1xf32>
    %60 = arith.addf %58, %59 : vector<1x1xf32>
    %61 = math.rsqrt %60 : vector<1x1xf32>
    %62 = vector.broadcast %61 : vector<1x1xf32> to vector<8x8xf32>
    %63 = arith.mulf %51, %62 : vector<8x8xf32>
    %64 = vector.extract_strided_slice %0 {offsets = [0, 24], sizes = [8, 8], strides = [1, 1]} : vector<16x32xf32> to vector<8x8xf32>
    %cst_21 = arith.constant dense<0.000000e+00> : vector<8xf32>
    %65 = vector.multi_reduction <add>, %64, %cst_21 [1] : vector<8x8xf32> to vector<8xf32>
    %66 = vector.shape_cast %65 : vector<8xf32> to vector<8x1xf32>
    %cst_22 = arith.constant dense<0.000000e+00> : vector<1xf32>
    %67 = vector.multi_reduction <add>, %66, %cst_22 [0] : vector<8x1xf32> to vector<1xf32>
    %68 = vector.shape_cast %67 : vector<1xf32> to vector<1x1xf32>
    %cst_23 = arith.constant 1.562500e-02 : f32
    %69 = vector.broadcast %cst_23 : f32 to vector<1x1xf32>
    %70 = arith.mulf %68, %69 : vector<1x1xf32>
    %71 = vector.broadcast %70 : vector<1x1xf32> to vector<8x8xf32>
    %72 = arith.subf %64, %71 : vector<8x8xf32>
    %73 = arith.mulf %72, %72 : vector<8x8xf32>
    %cst_24 = arith.constant dense<0.000000e+00> : vector<8xf32>
    %74 = vector.multi_reduction <add>, %73, %cst_24 [1] : vector<8x8xf32> to vector<8xf32>
    %75 = vector.shape_cast %74 : vector<8xf32> to vector<8x1xf32>
    %cst_25 = arith.constant dense<0.000000e+00> : vector<1xf32>
    %76 = vector.multi_reduction <add>, %75, %cst_25 [0] : vector<8x1xf32> to vector<1xf32>
    %77 = vector.shape_cast %76 : vector<1xf32> to vector<1x1xf32>
    %cst_26 = arith.constant 1.562500e-02 : f32
    %78 = vector.broadcast %cst_26 : f32 to vector<1x1xf32>
    %79 = arith.mulf %77, %78 : vector<1x1xf32>
    %cst_27 = arith.constant 9.99999974E-6 : f32
    %80 = vector.broadcast %cst_27 : f32 to vector<1x1xf32>
    %81 = arith.addf %79, %80 : vector<1x1xf32>
    %82 = math.rsqrt %81 : vector<1x1xf32>
    %83 = vector.broadcast %82 : vector<1x1xf32> to vector<8x8xf32>
    %84 = arith.mulf %72, %83 : vector<8x8xf32>
    %85 = tpu.concatenate %21, %42, %63, %84 in 1 : vector<8x8xf32>, vector<8x8xf32>, vector<8x8xf32>, vector<8x8xf32> -> vector<8x32xf32>
    %86 = vector.extract_strided_slice %0 {offsets = [8, 0], sizes = [8, 8], strides = [1, 1]} : vector<16x32xf32> to vector<8x8xf32>
    %cst_28 = arith.constant dense<0.000000e+00> : vector<8xf32>
    %87 = vector.multi_reduction <add>, %86, %cst_28 [1] : vector<8x8xf32> to vector<8xf32>
    %88 = vector.shape_cast %87 : vector<8xf32> to vector<8x1xf32>
    %cst_29 = arith.constant dense<0.000000e+00> : vector<1xf32>
    %89 = vector.multi_reduction <add>, %88, %cst_29 [0] : vector<8x1xf32> to vector<1xf32>
    %90 = vector.shape_cast %89 : vector<1xf32> to vector<1x1xf32>
    %cst_30 = arith.constant 1.562500e-02 : f32
    %91 = vector.broadcast %cst_30 : f32 to vector<1x1xf32>
    %92 = arith.mulf %90, %91 : vector<1x1xf32>
    %93 = vector.broadcast %92 : vector<1x1xf32> to vector<8x8xf32>
    %94 = arith.subf %86, %93 : vector<8x8xf32>
    %95 = arith.mulf %94, %94 : vector<8x8xf32>
    %cst_31 = arith.constant dense<0.000000e+00> : vector<8xf32>
    %96 = vector.multi_reduction <add>, %95, %cst_31 [1] : vector<8x8xf32> to vector<8xf32>
    %97 = vector.shape_cast %96 : vector<8xf32> to vector<8x1xf32>
    %cst_32 = arith.constant dense<0.000000e+00> : vector<1xf32>
    %98 = vector.multi_reduction <add>, %97, %cst_32 [0] : vector<8x1xf32> to vector<1xf32>
    %99 = vector.shape_cast %98 : vector<1xf32> to vector<1x1xf32>
    %cst_33 = arith.constant 1.562500e-02 : f32
    %100 = vector.broadcast %cst_33 : f32 to vector<1x1xf32>
    %101 = arith.mulf %99, %100 : vector<1x1xf32>
    %cst_34 = arith.constant 9.99999974E-6 : f32
    %102 = vector.broadcast %cst_34 : f32 to vector<1x1xf32>
    %103 = arith.addf %101, %102 : vector<1x1xf32>
    %104 = math.rsqrt %103 : vector<1x1xf32>
    %105 = vector.broadcast %104 : vector<1x1xf32> to vector<8x8xf32>
    %106 = arith.mulf %94, %105 : vector<8x8xf32>
    %107 = vector.extract_strided_slice %0 {offsets = [8, 8], sizes = [8, 8], strides = [1, 1]} : vector<16x32xf32> to vector<8x8xf32>
    %cst_35 = arith.constant dense<0.000000e+00> : vector<8xf32>
    %108 = vector.multi_reduction <add>, %107, %cst_35 [1] : vector<8x8xf32> to vector<8xf32>
    %109 = vector.shape_cast %108 : vector<8xf32> to vector<8x1xf32>
    %cst_36 = arith.constant dense<0.000000e+00> : vector<1xf32>
    %110 = vector.multi_reduction <add>, %109, %cst_36 [0] : vector<8x1xf32> to vector<1xf32>
    %111 = vector.shape_cast %110 : vector<1xf32> to vector<1x1xf32>
    %cst_37 = arith.constant 1.562500e-02 : f32
    %112 = vector.broadcast %cst_37 : f32 to vector<1x1xf32>
    %113 = arith.mulf %111, %112 : vector<1x1xf32>
    %114 = vector.broadcast %113 : vector<1x1xf32> to vector<8x8xf32>
    %115 = arith.subf %107, %114 : vector<8x8xf32>
    %116 = arith.mulf %115, %115 : vector<8x8xf32>
    %cst_38 = arith.constant dense<0.000000e+00> : vector<8xf32>
    %117 = vector.multi_reduction <add>, %116, %cst_38 [1] : vector<8x8xf32> to vector<8xf32>
    %118 = vector.shape_cast %117 : vector<8xf32> to vector<8x1xf32>
    %cst_39 = arith.constant dense<0.000000e+00> : vector<1xf32>
    %119 = vector.multi_reduction <add>, %118, %cst_39 [0] : vector<8x1xf32> to vector<1xf32>
    %120 = vector.shape_cast %119 : vector<1xf32> to vector<1x1xf32>
    %cst_40 = arith.constant 1.562500e-02 : f32
    %121 = vector.broadcast %cst_40 : f32 to vector<1x1xf32>
    %122 = arith.mulf %120, %121 : vector<1x1xf32>
    %cst_41 = arith.constant 9.99999974E-6 : f32
    %123 = vector.broadcast %cst_41 : f32 to vector<1x1xf32>
    %124 = arith.addf %122, %123 : vector<1x1xf32>
    %125 = math.rsqrt %124 : vector<1x1xf32>
    %126 = vector.broadcast %125 : vector<1x1xf32> to vector<8x8xf32>
    %127 = arith.mulf %115, %126 : vector<8x8xf32>
    %128 = vector.extract_strided_slice %0 {offsets = [8, 16], sizes = [8, 8], strides = [1, 1]} : vector<16x32xf32> to vector<8x8xf32>
    %cst_42 = arith.constant dense<0.000000e+00> : vector<8xf32>
    %129 = vector.multi_reduction <add>, %128, %cst_42 [1] : vector<8x8xf32> to vector<8xf32>
    %130 = vector.shape_cast %129 : vector<8xf32> to vector<8x1xf32>
    %cst_43 = arith.constant dense<0.000000e+00> : vector<1xf32>
    %131 = vector.multi_reduction <add>, %130, %cst_43 [0] : vector<8x1xf32> to vector<1xf32>
    %132 = vector.shape_cast %131 : vector<1xf32> to vector<1x1xf32>
    %cst_44 = arith.constant 1.562500e-02 : f32
    %133 = vector.broadcast %cst_44 : f32 to vector<1x1xf32>
    %134 = arith.mulf %132, %133 : vector<1x1xf32>
    %135 = vector.broadcast %134 : vector<1x1xf32> to vector<8x8xf32>
    %136 = arith.subf %128, %135 : vector<8x8xf32>
    %137 = arith.mulf %136, %136 : vector<8x8xf32>
    %cst_45 = arith.constant dense<0.000000e+00> : vector<8xf32>
    %138 = vector.multi_reduction <add>, %137, %cst_45 [1] : vector<8x8xf32> to vector<8xf32>
    %139 = vector.shape_cast %138 : vector<8xf32> to vector<8x1xf32>
    %cst_46 = arith.constant dense<0.000000e+00> : vector<1xf32>
    %140 = vector.multi_reduction <add>, %139, %cst_46 [0] : vector<8x1xf32> to vector<1xf32>
    %141 = vector.shape_cast %140 : vector<1xf32> to vector<1x1xf32>
    %cst_47 = arith.constant 1.562500e-02 : f32
    %142 = vector.broadcast %cst_47 : f32 to vector<1x1xf32>
    %143 = arith.mulf %141, %142 : vector<1x1xf32>
    %cst_48 = arith.constant 9.99999974E-6 : f32
    %144 = vector.broadcast %cst_48 : f32 to vector<1x1xf32>
    %145 = arith.addf %143, %144 : vector<1x1xf32>
    %146 = math.rsqrt %145 : vector<1x1xf32>
    %147 = vector.broadcast %146 : vector<1x1xf32> to vector<8x8xf32>
    %148 = arith.mulf %136, %147 : vector<8x8xf32>
    %149 = vector.extract_strided_slice %0 {offsets = [8, 24], sizes = [8, 8], strides = [1, 1]} : vector<16x32xf32> to vector<8x8xf32>
    %cst_49 = arith.constant dense<0.000000e+00> : vector<8xf32>
    %150 = vector.multi_reduction <add>, %149, %cst_49 [1] : vector<8x8xf32> to vector<8xf32>
    %151 = vector.shape_cast %150 : vector<8xf32> to vector<8x1xf32>
    %cst_50 = arith.constant dense<0.000000e+00> : vector<1xf32>
    %152 = vector.multi_reduction <add>, %151, %cst_50 [0] : vector<8x1xf32> to vector<1xf32>
    %153 = vector.shape_cast %152 : vector<1xf32> to vector<1x1xf32>
    %cst_51 = arith.constant 1.562500e-02 : f32
    %154 = vector.broadcast %cst_51 : f32 to vector<1x1xf32>
    %155 = arith.mulf %153, %154 : vector<1x1xf32>
    %156 = vector.broadcast %155 : vector<1x1xf32> to vector<8x8xf32>
    %157 = arith.subf %149, %156 : vector<8x8xf32>
    %158 = arith.mulf %157, %157 : vector<8x8xf32>
    %cst_52 = arith.constant dense<0.000000e+00> : vector<8xf32>
    %159 = vector.multi_reduction <add>, %158, %cst_52 [1] : vector<8x8xf32> to vector<8xf32>
    %160 = vector.shape_cast %159 : vector<8xf32> to vector<8x1xf32>
    %cst_53 = arith.constant dense<0.000000e+00> : vector<1xf32>
    %161 = vector.multi_reduction <add>, %160, %cst_53 [0] : vector<8x1xf32> to vector<1xf32>
    %162 = vector.shape_cast %161 : vector<1xf32> to vector<1x1xf32>
    %cst_54 = arith.constant 1.562500e-02 : f32
    %163 = vector.broadcast %cst_54 : f32 to vector<1x1xf32>
    %164 = arith.mulf %162, %163 : vector<1x1xf32>
    %cst_55 = arith.constant 9.99999974E-6 : f32
    %165 = vector.broadcast %cst_55 : f32 to vector<1x1xf32>
    %166 = arith.addf %164, %165 : vector<1x1xf32>
    %167 = math.rsqrt %166 : vector<1x1xf32>
    %168 = vector.broadcast %167 : vector<1x1xf32> to vector<8x8xf32>
    %169 = arith.mulf %157, %168 : vector<8x8xf32>
    %170 = tpu.concatenate %106, %127, %148, %169 in 1 : vector<8x8xf32>, vector<8x8xf32>, vector<8x8xf32>, vector<8x8xf32> -> vector<8x32xf32>
    %171 = tpu.concatenate %85, %170 in 0 : vector<8x32xf32>, vector<8x32xf32> -> vector<16x32xf32>
    %c0_56 = arith.constant 0 : index
    %c0_57 = arith.constant 0 : index
    %172 = vector.load %arg3[%c0_56, %c0_57] : memref<32x32xf32, #tpu.memory_space<vmem>>, vector<32x32xf32>
    %cst_58 = arith.constant dense<0.000000e+00> : vector<16x32xf32>
    %173 = tpu.matmul %171, %172, %cst_58 {dimension_numbers = #tpu.dot_dimension_numbers<[1], [0], [0], [1], [0, 0, 1, 1], [], []>} : vector<16x32xf32>, vector<32x32xf32>, vector<16x32xf32> -> vector<16x32xf32>
    %c0_59 = arith.constant 0 : index
    %c0_60 = arith.constant 0 : index
    %174 = vector.load %arg4[%c0_59, %c0_60] : memref<1x32xf32, #tpu.memory_space<vmem>>, vector<1x32xf32>
    %175 = vector.broadcast %174 : vector<1x32xf32> to vector<16x32xf32>
    %176 = arith.addf %173, %175 : vector<16x32xf32>
    %c0_61 = arith.constant 0 : index
    %c0_62 = arith.constant 0 : index
    %177 = vector.load %arg5[%c0_61, %c0_62] : memref<1x32xf32, #tpu.memory_space<vmem>>, vector<1x32xf32>
    %c0_63 = arith.constant 0 : index
    %c0_64 = arith.constant 0 : index
    %178 = vector.load %arg6[%c0_63, %c0_64] : memref<1x32xf32, #tpu.memory_space<vmem>>, vector<1x32xf32>
    %cst_65 = arith.constant dense<0.000000e+00> : vector<16xf32>
    %179 = vector.multi_reduction <add>, %176, %cst_65 [1] : vector<16x32xf32> to vector<16xf32>
    %180 = vector.shape_cast %179 : vector<16xf32> to vector<16x1xf32>
    %cst_66 = arith.constant 3.200000e+01 : f32
    %181 = vector.broadcast %cst_66 : f32 to vector<16x1xf32>
    %182 = arith.divf %180, %181 : vector<16x1xf32>
    %183 = vector.broadcast %182 : vector<16x1xf32> to vector<16x32xf32>
    %184 = arith.subf %176, %183 : vector<16x32xf32>
    %185 = arith.mulf %184, %184 : vector<16x32xf32>
    %cst_67 = arith.constant dense<0.000000e+00> : vector<16xf32>
    %186 = vector.multi_reduction <add>, %185, %cst_67 [1] : vector<16x32xf32> to vector<16xf32>
    %187 = vector.shape_cast %186 : vector<16xf32> to vector<16x1xf32>
    %cst_68 = arith.constant 3.200000e+01 : f32
    %188 = vector.broadcast %cst_68 : f32 to vector<16x1xf32>
    %189 = arith.divf %187, %188 : vector<16x1xf32>
    %190 = vector.broadcast %182 : vector<16x1xf32> to vector<16x32xf32>
    %191 = arith.subf %176, %190 : vector<16x32xf32>
    %cst_69 = arith.constant 9.99999974E-6 : f32
    %192 = vector.broadcast %cst_69 : f32 to vector<16x1xf32>
    %193 = arith.addf %189, %192 : vector<16x1xf32>
    %194 = math.rsqrt %193 : vector<16x1xf32>
    %195 = vector.broadcast %194 : vector<16x1xf32> to vector<16x32xf32>
    %196 = arith.mulf %191, %195 : vector<16x32xf32>
    %197 = vector.broadcast %177 : vector<1x32xf32> to vector<16x32xf32>
    %198 = arith.mulf %196, %197 : vector<16x32xf32>
    %199 = vector.broadcast %178 : vector<1x32xf32> to vector<16x32xf32>
    %200 = arith.addf %198, %199 : vector<16x32xf32>
    %c0_70 = arith.constant 0 : index
    %c0_71 = arith.constant 0 : index
    %201 = vector.load %arg7[%c0_70, %c0_71] : memref<32x128xf32, #tpu.memory_space<vmem>>, vector<32x128xf32>
    %cst_72 = arith.constant dense<0.000000e+00> : vector<16x128xf32>
    %202 = tpu.matmul %200, %201, %cst_72 {dimension_numbers = #tpu.dot_dimension_numbers<[1], [0], [0], [1], [0, 0, 1, 1], [], []>} : vector<16x32xf32>, vector<32x128xf32>, vector<16x128xf32> -> vector<16x128xf32>
    %c0_73 = arith.constant 0 : index
    %c0_74 = arith.constant 0 : index
    %203 = vector.load %arg8[%c0_73, %c0_74] : memref<1x128xf32, #tpu.memory_space<vmem>>, vector<1x128xf32>
    %204 = vector.broadcast %203 : vector<1x128xf32> to vector<16x128xf32>
    %205 = arith.addf %202, %204 : vector<16x128xf32>
    %206 = arith.negf %205 : vector<16x128xf32>
    %207 = math.exp %206 : vector<16x128xf32>
    %cst_75 = arith.constant 1.000000e+00 : f32
    %208 = vector.broadcast %cst_75 : f32 to vector<16x128xf32>
    %209 = arith.addf %208, %207 : vector<16x128xf32>
    %210 = arith.divf %208, %209 : vector<16x128xf32>
    %211 = arith.mulf %205, %210 : vector<16x128xf32>
    %c0_76 = arith.constant 0 : index
    %c0_77 = arith.constant 0 : index
    %212 = vector.load %arg9[%c0_76, %c0_77] : memref<128x32xf32, #tpu.memory_space<vmem>>, vector<128x32xf32>
    %cst_78 = arith.constant dense<0.000000e+00> : vector<16x32xf32>
    %213 = tpu.matmul %211, %212, %cst_78 {dimension_numbers = #tpu.dot_dimension_numbers<[1], [0], [0], [1], [0, 0, 1, 1], [], []>} : vector<16x128xf32>, vector<128x32xf32>, vector<16x32xf32> -> vector<16x32xf32>
    %c0_79 = arith.constant 0 : index
    %c0_80 = arith.constant 0 : index
    %214 = vector.load %arg10[%c0_79, %c0_80] : memref<1x32xf32, #tpu.memory_space<vmem>>, vector<1x32xf32>
    %215 = vector.broadcast %214 : vector<1x32xf32> to vector<16x32xf32>
    %216 = arith.addf %213, %215 : vector<16x32xf32>
    %217 = arith.addf %176, %216 : vector<16x32xf32>
    %c0_81 = arith.constant 0 : index
    %c0_82 = arith.constant 0 : index
    %218 = vector.load %arg11[%c0_81, %c0_82] : memref<1x32xf32, #tpu.memory_space<vmem>>, vector<1x32xf32>
    %c0_83 = arith.constant 0 : index
    %c0_84 = arith.constant 0 : index
    %219 = vector.load %arg12[%c0_83, %c0_84] : memref<1x32xf32, #tpu.memory_space<vmem>>, vector<1x32xf32>
    %cst_85 = arith.constant dense<0.000000e+00> : vector<16xf32>
    %220 = vector.multi_reduction <add>, %217, %cst_85 [1] : vector<16x32xf32> to vector<16xf32>
    %221 = vector.shape_cast %220 : vector<16xf32> to vector<16x1xf32>
    %cst_86 = arith.constant 3.200000e+01 : f32
    %222 = vector.broadcast %cst_86 : f32 to vector<16x1xf32>
    %223 = arith.divf %221, %222 : vector<16x1xf32>
    %224 = vector.broadcast %223 : vector<16x1xf32> to vector<16x32xf32>
    %225 = arith.subf %217, %224 : vector<16x32xf32>
    %226 = arith.mulf %225, %225 : vector<16x32xf32>
    %cst_87 = arith.constant dense<0.000000e+00> : vector<16xf32>
    %227 = vector.multi_reduction <add>, %226, %cst_87 [1] : vector<16x32xf32> to vector<16xf32>
    %228 = vector.shape_cast %227 : vector<16xf32> to vector<16x1xf32>
    %cst_88 = arith.constant 3.200000e+01 : f32
    %229 = vector.broadcast %cst_88 : f32 to vector<16x1xf32>
    %230 = arith.divf %228, %229 : vector<16x1xf32>
    %231 = vector.broadcast %223 : vector<16x1xf32> to vector<16x32xf32>
    %232 = arith.subf %217, %231 : vector<16x32xf32>
    %cst_89 = arith.constant 9.99999974E-6 : f32
    %233 = vector.broadcast %cst_89 : f32 to vector<16x1xf32>
    %234 = arith.addf %230, %233 : vector<16x1xf32>
    %235 = math.rsqrt %234 : vector<16x1xf32>
    %236 = vector.broadcast %235 : vector<16x1xf32> to vector<16x32xf32>
    %237 = arith.mulf %232, %236 : vector<16x32xf32>
    %238 = vector.broadcast %218 : vector<1x32xf32> to vector<16x32xf32>
    %239 = arith.mulf %237, %238 : vector<16x32xf32>
    %240 = vector.broadcast %219 : vector<1x32xf32> to vector<16x32xf32>
    %241 = arith.addf %239, %240 : vector<16x32xf32>
    %c0_90 = arith.constant 0 : index
    %c0_91 = arith.constant 0 : index
    %242 = vector.load %arg13[%c0_90, %c0_91] : memref<32x96xf32, #tpu.memory_space<vmem>>, vector<32x96xf32>
    %cst_92 = arith.constant dense<0.000000e+00> : vector<16x96xf32>
    %243 = tpu.matmul %241, %242, %cst_92 {dimension_numbers = #tpu.dot_dimension_numbers<[1], [0], [0], [1], [0, 0, 1, 1], [], []>} : vector<16x32xf32>, vector<32x96xf32>, vector<16x96xf32> -> vector<16x96xf32>
    %c0_93 = arith.constant 0 : index
    %c0_94 = arith.constant 0 : index
    %244 = vector.load %arg14[%c0_93, %c0_94] : memref<1x96xf32, #tpu.memory_space<vmem>>, vector<1x96xf32>
    %245 = vector.broadcast %244 : vector<1x96xf32> to vector<16x96xf32>
    %246 = arith.addf %243, %245 : vector<16x96xf32>
    %247 = vector.extract_strided_slice %246 {offsets = [0, 0], sizes = [16, 32], strides = [1, 1]} : vector<16x96xf32> to vector<16x32xf32>
    %248 = vector.extract_strided_slice %246 {offsets = [0, 32], sizes = [16, 32], strides = [1, 1]} : vector<16x96xf32> to vector<16x32xf32>
    %249 = vector.extract_strided_slice %246 {offsets = [0, 64], sizes = [16, 32], strides = [1, 1]} : vector<16x96xf32> to vector<16x32xf32>
    %c0_95 = arith.constant 0 : index
    %c0_96 = arith.constant 0 : index
    %250 = vector.load %arg2[%c0_95, %c0_96] : memref<32x15xf32, #tpu.memory_space<vmem>>, vector<32x15xf32>
    %251 = tpu.iota {dimensions = array<i32: 0>} : vector<8x8x15xi32>
    %252 = tpu.iota {dimensions = array<i32: 1>} : vector<8x8x15xi32>
    %253 = tpu.iota {dimensions = array<i32: 2>} : vector<8x8x15xi32>
    %c7_i32 = arith.constant 7 : i32
    %254 = vector.broadcast %c7_i32 : i32 to vector<8x8x15xi32>
    %255 = arith.subi %254, %251 : vector<8x8x15xi32>
    %256 = arith.addi %255, %252 : vector<8x8x15xi32>
    %257 = arith.cmpi eq, %253, %256 : vector<8x8x15xi32>
    %258 = arith.extui %257 : vector<8x8x15xi1> to vector<8x8x15xi32>
    %259 = arith.sitofp %258 : vector<8x8x15xi32> to vector<8x8x15xf32>
    %c0_97 = arith.constant 0 : index
    %c0_98 = arith.constant 0 : index
    %260 = vector.load %arg15[%c0_97, %c0_98] : memref<4x8xf32, #tpu.memory_space<vmem>>, vector<4x8xf32>
    %c0_99 = arith.constant 0 : index
    %c0_100 = arith.constant 0 : index
    %261 = vector.load %arg16[%c0_99, %c0_100] : memref<4x8xf32, #tpu.memory_space<vmem>>, vector<4x8xf32>
    %262 = vector.extract_strided_slice %247 {offsets = [0, 0], sizes = [8, 8], strides = [1, 1]} : vector<16x32xf32> to vector<8x8xf32>
    %263 = vector.extract_strided_slice %248 {offsets = [0, 0], sizes = [8, 8], strides = [1, 1]} : vector<16x32xf32> to vector<8x8xf32>
    %264 = vector.extract_strided_slice %249 {offsets = [0, 0], sizes = [8, 8], strides = [1, 1]} : vector<16x32xf32> to vector<8x8xf32>
    %265 = vector.extract_strided_slice %250 {offsets = [0, 0], sizes = [8, 15], strides = [1, 1]} : vector<32x15xf32> to vector<8x15xf32>
    %266 = vector.extract_strided_slice %260 {offsets = [0, 0], sizes = [1, 8], strides = [1, 1]} : vector<4x8xf32> to vector<1x8xf32>
    %267 = vector.broadcast %266 : vector<1x8xf32> to vector<8x8xf32>
    %268 = arith.addf %262, %267 : vector<8x8xf32>
    %269 = tpu.transpose %263, [1, 0] : vector<8x8xf32> -> vector<8x8xf32>
    %cst_101 = arith.constant dense<0.000000e+00> : vector<8x8xf32>
    %270 = tpu.matmul %268, %269, %cst_101 {dimension_numbers = #tpu.dot_dimension_numbers<[1], [0], [0], [1], [0, 0, 1, 1], [], []>} : vector<8x8xf32>, vector<8x8xf32>, vector<8x8xf32> -> vector<8x8xf32>
    %271 = vector.extract_strided_slice %261 {offsets = [0, 0], sizes = [1, 8], strides = [1, 1]} : vector<4x8xf32> to vector<1x8xf32>
    %272 = vector.broadcast %271 : vector<1x8xf32> to vector<8x8xf32>
    %273 = arith.addf %262, %272 : vector<8x8xf32>
    %cst_102 = arith.constant dense<0.000000e+00> : vector<8x15xf32>
    %274 = tpu.matmul %273, %265, %cst_102 {dimension_numbers = #tpu.dot_dimension_numbers<[1], [0], [0], [1], [0, 0, 1, 1], [], []>} : vector<8x8xf32>, vector<8x15xf32>, vector<8x15xf32> -> vector<8x15xf32>
    %275 = vector.shape_cast %274 : vector<8x15xf32> to vector<8x1x15xf32>
    %276 = vector.broadcast %275 : vector<8x1x15xf32> to vector<8x8x15xf32>
    %277 = arith.mulf %276, %259 : vector<8x8x15xf32>
    %cst_103 = arith.constant dense<0.000000e+00> : vector<8x8xf32>
    %278 = vector.multi_reduction <add>, %277, %cst_103 [2] : vector<8x8x15xf32> to vector<8x8xf32>
    %279 = arith.addf %270, %278 : vector<8x8xf32>
    %cst_104 = arith.constant 0.353553385 : f32
    %280 = vector.broadcast %cst_104 : f32 to vector<8x8xf32>
    %281 = arith.mulf %279, %280 : vector<8x8xf32>
    %cst_105 = arith.constant dense<0xFF800000> : vector<8xf32>
    %282 = vector.multi_reduction <maximumf>, %281, %cst_105 [1] : vector<8x8xf32> to vector<8xf32>
    %283 = vector.shape_cast %282 : vector<8xf32> to vector<8x1xf32>
    %284 = vector.broadcast %283 : vector<8x1xf32> to vector<8x8xf32>
    %285 = arith.subf %281, %284 : vector<8x8xf32>
    %286 = math.exp %285 : vector<8x8xf32>
    %cst_106 = arith.constant dense<0.000000e+00> : vector<8xf32>
    %287 = vector.multi_reduction <add>, %286, %cst_106 [1] : vector<8x8xf32> to vector<8xf32>
    %288 = vector.shape_cast %287 : vector<8xf32> to vector<8x1xf32>
    %289 = tpu.reciprocal %288 {approx = true} : vector<8x1xf32> -> vector<8x1xf32>
    %290 = vector.broadcast %289 : vector<8x1xf32> to vector<8x8xf32>
    %291 = arith.mulf %286, %290 : vector<8x8xf32>
    %cst_107 = arith.constant dense<0.000000e+00> : vector<8x8xf32>
    %292 = tpu.matmul %291, %264, %cst_107 {dimension_numbers = #tpu.dot_dimension_numbers<[1], [0], [0], [1], [0, 0, 1, 1], [], []>} : vector<8x8xf32>, vector<8x8xf32>, vector<8x8xf32> -> vector<8x8xf32>
    %293 = vector.extract_strided_slice %247 {offsets = [0, 8], sizes = [8, 8], strides = [1, 1]} : vector<16x32xf32> to vector<8x8xf32>
    %294 = vector.extract_strided_slice %248 {offsets = [0, 8], sizes = [8, 8], strides = [1, 1]} : vector<16x32xf32> to vector<8x8xf32>
    %295 = vector.extract_strided_slice %249 {offsets = [0, 8], sizes = [8, 8], strides = [1, 1]} : vector<16x32xf32> to vector<8x8xf32>
    %296 = vector.extract_strided_slice %250 {offsets = [8, 0], sizes = [8, 15], strides = [1, 1]} : vector<32x15xf32> to vector<8x15xf32>
    %297 = vector.extract_strided_slice %260 {offsets = [1, 0], sizes = [1, 8], strides = [1, 1]} : vector<4x8xf32> to vector<1x8xf32>
    %298 = vector.broadcast %297 : vector<1x8xf32> to vector<8x8xf32>
    %299 = arith.addf %293, %298 : vector<8x8xf32>
    %300 = tpu.transpose %294, [1, 0] : vector<8x8xf32> -> vector<8x8xf32>
    %cst_108 = arith.constant dense<0.000000e+00> : vector<8x8xf32>
    %301 = tpu.matmul %299, %300, %cst_108 {dimension_numbers = #tpu.dot_dimension_numbers<[1], [0], [0], [1], [0, 0, 1, 1], [], []>} : vector<8x8xf32>, vector<8x8xf32>, vector<8x8xf32> -> vector<8x8xf32>
    %302 = vector.extract_strided_slice %261 {offsets = [1, 0], sizes = [1, 8], strides = [1, 1]} : vector<4x8xf32> to vector<1x8xf32>
    %303 = vector.broadcast %302 : vector<1x8xf32> to vector<8x8xf32>
    %304 = arith.addf %293, %303 : vector<8x8xf32>
    %cst_109 = arith.constant dense<0.000000e+00> : vector<8x15xf32>
    %305 = tpu.matmul %304, %296, %cst_109 {dimension_numbers = #tpu.dot_dimension_numbers<[1], [0], [0], [1], [0, 0, 1, 1], [], []>} : vector<8x8xf32>, vector<8x15xf32>, vector<8x15xf32> -> vector<8x15xf32>
    %306 = vector.shape_cast %305 : vector<8x15xf32> to vector<8x1x15xf32>
    %307 = vector.broadcast %306 : vector<8x1x15xf32> to vector<8x8x15xf32>
    %308 = arith.mulf %307, %259 : vector<8x8x15xf32>
    %cst_110 = arith.constant dense<0.000000e+00> : vector<8x8xf32>
    %309 = vector.multi_reduction <add>, %308, %cst_110 [2] : vector<8x8x15xf32> to vector<8x8xf32>
    %310 = arith.addf %301, %309 : vector<8x8xf32>
    %cst_111 = arith.constant 0.353553385 : f32
    %311 = vector.broadcast %cst_111 : f32 to vector<8x8xf32>
    %312 = arith.mulf %310, %311 : vector<8x8xf32>
    %cst_112 = arith.constant dense<0xFF800000> : vector<8xf32>
    %313 = vector.multi_reduction <maximumf>, %312, %cst_112 [1] : vector<8x8xf32> to vector<8xf32>
    %314 = vector.shape_cast %313 : vector<8xf32> to vector<8x1xf32>
    %315 = vector.broadcast %314 : vector<8x1xf32> to vector<8x8xf32>
    %316 = arith.subf %312, %315 : vector<8x8xf32>
    %317 = math.exp %316 : vector<8x8xf32>
    %cst_113 = arith.constant dense<0.000000e+00> : vector<8xf32>
    %318 = vector.multi_reduction <add>, %317, %cst_113 [1] : vector<8x8xf32> to vector<8xf32>
    %319 = vector.shape_cast %318 : vector<8xf32> to vector<8x1xf32>
    %320 = tpu.reciprocal %319 {approx = true} : vector<8x1xf32> -> vector<8x1xf32>
    %321 = vector.broadcast %320 : vector<8x1xf32> to vector<8x8xf32>
    %322 = arith.mulf %317, %321 : vector<8x8xf32>
    %cst_114 = arith.constant dense<0.000000e+00> : vector<8x8xf32>
    %323 = tpu.matmul %322, %295, %cst_114 {dimension_numbers = #tpu.dot_dimension_numbers<[1], [0], [0], [1], [0, 0, 1, 1], [], []>} : vector<8x8xf32>, vector<8x8xf32>, vector<8x8xf32> -> vector<8x8xf32>
    %324 = vector.extract_strided_slice %247 {offsets = [0, 16], sizes = [8, 8], strides = [1, 1]} : vector<16x32xf32> to vector<8x8xf32>
    %325 = vector.extract_strided_slice %248 {offsets = [0, 16], sizes = [8, 8], strides = [1, 1]} : vector<16x32xf32> to vector<8x8xf32>
    %326 = vector.extract_strided_slice %249 {offsets = [0, 16], sizes = [8, 8], strides = [1, 1]} : vector<16x32xf32> to vector<8x8xf32>
    %327 = vector.extract_strided_slice %250 {offsets = [16, 0], sizes = [8, 15], strides = [1, 1]} : vector<32x15xf32> to vector<8x15xf32>
    %328 = vector.extract_strided_slice %260 {offsets = [2, 0], sizes = [1, 8], strides = [1, 1]} : vector<4x8xf32> to vector<1x8xf32>
    %329 = vector.broadcast %328 : vector<1x8xf32> to vector<8x8xf32>
    %330 = arith.addf %324, %329 : vector<8x8xf32>
    %331 = tpu.transpose %325, [1, 0] : vector<8x8xf32> -> vector<8x8xf32>
    %cst_115 = arith.constant dense<0.000000e+00> : vector<8x8xf32>
    %332 = tpu.matmul %330, %331, %cst_115 {dimension_numbers = #tpu.dot_dimension_numbers<[1], [0], [0], [1], [0, 0, 1, 1], [], []>} : vector<8x8xf32>, vector<8x8xf32>, vector<8x8xf32> -> vector<8x8xf32>
    %333 = vector.extract_strided_slice %261 {offsets = [2, 0], sizes = [1, 8], strides = [1, 1]} : vector<4x8xf32> to vector<1x8xf32>
    %334 = vector.broadcast %333 : vector<1x8xf32> to vector<8x8xf32>
    %335 = arith.addf %324, %334 : vector<8x8xf32>
    %cst_116 = arith.constant dense<0.000000e+00> : vector<8x15xf32>
    %336 = tpu.matmul %335, %327, %cst_116 {dimension_numbers = #tpu.dot_dimension_numbers<[1], [0], [0], [1], [0, 0, 1, 1], [], []>} : vector<8x8xf32>, vector<8x15xf32>, vector<8x15xf32> -> vector<8x15xf32>
    %337 = vector.shape_cast %336 : vector<8x15xf32> to vector<8x1x15xf32>
    %338 = vector.broadcast %337 : vector<8x1x15xf32> to vector<8x8x15xf32>
    %339 = arith.mulf %338, %259 : vector<8x8x15xf32>
    %cst_117 = arith.constant dense<0.000000e+00> : vector<8x8xf32>
    %340 = vector.multi_reduction <add>, %339, %cst_117 [2] : vector<8x8x15xf32> to vector<8x8xf32>
    %341 = arith.addf %332, %340 : vector<8x8xf32>
    %cst_118 = arith.constant 0.353553385 : f32
    %342 = vector.broadcast %cst_118 : f32 to vector<8x8xf32>
    %343 = arith.mulf %341, %342 : vector<8x8xf32>
    %cst_119 = arith.constant dense<0xFF800000> : vector<8xf32>
    %344 = vector.multi_reduction <maximumf>, %343, %cst_119 [1] : vector<8x8xf32> to vector<8xf32>
    %345 = vector.shape_cast %344 : vector<8xf32> to vector<8x1xf32>
    %346 = vector.broadcast %345 : vector<8x1xf32> to vector<8x8xf32>
    %347 = arith.subf %343, %346 : vector<8x8xf32>
    %348 = math.exp %347 : vector<8x8xf32>
    %cst_120 = arith.constant dense<0.000000e+00> : vector<8xf32>
    %349 = vector.multi_reduction <add>, %348, %cst_120 [1] : vector<8x8xf32> to vector<8xf32>
    %350 = vector.shape_cast %349 : vector<8xf32> to vector<8x1xf32>
    %351 = tpu.reciprocal %350 {approx = true} : vector<8x1xf32> -> vector<8x1xf32>
    %352 = vector.broadcast %351 : vector<8x1xf32> to vector<8x8xf32>
    %353 = arith.mulf %348, %352 : vector<8x8xf32>
    %cst_121 = arith.constant dense<0.000000e+00> : vector<8x8xf32>
    %354 = tpu.matmul %353, %326, %cst_121 {dimension_numbers = #tpu.dot_dimension_numbers<[1], [0], [0], [1], [0, 0, 1, 1], [], []>} : vector<8x8xf32>, vector<8x8xf32>, vector<8x8xf32> -> vector<8x8xf32>
    %355 = vector.extract_strided_slice %247 {offsets = [0, 24], sizes = [8, 8], strides = [1, 1]} : vector<16x32xf32> to vector<8x8xf32>
    %356 = vector.extract_strided_slice %248 {offsets = [0, 24], sizes = [8, 8], strides = [1, 1]} : vector<16x32xf32> to vector<8x8xf32>
    %357 = vector.extract_strided_slice %249 {offsets = [0, 24], sizes = [8, 8], strides = [1, 1]} : vector<16x32xf32> to vector<8x8xf32>
    %358 = vector.extract_strided_slice %250 {offsets = [24, 0], sizes = [8, 15], strides = [1, 1]} : vector<32x15xf32> to vector<8x15xf32>
    %359 = vector.extract_strided_slice %260 {offsets = [3, 0], sizes = [1, 8], strides = [1, 1]} : vector<4x8xf32> to vector<1x8xf32>
    %360 = vector.broadcast %359 : vector<1x8xf32> to vector<8x8xf32>
    %361 = arith.addf %355, %360 : vector<8x8xf32>
    %362 = tpu.transpose %356, [1, 0] : vector<8x8xf32> -> vector<8x8xf32>
    %cst_122 = arith.constant dense<0.000000e+00> : vector<8x8xf32>
    %363 = tpu.matmul %361, %362, %cst_122 {dimension_numbers = #tpu.dot_dimension_numbers<[1], [0], [0], [1], [0, 0, 1, 1], [], []>} : vector<8x8xf32>, vector<8x8xf32>, vector<8x8xf32> -> vector<8x8xf32>
    %364 = vector.extract_strided_slice %261 {offsets = [3, 0], sizes = [1, 8], strides = [1, 1]} : vector<4x8xf32> to vector<1x8xf32>
    %365 = vector.broadcast %364 : vector<1x8xf32> to vector<8x8xf32>
    %366 = arith.addf %355, %365 : vector<8x8xf32>
    %cst_123 = arith.constant dense<0.000000e+00> : vector<8x15xf32>
    %367 = tpu.matmul %366, %358, %cst_123 {dimension_numbers = #tpu.dot_dimension_numbers<[1], [0], [0], [1], [0, 0, 1, 1], [], []>} : vector<8x8xf32>, vector<8x15xf32>, vector<8x15xf32> -> vector<8x15xf32>
    %368 = vector.shape_cast %367 : vector<8x15xf32> to vector<8x1x15xf32>
    %369 = vector.broadcast %368 : vector<8x1x15xf32> to vector<8x8x15xf32>
    %370 = arith.mulf %369, %259 : vector<8x8x15xf32>
    %cst_124 = arith.constant dense<0.000000e+00> : vector<8x8xf32>
    %371 = vector.multi_reduction <add>, %370, %cst_124 [2] : vector<8x8x15xf32> to vector<8x8xf32>
    %372 = arith.addf %363, %371 : vector<8x8xf32>
    %cst_125 = arith.constant 0.353553385 : f32
    %373 = vector.broadcast %cst_125 : f32 to vector<8x8xf32>
    %374 = arith.mulf %372, %373 : vector<8x8xf32>
    %cst_126 = arith.constant dense<0xFF800000> : vector<8xf32>
    %375 = vector.multi_reduction <maximumf>, %374, %cst_126 [1] : vector<8x8xf32> to vector<8xf32>
    %376 = vector.shape_cast %375 : vector<8xf32> to vector<8x1xf32>
    %377 = vector.broadcast %376 : vector<8x1xf32> to vector<8x8xf32>
    %378 = arith.subf %374, %377 : vector<8x8xf32>
    %379 = math.exp %378 : vector<8x8xf32>
    %cst_127 = arith.constant dense<0.000000e+00> : vector<8xf32>
    %380 = vector.multi_reduction <add>, %379, %cst_127 [1] : vector<8x8xf32> to vector<8xf32>
    %381 = vector.shape_cast %380 : vector<8xf32> to vector<8x1xf32>
    %382 = tpu.reciprocal %381 {approx = true} : vector<8x1xf32> -> vector<8x1xf32>
    %383 = vector.broadcast %382 : vector<8x1xf32> to vector<8x8xf32>
    %384 = arith.mulf %379, %383 : vector<8x8xf32>
    %cst_128 = arith.constant dense<0.000000e+00> : vector<8x8xf32>
    %385 = tpu.matmul %384, %357, %cst_128 {dimension_numbers = #tpu.dot_dimension_numbers<[1], [0], [0], [1], [0, 0, 1, 1], [], []>} : vector<8x8xf32>, vector<8x8xf32>, vector<8x8xf32> -> vector<8x8xf32>
    %386 = tpu.concatenate %292, %323, %354, %385 in 1 : vector<8x8xf32>, vector<8x8xf32>, vector<8x8xf32>, vector<8x8xf32> -> vector<8x32xf32>
    %387 = vector.extract_strided_slice %247 {offsets = [8, 0], sizes = [8, 8], strides = [1, 1]} : vector<16x32xf32> to vector<8x8xf32>
    %388 = vector.extract_strided_slice %248 {offsets = [8, 0], sizes = [8, 8], strides = [1, 1]} : vector<16x32xf32> to vector<8x8xf32>
    %389 = vector.extract_strided_slice %249 {offsets = [8, 0], sizes = [8, 8], strides = [1, 1]} : vector<16x32xf32> to vector<8x8xf32>
    %390 = vector.extract_strided_slice %250 {offsets = [0, 0], sizes = [8, 15], strides = [1, 1]} : vector<32x15xf32> to vector<8x15xf32>
    %391 = vector.extract_strided_slice %260 {offsets = [0, 0], sizes = [1, 8], strides = [1, 1]} : vector<4x8xf32> to vector<1x8xf32>
    %392 = vector.broadcast %391 : vector<1x8xf32> to vector<8x8xf32>
    %393 = arith.addf %387, %392 : vector<8x8xf32>
    %394 = tpu.transpose %388, [1, 0] : vector<8x8xf32> -> vector<8x8xf32>
    %cst_129 = arith.constant dense<0.000000e+00> : vector<8x8xf32>
    %395 = tpu.matmul %393, %394, %cst_129 {dimension_numbers = #tpu.dot_dimension_numbers<[1], [0], [0], [1], [0, 0, 1, 1], [], []>} : vector<8x8xf32>, vector<8x8xf32>, vector<8x8xf32> -> vector<8x8xf32>
    %396 = vector.extract_strided_slice %261 {offsets = [0, 0], sizes = [1, 8], strides = [1, 1]} : vector<4x8xf32> to vector<1x8xf32>
    %397 = vector.broadcast %396 : vector<1x8xf32> to vector<8x8xf32>
    %398 = arith.addf %387, %397 : vector<8x8xf32>
    %cst_130 = arith.constant dense<0.000000e+00> : vector<8x15xf32>
    %399 = tpu.matmul %398, %390, %cst_130 {dimension_numbers = #tpu.dot_dimension_numbers<[1], [0], [0], [1], [0, 0, 1, 1], [], []>} : vector<8x8xf32>, vector<8x15xf32>, vector<8x15xf32> -> vector<8x15xf32>
    %400 = vector.shape_cast %399 : vector<8x15xf32> to vector<8x1x15xf32>
    %401 = vector.broadcast %400 : vector<8x1x15xf32> to vector<8x8x15xf32>
    %402 = arith.mulf %401, %259 : vector<8x8x15xf32>
    %cst_131 = arith.constant dense<0.000000e+00> : vector<8x8xf32>
    %403 = vector.multi_reduction <add>, %402, %cst_131 [2] : vector<8x8x15xf32> to vector<8x8xf32>
    %404 = arith.addf %395, %403 : vector<8x8xf32>
    %cst_132 = arith.constant 0.353553385 : f32
    %405 = vector.broadcast %cst_132 : f32 to vector<8x8xf32>
    %406 = arith.mulf %404, %405 : vector<8x8xf32>
    %cst_133 = arith.constant dense<0xFF800000> : vector<8xf32>
    %407 = vector.multi_reduction <maximumf>, %406, %cst_133 [1] : vector<8x8xf32> to vector<8xf32>
    %408 = vector.shape_cast %407 : vector<8xf32> to vector<8x1xf32>
    %409 = vector.broadcast %408 : vector<8x1xf32> to vector<8x8xf32>
    %410 = arith.subf %406, %409 : vector<8x8xf32>
    %411 = math.exp %410 : vector<8x8xf32>
    %cst_134 = arith.constant dense<0.000000e+00> : vector<8xf32>
    %412 = vector.multi_reduction <add>, %411, %cst_134 [1] : vector<8x8xf32> to vector<8xf32>
    %413 = vector.shape_cast %412 : vector<8xf32> to vector<8x1xf32>
    %414 = tpu.reciprocal %413 {approx = true} : vector<8x1xf32> -> vector<8x1xf32>
    %415 = vector.broadcast %414 : vector<8x1xf32> to vector<8x8xf32>
    %416 = arith.mulf %411, %415 : vector<8x8xf32>
    %cst_135 = arith.constant dense<0.000000e+00> : vector<8x8xf32>
    %417 = tpu.matmul %416, %389, %cst_135 {dimension_numbers = #tpu.dot_dimension_numbers<[1], [0], [0], [1], [0, 0, 1, 1], [], []>} : vector<8x8xf32>, vector<8x8xf32>, vector<8x8xf32> -> vector<8x8xf32>
    %418 = vector.extract_strided_slice %247 {offsets = [8, 8], sizes = [8, 8], strides = [1, 1]} : vector<16x32xf32> to vector<8x8xf32>
    %419 = vector.extract_strided_slice %248 {offsets = [8, 8], sizes = [8, 8], strides = [1, 1]} : vector<16x32xf32> to vector<8x8xf32>
    %420 = vector.extract_strided_slice %249 {offsets = [8, 8], sizes = [8, 8], strides = [1, 1]} : vector<16x32xf32> to vector<8x8xf32>
    %421 = vector.extract_strided_slice %250 {offsets = [8, 0], sizes = [8, 15], strides = [1, 1]} : vector<32x15xf32> to vector<8x15xf32>
    %422 = vector.extract_strided_slice %260 {offsets = [1, 0], sizes = [1, 8], strides = [1, 1]} : vector<4x8xf32> to vector<1x8xf32>
    %423 = vector.broadcast %422 : vector<1x8xf32> to vector<8x8xf32>
    %424 = arith.addf %418, %423 : vector<8x8xf32>
    %425 = tpu.transpose %419, [1, 0] : vector<8x8xf32> -> vector<8x8xf32>
    %cst_136 = arith.constant dense<0.000000e+00> : vector<8x8xf32>
    %426 = tpu.matmul %424, %425, %cst_136 {dimension_numbers = #tpu.dot_dimension_numbers<[1], [0], [0], [1], [0, 0, 1, 1], [], []>} : vector<8x8xf32>, vector<8x8xf32>, vector<8x8xf32> -> vector<8x8xf32>
    %427 = vector.extract_strided_slice %261 {offsets = [1, 0], sizes = [1, 8], strides = [1, 1]} : vector<4x8xf32> to vector<1x8xf32>
    %428 = vector.broadcast %427 : vector<1x8xf32> to vector<8x8xf32>
    %429 = arith.addf %418, %428 : vector<8x8xf32>
    %cst_137 = arith.constant dense<0.000000e+00> : vector<8x15xf32>
    %430 = tpu.matmul %429, %421, %cst_137 {dimension_numbers = #tpu.dot_dimension_numbers<[1], [0], [0], [1], [0, 0, 1, 1], [], []>} : vector<8x8xf32>, vector<8x15xf32>, vector<8x15xf32> -> vector<8x15xf32>
    %431 = vector.shape_cast %430 : vector<8x15xf32> to vector<8x1x15xf32>
    %432 = vector.broadcast %431 : vector<8x1x15xf32> to vector<8x8x15xf32>
    %433 = arith.mulf %432, %259 : vector<8x8x15xf32>
    %cst_138 = arith.constant dense<0.000000e+00> : vector<8x8xf32>
    %434 = vector.multi_reduction <add>, %433, %cst_138 [2] : vector<8x8x15xf32> to vector<8x8xf32>
    %435 = arith.addf %426, %434 : vector<8x8xf32>
    %cst_139 = arith.constant 0.353553385 : f32
    %436 = vector.broadcast %cst_139 : f32 to vector<8x8xf32>
    %437 = arith.mulf %435, %436 : vector<8x8xf32>
    %cst_140 = arith.constant dense<0xFF800000> : vector<8xf32>
    %438 = vector.multi_reduction <maximumf>, %437, %cst_140 [1] : vector<8x8xf32> to vector<8xf32>
    %439 = vector.shape_cast %438 : vector<8xf32> to vector<8x1xf32>
    %440 = vector.broadcast %439 : vector<8x1xf32> to vector<8x8xf32>
    %441 = arith.subf %437, %440 : vector<8x8xf32>
    %442 = math.exp %441 : vector<8x8xf32>
    %cst_141 = arith.constant dense<0.000000e+00> : vector<8xf32>
    %443 = vector.multi_reduction <add>, %442, %cst_141 [1] : vector<8x8xf32> to vector<8xf32>
    %444 = vector.shape_cast %443 : vector<8xf32> to vector<8x1xf32>
    %445 = tpu.reciprocal %444 {approx = true} : vector<8x1xf32> -> vector<8x1xf32>
    %446 = vector.broadcast %445 : vector<8x1xf32> to vector<8x8xf32>
    %447 = arith.mulf %442, %446 : vector<8x8xf32>
    %cst_142 = arith.constant dense<0.000000e+00> : vector<8x8xf32>
    %448 = tpu.matmul %447, %420, %cst_142 {dimension_numbers = #tpu.dot_dimension_numbers<[1], [0], [0], [1], [0, 0, 1, 1], [], []>} : vector<8x8xf32>, vector<8x8xf32>, vector<8x8xf32> -> vector<8x8xf32>
    %449 = vector.extract_strided_slice %247 {offsets = [8, 16], sizes = [8, 8], strides = [1, 1]} : vector<16x32xf32> to vector<8x8xf32>
    %450 = vector.extract_strided_slice %248 {offsets = [8, 16], sizes = [8, 8], strides = [1, 1]} : vector<16x32xf32> to vector<8x8xf32>
    %451 = vector.extract_strided_slice %249 {offsets = [8, 16], sizes = [8, 8], strides = [1, 1]} : vector<16x32xf32> to vector<8x8xf32>
    %452 = vector.extract_strided_slice %250 {offsets = [16, 0], sizes = [8, 15], strides = [1, 1]} : vector<32x15xf32> to vector<8x15xf32>
    %453 = vector.extract_strided_slice %260 {offsets = [2, 0], sizes = [1, 8], strides = [1, 1]} : vector<4x8xf32> to vector<1x8xf32>
    %454 = vector.broadcast %453 : vector<1x8xf32> to vector<8x8xf32>
    %455 = arith.addf %449, %454 : vector<8x8xf32>
    %456 = tpu.transpose %450, [1, 0] : vector<8x8xf32> -> vector<8x8xf32>
    %cst_143 = arith.constant dense<0.000000e+00> : vector<8x8xf32>
    %457 = tpu.matmul %455, %456, %cst_143 {dimension_numbers = #tpu.dot_dimension_numbers<[1], [0], [0], [1], [0, 0, 1, 1], [], []>} : vector<8x8xf32>, vector<8x8xf32>, vector<8x8xf32> -> vector<8x8xf32>
    %458 = vector.extract_strided_slice %261 {offsets = [2, 0], sizes = [1, 8], strides = [1, 1]} : vector<4x8xf32> to vector<1x8xf32>
    %459 = vector.broadcast %458 : vector<1x8xf32> to vector<8x8xf32>
    %460 = arith.addf %449, %459 : vector<8x8xf32>
    %cst_144 = arith.constant dense<0.000000e+00> : vector<8x15xf32>
    %461 = tpu.matmul %460, %452, %cst_144 {dimension_numbers = #tpu.dot_dimension_numbers<[1], [0], [0], [1], [0, 0, 1, 1], [], []>} : vector<8x8xf32>, vector<8x15xf32>, vector<8x15xf32> -> vector<8x15xf32>
    %462 = vector.shape_cast %461 : vector<8x15xf32> to vector<8x1x15xf32>
    %463 = vector.broadcast %462 : vector<8x1x15xf32> to vector<8x8x15xf32>
    %464 = arith.mulf %463, %259 : vector<8x8x15xf32>
    %cst_145 = arith.constant dense<0.000000e+00> : vector<8x8xf32>
    %465 = vector.multi_reduction <add>, %464, %cst_145 [2] : vector<8x8x15xf32> to vector<8x8xf32>
    %466 = arith.addf %457, %465 : vector<8x8xf32>
    %cst_146 = arith.constant 0.353553385 : f32
    %467 = vector.broadcast %cst_146 : f32 to vector<8x8xf32>
    %468 = arith.mulf %466, %467 : vector<8x8xf32>
    %cst_147 = arith.constant dense<0xFF800000> : vector<8xf32>
    %469 = vector.multi_reduction <maximumf>, %468, %cst_147 [1] : vector<8x8xf32> to vector<8xf32>
    %470 = vector.shape_cast %469 : vector<8xf32> to vector<8x1xf32>
    %471 = vector.broadcast %470 : vector<8x1xf32> to vector<8x8xf32>
    %472 = arith.subf %468, %471 : vector<8x8xf32>
    %473 = math.exp %472 : vector<8x8xf32>
    %cst_148 = arith.constant dense<0.000000e+00> : vector<8xf32>
    %474 = vector.multi_reduction <add>, %473, %cst_148 [1] : vector<8x8xf32> to vector<8xf32>
    %475 = vector.shape_cast %474 : vector<8xf32> to vector<8x1xf32>
    %476 = tpu.reciprocal %475 {approx = true} : vector<8x1xf32> -> vector<8x1xf32>
    %477 = vector.broadcast %476 : vector<8x1xf32> to vector<8x8xf32>
    %478 = arith.mulf %473, %477 : vector<8x8xf32>
    %cst_149 = arith.constant dense<0.000000e+00> : vector<8x8xf32>
    %479 = tpu.matmul %478, %451, %cst_149 {dimension_numbers = #tpu.dot_dimension_numbers<[1], [0], [0], [1], [0, 0, 1, 1], [], []>} : vector<8x8xf32>, vector<8x8xf32>, vector<8x8xf32> -> vector<8x8xf32>
    %480 = vector.extract_strided_slice %247 {offsets = [8, 24], sizes = [8, 8], strides = [1, 1]} : vector<16x32xf32> to vector<8x8xf32>
    %481 = vector.extract_strided_slice %248 {offsets = [8, 24], sizes = [8, 8], strides = [1, 1]} : vector<16x32xf32> to vector<8x8xf32>
    %482 = vector.extract_strided_slice %249 {offsets = [8, 24], sizes = [8, 8], strides = [1, 1]} : vector<16x32xf32> to vector<8x8xf32>
    %483 = vector.extract_strided_slice %250 {offsets = [24, 0], sizes = [8, 15], strides = [1, 1]} : vector<32x15xf32> to vector<8x15xf32>
    %484 = vector.extract_strided_slice %260 {offsets = [3, 0], sizes = [1, 8], strides = [1, 1]} : vector<4x8xf32> to vector<1x8xf32>
    %485 = vector.broadcast %484 : vector<1x8xf32> to vector<8x8xf32>
    %486 = arith.addf %480, %485 : vector<8x8xf32>
    %487 = tpu.transpose %481, [1, 0] : vector<8x8xf32> -> vector<8x8xf32>
    %cst_150 = arith.constant dense<0.000000e+00> : vector<8x8xf32>
    %488 = tpu.matmul %486, %487, %cst_150 {dimension_numbers = #tpu.dot_dimension_numbers<[1], [0], [0], [1], [0, 0, 1, 1], [], []>} : vector<8x8xf32>, vector<8x8xf32>, vector<8x8xf32> -> vector<8x8xf32>
    %489 = vector.extract_strided_slice %261 {offsets = [3, 0], sizes = [1, 8], strides = [1, 1]} : vector<4x8xf32> to vector<1x8xf32>
    %490 = vector.broadcast %489 : vector<1x8xf32> to vector<8x8xf32>
    %491 = arith.addf %480, %490 : vector<8x8xf32>
    %cst_151 = arith.constant dense<0.000000e+00> : vector<8x15xf32>
    %492 = tpu.matmul %491, %483, %cst_151 {dimension_numbers = #tpu.dot_dimension_numbers<[1], [0], [0], [1], [0, 0, 1, 1], [], []>} : vector<8x8xf32>, vector<8x15xf32>, vector<8x15xf32> -> vector<8x15xf32>
    %493 = vector.shape_cast %492 : vector<8x15xf32> to vector<8x1x15xf32>
    %494 = vector.broadcast %493 : vector<8x1x15xf32> to vector<8x8x15xf32>
    %495 = arith.mulf %494, %259 : vector<8x8x15xf32>
    %cst_152 = arith.constant dense<0.000000e+00> : vector<8x8xf32>
    %496 = vector.multi_reduction <add>, %495, %cst_152 [2] : vector<8x8x15xf32> to vector<8x8xf32>
    %497 = arith.addf %488, %496 : vector<8x8xf32>
    %cst_153 = arith.constant 0.353553385 : f32
    %498 = vector.broadcast %cst_153 : f32 to vector<8x8xf32>
    %499 = arith.mulf %497, %498 : vector<8x8xf32>
    %cst_154 = arith.constant dense<0xFF800000> : vector<8xf32>
    %500 = vector.multi_reduction <maximumf>, %499, %cst_154 [1] : vector<8x8xf32> to vector<8xf32>
    %501 = vector.shape_cast %500 : vector<8xf32> to vector<8x1xf32>
    %502 = vector.broadcast %501 : vector<8x1xf32> to vector<8x8xf32>
    %503 = arith.subf %499, %502 : vector<8x8xf32>
    %504 = math.exp %503 : vector<8x8xf32>
    %cst_155 = arith.constant dense<0.000000e+00> : vector<8xf32>
    %505 = vector.multi_reduction <add>, %504, %cst_155 [1] : vector<8x8xf32> to vector<8xf32>
    %506 = vector.shape_cast %505 : vector<8xf32> to vector<8x1xf32>
    %507 = tpu.reciprocal %506 {approx = true} : vector<8x1xf32> -> vector<8x1xf32>
    %508 = vector.broadcast %507 : vector<8x1xf32> to vector<8x8xf32>
    %509 = arith.mulf %504, %508 : vector<8x8xf32>
    %cst_156 = arith.constant dense<0.000000e+00> : vector<8x8xf32>
    %510 = tpu.matmul %509, %482, %cst_156 {dimension_numbers = #tpu.dot_dimension_numbers<[1], [0], [0], [1], [0, 0, 1, 1], [], []>} : vector<8x8xf32>, vector<8x8xf32>, vector<8x8xf32> -> vector<8x8xf32>
    %511 = tpu.concatenate %417, %448, %479, %510 in 1 : vector<8x8xf32>, vector<8x8xf32>, vector<8x8xf32>, vector<8x8xf32> -> vector<8x32xf32>
    %512 = tpu.concatenate %386, %511 in 0 : vector<8x32xf32>, vector<8x32xf32> -> vector<16x32xf32>
    %c0_157 = arith.constant 0 : index
    %c0_158 = arith.constant 0 : index
    %513 = vector.load %arg17[%c0_157, %c0_158] : memref<32x32xf32, #tpu.memory_space<vmem>>, vector<32x32xf32>
    %cst_159 = arith.constant dense<0.000000e+00> : vector<16x32xf32>
    %514 = tpu.matmul %512, %513, %cst_159 {dimension_numbers = #tpu.dot_dimension_numbers<[1], [0], [0], [1], [0, 0, 1, 1], [], []>} : vector<16x32xf32>, vector<32x32xf32>, vector<16x32xf32> -> vector<16x32xf32>
    %c0_160 = arith.constant 0 : index
    %c0_161 = arith.constant 0 : index
    %515 = vector.load %arg18[%c0_160, %c0_161] : memref<1x32xf32, #tpu.memory_space<vmem>>, vector<1x32xf32>
    %516 = vector.broadcast %515 : vector<1x32xf32> to vector<16x32xf32>
    %517 = arith.addf %514, %516 : vector<16x32xf32>
    %518 = arith.addf %217, %517 : vector<16x32xf32>
    %c0_162 = arith.constant 0 : index
    %c0_163 = arith.constant 0 : index
    %519 = vector.load %arg19[%c0_162, %c0_163] : memref<1x32xf32, #tpu.memory_space<vmem>>, vector<1x32xf32>
    %c0_164 = arith.constant 0 : index
    %c0_165 = arith.constant 0 : index
    %520 = vector.load %arg20[%c0_164, %c0_165] : memref<1x32xf32, #tpu.memory_space<vmem>>, vector<1x32xf32>
    %cst_166 = arith.constant dense<0.000000e+00> : vector<16xf32>
    %521 = vector.multi_reduction <add>, %518, %cst_166 [1] : vector<16x32xf32> to vector<16xf32>
    %522 = vector.shape_cast %521 : vector<16xf32> to vector<16x1xf32>
    %cst_167 = arith.constant 3.200000e+01 : f32
    %523 = vector.broadcast %cst_167 : f32 to vector<16x1xf32>
    %524 = arith.divf %522, %523 : vector<16x1xf32>
    %525 = vector.broadcast %524 : vector<16x1xf32> to vector<16x32xf32>
    %526 = arith.subf %518, %525 : vector<16x32xf32>
    %527 = arith.mulf %526, %526 : vector<16x32xf32>
    %cst_168 = arith.constant dense<0.000000e+00> : vector<16xf32>
    %528 = vector.multi_reduction <add>, %527, %cst_168 [1] : vector<16x32xf32> to vector<16xf32>
    %529 = vector.shape_cast %528 : vector<16xf32> to vector<16x1xf32>
    %cst_169 = arith.constant 3.200000e+01 : f32
    %530 = vector.broadcast %cst_169 : f32 to vector<16x1xf32>
    %531 = arith.divf %529, %530 : vector<16x1xf32>
    %532 = vector.broadcast %524 : vector<16x1xf32> to vector<16x32xf32>
    %533 = arith.subf %518, %532 : vector<16x32xf32>
    %cst_170 = arith.constant 9.99999974E-6 : f32
    %534 = vector.broadcast %cst_170 : f32 to vector<16x1xf32>
    %535 = arith.addf %531, %534 : vector<16x1xf32>
    %536 = math.rsqrt %535 : vector<16x1xf32>
    %537 = vector.broadcast %536 : vector<16x1xf32> to vector<16x32xf32>
    %538 = arith.mulf %533, %537 : vector<16x32xf32>
    %539 = vector.broadcast %519 : vector<1x32xf32> to vector<16x32xf32>
    %540 = arith.mulf %538, %539 : vector<16x32xf32>
    %541 = vector.broadcast %520 : vector<1x32xf32> to vector<16x32xf32>
    %542 = arith.addf %540, %541 : vector<16x32xf32>
    %c0_171 = arith.constant 0 : index
    %c0_172 = arith.constant 0 : index
    %543 = vector.load %arg21[%c0_171, %c0_172] : memref<32x64xf32, #tpu.memory_space<vmem>>, vector<32x64xf32>
    %cst_173 = arith.constant dense<0.000000e+00> : vector<16x64xf32>
    %544 = tpu.matmul %542, %543, %cst_173 {dimension_numbers = #tpu.dot_dimension_numbers<[1], [0], [0], [1], [0, 0, 1, 1], [], []>} : vector<16x32xf32>, vector<32x64xf32>, vector<16x64xf32> -> vector<16x64xf32>
    %c0_174 = arith.constant 0 : index
    %c0_175 = arith.constant 0 : index
    %545 = vector.load %arg22[%c0_174, %c0_175] : memref<1x64xf32, #tpu.memory_space<vmem>>, vector<1x64xf32>
    %546 = vector.broadcast %545 : vector<1x64xf32> to vector<16x64xf32>
    %547 = arith.addf %544, %546 : vector<16x64xf32>
    %548 = vector.extract_strided_slice %547 {offsets = [0, 0], sizes = [16, 32], strides = [1, 1]} : vector<16x64xf32> to vector<16x32xf32>
    %549 = vector.extract_strided_slice %547 {offsets = [0, 32], sizes = [16, 32], strides = [1, 1]} : vector<16x64xf32> to vector<16x32xf32>
    %550 = arith.negf %549 : vector<16x32xf32>
    %551 = math.exp %550 : vector<16x32xf32>
    %cst_176 = arith.constant 1.000000e+00 : f32
    %552 = vector.broadcast %cst_176 : f32 to vector<16x32xf32>
    %553 = arith.addf %552, %551 : vector<16x32xf32>
    %554 = arith.divf %552, %553 : vector<16x32xf32>
    %555 = arith.mulf %548, %554 : vector<16x32xf32>
    %cst_177 = arith.constant 0.000000e+00 : f32
    %556 = vector.broadcast %cst_177 : f32 to vector<2x32xf32>
    %557 = tpu.concatenate %556, %555, %556 in 0 : vector<2x32xf32>, vector<16x32xf32>, vector<2x32xf32> -> vector<20x32xf32>
    %558 = tpu.iota {dimensions = array<i32: 0>} : vector<16x1xi32>
    %c8_i32 = arith.constant 8 : i32
    %c0_i32 = arith.constant 0 : i32
    %559 = arith.cmpi eq, %c8_i32, %c0_i32 : i32
    %c1_i32 = arith.constant 1 : i32
    %560 = arith.select %559, %c1_i32, %c8_i32 : i32
    %561 = vector.broadcast %560 : i32 to vector<16x1xi32>
    %562 = arith.remsi %558, %561 : vector<16x1xi32>
    %c0_i32_178 = arith.constant 0 : i32
    %563 = vector.broadcast %c0_i32_178 : i32 to vector<16x1xi32>
    %564 = arith.cmpi ne, %562, %563 : vector<16x1xi32>
    %c0_i32_179 = arith.constant 0 : i32
    %565 = vector.broadcast %c0_i32_179 : i32 to vector<16x1xi32>
    %566 = arith.cmpi slt, %562, %565 : vector<16x1xi32>
    %c0_i32_180 = arith.constant 0 : i32
    %567 = arith.cmpi slt, %560, %c0_i32_180 : i32
    %568 = vector.broadcast %567 : i1 to vector<16x1xi1>
    %569 = vector.broadcast %568 : vector<16x1xi1> to vector<16x1xi1>
    %570 = arith.xori %566, %569 : vector<16x1xi1>
    %571 = arith.andi %570, %564 : vector<16x1xi1>
    %572 = vector.broadcast %560 : i32 to vector<16x1xi32>
    %573 = arith.addi %562, %572 : vector<16x1xi32>
    %574 = arith.select %571, %573, %562 : vector<16x1xi1>, vector<16x1xi32>
    %c0_181 = arith.constant 0 : index
    %c0_182 = arith.constant 0 : index
    %575 = vector.load %arg23[%c0_181, %c0_182] : memref<5x32xf32, #tpu.memory_space<vmem>>, vector<5x32xf32>
    %c-2_i32 = arith.constant -2 : i32
    %576 = vector.broadcast %c-2_i32 : i32 to vector<16x1xi32>
    %577 = arith.addi %574, %576 : vector<16x1xi32>
    %c0_i32_183 = arith.constant 0 : i32
    %578 = vector.broadcast %c0_i32_183 : i32 to vector<16x1xi32>
    %579 = arith.cmpi sge, %577, %578 : vector<16x1xi32>
    %c-2_i32_184 = arith.constant -2 : i32
    %580 = vector.broadcast %c-2_i32_184 : i32 to vector<16x1xi32>
    %581 = arith.addi %574, %580 : vector<16x1xi32>
    %c8_i32_185 = arith.constant 8 : i32
    %582 = vector.broadcast %c8_i32_185 : i32 to vector<16x1xi32>
    %583 = arith.cmpi slt, %581, %582 : vector<16x1xi32>
    %584 = arith.andi %579, %583 : vector<16x1xi1>
    %585 = arith.extui %584 : vector<16x1xi1> to vector<16x1xi32>
    %586 = arith.sitofp %585 : vector<16x1xi32> to vector<16x1xf32>
    %587 = vector.extract_strided_slice %557 {offsets = [0, 0], sizes = [16, 32], strides = [1, 1]} : vector<20x32xf32> to vector<16x32xf32>
    %588 = vector.broadcast %586 : vector<16x1xf32> to vector<16x32xf32>
    %589 = arith.mulf %587, %588 : vector<16x32xf32>
    %590 = vector.extract_strided_slice %575 {offsets = [0, 0], sizes = [1, 32], strides = [1, 1]} : vector<5x32xf32> to vector<1x32xf32>
    %591 = vector.broadcast %590 : vector<1x32xf32> to vector<16x32xf32>
    %592 = arith.mulf %589, %591 : vector<16x32xf32>
    %c-1_i32 = arith.constant -1 : i32
    %593 = vector.broadcast %c-1_i32 : i32 to vector<16x1xi32>
    %594 = arith.addi %574, %593 : vector<16x1xi32>
    %c0_i32_186 = arith.constant 0 : i32
    %595 = vector.broadcast %c0_i32_186 : i32 to vector<16x1xi32>
    %596 = arith.cmpi sge, %594, %595 : vector<16x1xi32>
    %c-1_i32_187 = arith.constant -1 : i32
    %597 = vector.broadcast %c-1_i32_187 : i32 to vector<16x1xi32>
    %598 = arith.addi %574, %597 : vector<16x1xi32>
    %c8_i32_188 = arith.constant 8 : i32
    %599 = vector.broadcast %c8_i32_188 : i32 to vector<16x1xi32>
    %600 = arith.cmpi slt, %598, %599 : vector<16x1xi32>
    %601 = arith.andi %596, %600 : vector<16x1xi1>
    %602 = arith.extui %601 : vector<16x1xi1> to vector<16x1xi32>
    %603 = arith.sitofp %602 : vector<16x1xi32> to vector<16x1xf32>
    %604 = vector.extract_strided_slice %557 {offsets = [1, 0], sizes = [16, 32], strides = [1, 1]} : vector<20x32xf32> to vector<16x32xf32>
    %605 = vector.broadcast %603 : vector<16x1xf32> to vector<16x32xf32>
    %606 = arith.mulf %604, %605 : vector<16x32xf32>
    %607 = vector.extract_strided_slice %575 {offsets = [1, 0], sizes = [1, 32], strides = [1, 1]} : vector<5x32xf32> to vector<1x32xf32>
    %608 = vector.broadcast %607 : vector<1x32xf32> to vector<16x32xf32>
    %609 = arith.mulf %606, %608 : vector<16x32xf32>
    %610 = arith.addf %592, %609 : vector<16x32xf32>
    %c0_i32_189 = arith.constant 0 : i32
    %611 = vector.broadcast %c0_i32_189 : i32 to vector<16x1xi32>
    %612 = arith.addi %574, %611 : vector<16x1xi32>
    %c0_i32_190 = arith.constant 0 : i32
    %613 = vector.broadcast %c0_i32_190 : i32 to vector<16x1xi32>
    %614 = arith.cmpi sge, %612, %613 : vector<16x1xi32>
    %c0_i32_191 = arith.constant 0 : i32
    %615 = vector.broadcast %c0_i32_191 : i32 to vector<16x1xi32>
    %616 = arith.addi %574, %615 : vector<16x1xi32>
    %c8_i32_192 = arith.constant 8 : i32
    %617 = vector.broadcast %c8_i32_192 : i32 to vector<16x1xi32>
    %618 = arith.cmpi slt, %616, %617 : vector<16x1xi32>
    %619 = arith.andi %614, %618 : vector<16x1xi1>
    %620 = arith.extui %619 : vector<16x1xi1> to vector<16x1xi32>
    %621 = arith.sitofp %620 : vector<16x1xi32> to vector<16x1xf32>
    %622 = vector.extract_strided_slice %557 {offsets = [2, 0], sizes = [16, 32], strides = [1, 1]} : vector<20x32xf32> to vector<16x32xf32>
    %623 = vector.broadcast %621 : vector<16x1xf32> to vector<16x32xf32>
    %624 = arith.mulf %622, %623 : vector<16x32xf32>
    %625 = vector.extract_strided_slice %575 {offsets = [2, 0], sizes = [1, 32], strides = [1, 1]} : vector<5x32xf32> to vector<1x32xf32>
    %626 = vector.broadcast %625 : vector<1x32xf32> to vector<16x32xf32>
    %627 = arith.mulf %624, %626 : vector<16x32xf32>
    %628 = arith.addf %610, %627 : vector<16x32xf32>
    %c1_i32_193 = arith.constant 1 : i32
    %629 = vector.broadcast %c1_i32_193 : i32 to vector<16x1xi32>
    %630 = arith.addi %574, %629 : vector<16x1xi32>
    %c0_i32_194 = arith.constant 0 : i32
    %631 = vector.broadcast %c0_i32_194 : i32 to vector<16x1xi32>
    %632 = arith.cmpi sge, %630, %631 : vector<16x1xi32>
    %c1_i32_195 = arith.constant 1 : i32
    %633 = vector.broadcast %c1_i32_195 : i32 to vector<16x1xi32>
    %634 = arith.addi %574, %633 : vector<16x1xi32>
    %c8_i32_196 = arith.constant 8 : i32
    %635 = vector.broadcast %c8_i32_196 : i32 to vector<16x1xi32>
    %636 = arith.cmpi slt, %634, %635 : vector<16x1xi32>
    %637 = arith.andi %632, %636 : vector<16x1xi1>
    %638 = arith.extui %637 : vector<16x1xi1> to vector<16x1xi32>
    %639 = arith.sitofp %638 : vector<16x1xi32> to vector<16x1xf32>
    %640 = vector.extract_strided_slice %557 {offsets = [3, 0], sizes = [16, 32], strides = [1, 1]} : vector<20x32xf32> to vector<16x32xf32>
    %641 = vector.broadcast %639 : vector<16x1xf32> to vector<16x32xf32>
    %642 = arith.mulf %640, %641 : vector<16x32xf32>
    %643 = vector.extract_strided_slice %575 {offsets = [3, 0], sizes = [1, 32], strides = [1, 1]} : vector<5x32xf32> to vector<1x32xf32>
    %644 = vector.broadcast %643 : vector<1x32xf32> to vector<16x32xf32>
    %645 = arith.mulf %642, %644 : vector<16x32xf32>
    %646 = arith.addf %628, %645 : vector<16x32xf32>
    %c2_i32 = arith.constant 2 : i32
    %647 = vector.broadcast %c2_i32 : i32 to vector<16x1xi32>
    %648 = arith.addi %574, %647 : vector<16x1xi32>
    %c0_i32_197 = arith.constant 0 : i32
    %649 = vector.broadcast %c0_i32_197 : i32 to vector<16x1xi32>
    %650 = arith.cmpi sge, %648, %649 : vector<16x1xi32>
    %c2_i32_198 = arith.constant 2 : i32
    %651 = vector.broadcast %c2_i32_198 : i32 to vector<16x1xi32>
    %652 = arith.addi %574, %651 : vector<16x1xi32>
    %c8_i32_199 = arith.constant 8 : i32
    %653 = vector.broadcast %c8_i32_199 : i32 to vector<16x1xi32>
    %654 = arith.cmpi slt, %652, %653 : vector<16x1xi32>
    %655 = arith.andi %650, %654 : vector<16x1xi1>
    %656 = arith.extui %655 : vector<16x1xi1> to vector<16x1xi32>
    %657 = arith.sitofp %656 : vector<16x1xi32> to vector<16x1xf32>
    %658 = vector.extract_strided_slice %557 {offsets = [4, 0], sizes = [16, 32], strides = [1, 1]} : vector<20x32xf32> to vector<16x32xf32>
    %659 = vector.broadcast %657 : vector<16x1xf32> to vector<16x32xf32>
    %660 = arith.mulf %658, %659 : vector<16x32xf32>
    %661 = vector.extract_strided_slice %575 {offsets = [4, 0], sizes = [1, 32], strides = [1, 1]} : vector<5x32xf32> to vector<1x32xf32>
    %662 = vector.broadcast %661 : vector<1x32xf32> to vector<16x32xf32>
    %663 = arith.mulf %660, %662 : vector<16x32xf32>
    %664 = arith.addf %646, %663 : vector<16x32xf32>
    %c0_200 = arith.constant 0 : index
    %c0_201 = arith.constant 0 : index
    %665 = vector.load %arg24[%c0_200, %c0_201] : memref<1x32xf32, #tpu.memory_space<vmem>>, vector<1x32xf32>
    %666 = vector.broadcast %665 : vector<1x32xf32> to vector<16x32xf32>
    %667 = arith.addf %664, %666 : vector<16x32xf32>
    %668 = arith.negf %667 : vector<16x32xf32>
    %669 = math.exp %668 : vector<16x32xf32>
    %cst_202 = arith.constant 1.000000e+00 : f32
    %670 = vector.broadcast %cst_202 : f32 to vector<16x32xf32>
    %671 = arith.addf %670, %669 : vector<16x32xf32>
    %672 = arith.divf %670, %671 : vector<16x32xf32>
    %673 = arith.mulf %667, %672 : vector<16x32xf32>
    %c0_203 = arith.constant 0 : index
    %c0_204 = arith.constant 0 : index
    %674 = vector.load %arg25[%c0_203, %c0_204] : memref<32x32xf32, #tpu.memory_space<vmem>>, vector<32x32xf32>
    %cst_205 = arith.constant dense<0.000000e+00> : vector<16x32xf32>
    %675 = tpu.matmul %673, %674, %cst_205 {dimension_numbers = #tpu.dot_dimension_numbers<[1], [0], [0], [1], [0, 0, 1, 1], [], []>} : vector<16x32xf32>, vector<32x32xf32>, vector<16x32xf32> -> vector<16x32xf32>
    %c0_206 = arith.constant 0 : index
    %c0_207 = arith.constant 0 : index
    %676 = vector.load %arg26[%c0_206, %c0_207] : memref<1x32xf32, #tpu.memory_space<vmem>>, vector<1x32xf32>
    %677 = vector.broadcast %676 : vector<1x32xf32> to vector<16x32xf32>
    %678 = arith.addf %675, %677 : vector<16x32xf32>
    %679 = arith.addf %518, %678 : vector<16x32xf32>
    %c0_208 = arith.constant 0 : index
    %c0_209 = arith.constant 0 : index
    %680 = vector.load %arg27[%c0_208, %c0_209] : memref<1x32xf32, #tpu.memory_space<vmem>>, vector<1x32xf32>
    %c0_210 = arith.constant 0 : index
    %c0_211 = arith.constant 0 : index
    %681 = vector.load %arg28[%c0_210, %c0_211] : memref<1x32xf32, #tpu.memory_space<vmem>>, vector<1x32xf32>
    %cst_212 = arith.constant dense<0.000000e+00> : vector<16xf32>
    %682 = vector.multi_reduction <add>, %679, %cst_212 [1] : vector<16x32xf32> to vector<16xf32>
    %683 = vector.shape_cast %682 : vector<16xf32> to vector<16x1xf32>
    %cst_213 = arith.constant 3.200000e+01 : f32
    %684 = vector.broadcast %cst_213 : f32 to vector<16x1xf32>
    %685 = arith.divf %683, %684 : vector<16x1xf32>
    %686 = vector.broadcast %685 : vector<16x1xf32> to vector<16x32xf32>
    %687 = arith.subf %679, %686 : vector<16x32xf32>
    %688 = arith.mulf %687, %687 : vector<16x32xf32>
    %cst_214 = arith.constant dense<0.000000e+00> : vector<16xf32>
    %689 = vector.multi_reduction <add>, %688, %cst_214 [1] : vector<16x32xf32> to vector<16xf32>
    %690 = vector.shape_cast %689 : vector<16xf32> to vector<16x1xf32>
    %cst_215 = arith.constant 3.200000e+01 : f32
    %691 = vector.broadcast %cst_215 : f32 to vector<16x1xf32>
    %692 = arith.divf %690, %691 : vector<16x1xf32>
    %693 = vector.broadcast %685 : vector<16x1xf32> to vector<16x32xf32>
    %694 = arith.subf %679, %693 : vector<16x32xf32>
    %cst_216 = arith.constant 9.99999974E-6 : f32
    %695 = vector.broadcast %cst_216 : f32 to vector<16x1xf32>
    %696 = arith.addf %692, %695 : vector<16x1xf32>
    %697 = math.rsqrt %696 : vector<16x1xf32>
    %698 = vector.broadcast %697 : vector<16x1xf32> to vector<16x32xf32>
    %699 = arith.mulf %694, %698 : vector<16x32xf32>
    %700 = vector.broadcast %680 : vector<1x32xf32> to vector<16x32xf32>
    %701 = arith.mulf %699, %700 : vector<16x32xf32>
    %702 = vector.broadcast %681 : vector<1x32xf32> to vector<16x32xf32>
    %703 = arith.addf %701, %702 : vector<16x32xf32>
    %c0_217 = arith.constant 0 : index
    %c0_218 = arith.constant 0 : index
    %704 = vector.load %arg29[%c0_217, %c0_218] : memref<32x128xf32, #tpu.memory_space<vmem>>, vector<32x128xf32>
    %cst_219 = arith.constant dense<0.000000e+00> : vector<16x128xf32>
    %705 = tpu.matmul %703, %704, %cst_219 {dimension_numbers = #tpu.dot_dimension_numbers<[1], [0], [0], [1], [0, 0, 1, 1], [], []>} : vector<16x32xf32>, vector<32x128xf32>, vector<16x128xf32> -> vector<16x128xf32>
    %c0_220 = arith.constant 0 : index
    %c0_221 = arith.constant 0 : index
    %706 = vector.load %arg30[%c0_220, %c0_221] : memref<1x128xf32, #tpu.memory_space<vmem>>, vector<1x128xf32>
    %707 = vector.broadcast %706 : vector<1x128xf32> to vector<16x128xf32>
    %708 = arith.addf %705, %707 : vector<16x128xf32>
    %709 = arith.negf %708 : vector<16x128xf32>
    %710 = math.exp %709 : vector<16x128xf32>
    %cst_222 = arith.constant 1.000000e+00 : f32
    %711 = vector.broadcast %cst_222 : f32 to vector<16x128xf32>
    %712 = arith.addf %711, %710 : vector<16x128xf32>
    %713 = arith.divf %711, %712 : vector<16x128xf32>
    %714 = arith.mulf %708, %713 : vector<16x128xf32>
    %c0_223 = arith.constant 0 : index
    %c0_224 = arith.constant 0 : index
    %715 = vector.load %arg31[%c0_223, %c0_224] : memref<128x32xf32, #tpu.memory_space<vmem>>, vector<128x32xf32>
    %cst_225 = arith.constant dense<0.000000e+00> : vector<16x32xf32>
    %716 = tpu.matmul %714, %715, %cst_225 {dimension_numbers = #tpu.dot_dimension_numbers<[1], [0], [0], [1], [0, 0, 1, 1], [], []>} : vector<16x128xf32>, vector<128x32xf32>, vector<16x32xf32> -> vector<16x32xf32>
    %c0_226 = arith.constant 0 : index
    %c0_227 = arith.constant 0 : index
    %717 = vector.load %arg32[%c0_226, %c0_227] : memref<1x32xf32, #tpu.memory_space<vmem>>, vector<1x32xf32>
    %718 = vector.broadcast %717 : vector<1x32xf32> to vector<16x32xf32>
    %719 = arith.addf %716, %718 : vector<16x32xf32>
    %720 = arith.addf %679, %719 : vector<16x32xf32>
    %c0_228 = arith.constant 0 : index
    %c0_229 = arith.constant 0 : index
    %721 = vector.load %arg33[%c0_228, %c0_229] : memref<1x32xf32, #tpu.memory_space<vmem>>, vector<1x32xf32>
    %c0_230 = arith.constant 0 : index
    %c0_231 = arith.constant 0 : index
    %722 = vector.load %arg34[%c0_230, %c0_231] : memref<1x32xf32, #tpu.memory_space<vmem>>, vector<1x32xf32>
    %cst_232 = arith.constant dense<0.000000e+00> : vector<16xf32>
    %723 = vector.multi_reduction <add>, %720, %cst_232 [1] : vector<16x32xf32> to vector<16xf32>
    %724 = vector.shape_cast %723 : vector<16xf32> to vector<16x1xf32>
    %cst_233 = arith.constant 3.200000e+01 : f32
    %725 = vector.broadcast %cst_233 : f32 to vector<16x1xf32>
    %726 = arith.divf %724, %725 : vector<16x1xf32>
    %727 = vector.broadcast %726 : vector<16x1xf32> to vector<16x32xf32>
    %728 = arith.subf %720, %727 : vector<16x32xf32>
    %729 = arith.mulf %728, %728 : vector<16x32xf32>
    %cst_234 = arith.constant dense<0.000000e+00> : vector<16xf32>
    %730 = vector.multi_reduction <add>, %729, %cst_234 [1] : vector<16x32xf32> to vector<16xf32>
    %731 = vector.shape_cast %730 : vector<16xf32> to vector<16x1xf32>
    %cst_235 = arith.constant 3.200000e+01 : f32
    %732 = vector.broadcast %cst_235 : f32 to vector<16x1xf32>
    %733 = arith.divf %731, %732 : vector<16x1xf32>
    %734 = vector.broadcast %726 : vector<16x1xf32> to vector<16x32xf32>
    %735 = arith.subf %720, %734 : vector<16x32xf32>
    %cst_236 = arith.constant 9.99999974E-6 : f32
    %736 = vector.broadcast %cst_236 : f32 to vector<16x1xf32>
    %737 = arith.addf %733, %736 : vector<16x1xf32>
    %738 = math.rsqrt %737 : vector<16x1xf32>
    %739 = vector.broadcast %738 : vector<16x1xf32> to vector<16x32xf32>
    %740 = arith.mulf %735, %739 : vector<16x32xf32>
    %741 = vector.broadcast %721 : vector<1x32xf32> to vector<16x32xf32>
    %742 = arith.mulf %740, %741 : vector<16x32xf32>
    %743 = vector.broadcast %722 : vector<1x32xf32> to vector<16x32xf32>
    %744 = arith.addf %742, %743 : vector<16x32xf32>
    %c0_237 = arith.constant 0 : index
    %c0_238 = arith.constant 0 : index
    %745 = vector.load %arg35[%c0_237, %c0_238] : memref<1x32xf32, #tpu.memory_space<vmem>>, vector<1x32xf32>
    %746 = vector.broadcast %745 : vector<1x32xf32> to vector<16x32xf32>
    %747 = arith.mulf %744, %746 : vector<16x32xf32>
    %cst_239 = arith.constant dense<0.000000e+00> : vector<16xf32>
    %748 = vector.multi_reduction <add>, %747, %cst_239 [1] : vector<16x32xf32> to vector<16xf32>
    %749 = vector.shape_cast %748 : vector<16xf32> to vector<16x1xf32>
    %c0_240 = arith.constant 0 : index
    %c0_241 = arith.constant 0 : index
    %750 = vector.load %arg36[%c0_240, %c0_241] : memref<1x1xf32, #tpu.memory_space<vmem>>, vector<1x1xf32>
    %751 = vector.broadcast %750 : vector<1x1xf32> to vector<16x1xf32>
    %752 = arith.addf %749, %751 : vector<16x1xf32>
    %753 = vector.extract_strided_slice %752 {offsets = [0, 0], sizes = [8, 1], strides = [1, 1]} : vector<16x1xf32> to vector<8x1xf32>
    %cst_242 = arith.constant dense<0xFF800000> : vector<1xf32>
    %754 = vector.multi_reduction <maximumf>, %753, %cst_242 [0] : vector<8x1xf32> to vector<1xf32>
    %755 = vector.shape_cast %754 : vector<1xf32> to vector<1x1xf32>
    %756 = arith.negf %755 : vector<1x1xf32>
    %757 = math.exp %756 : vector<1x1xf32>
    %cst_243 = arith.constant 1.000000e+00 : f32
    %758 = vector.broadcast %cst_243 : f32 to vector<1x1xf32>
    %759 = arith.addf %758, %757 : vector<1x1xf32>
    %760 = arith.divf %758, %759 : vector<1x1xf32>
    %cst_244 = arith.constant 1.000000e+00 : f32
    %761 = vector.broadcast %cst_244 : f32 to vector<1x1xf32>
    %762 = arith.subf %761, %760 : vector<1x1xf32>
    %cst_245 = arith.constant 5.000000e+00 : f32
    %763 = vector.broadcast %cst_245 : f32 to vector<1x1xf32>
    %764 = arith.mulf %763, %762 : vector<1x1xf32>
    %cst_246 = arith.constant 9.99999993E-9 : f32
    %765 = vector.broadcast %cst_246 : f32 to vector<1x1xf32>
    %766 = arith.addf %764, %765 : vector<1x1xf32>
    %767 = tpu.reciprocal %766 {approx = true} : vector<1x1xf32> -> vector<1x1xf32>
    %768 = vector.broadcast %767 : vector<1x1xf32> to vector<8x1xf32>
    %769 = arith.mulf %753, %768 : vector<8x1xf32>
    %cst_247 = arith.constant dense<0xFF800000> : vector<1xf32>
    %770 = vector.multi_reduction <maximumf>, %769, %cst_247 [0] : vector<8x1xf32> to vector<1xf32>
    %771 = vector.shape_cast %770 : vector<1xf32> to vector<1x1xf32>
    %772 = vector.broadcast %771 : vector<1x1xf32> to vector<8x1xf32>
    %773 = arith.subf %769, %772 : vector<8x1xf32>
    %774 = math.exp %773 : vector<8x1xf32>
    %cst_248 = arith.constant dense<0.000000e+00> : vector<1xf32>
    %775 = vector.multi_reduction <add>, %774, %cst_248 [0] : vector<8x1xf32> to vector<1xf32>
    %776 = vector.shape_cast %775 : vector<1xf32> to vector<1x1xf32>
    %777 = tpu.reciprocal %776 {approx = true} : vector<1x1xf32> -> vector<1x1xf32>
    %778 = vector.broadcast %777 : vector<1x1xf32> to vector<8x1xf32>
    %779 = arith.mulf %774, %778 : vector<8x1xf32>
    %780 = arith.mulf %753, %779 : vector<8x1xf32>
    %cst_249 = arith.constant dense<0.000000e+00> : vector<1xf32>
    %781 = vector.multi_reduction <add>, %780, %cst_249 [0] : vector<8x1xf32> to vector<1xf32>
    %782 = vector.shape_cast %781 : vector<1xf32> to vector<1x1xf32>
    %c0_250 = arith.constant 0 : index
    %c0_251 = arith.constant 0 : index
    %c0_252 = arith.constant 0 : index
    %783 = vector.load %arg37[%c0_250, %c0_251, %c0_252] : memref<2x1x1xf32, #tpu.memory_space<vmem>>, vector<1x1x1xf32>
    %784 = vector.shape_cast %783 : vector<1x1x1xf32> to vector<1x1xf32>
    %785 = vector.shape_cast %782 : vector<1x1xf32> to vector<1x1x1xf32>
    tpu.vector_store %arg37[%c0_250, %c0_251, %c0_252], %785 {strides = array<i32>} : memref<2x1x1xf32, #tpu.memory_space<vmem>>, vector<1x1x1xf32>,
    %786 = vector.extract_strided_slice %752 {offsets = [8, 0], sizes = [8, 1], strides = [1, 1]} : vector<16x1xf32> to vector<8x1xf32>
    %cst_253 = arith.constant dense<0xFF800000> : vector<1xf32>
    %787 = vector.multi_reduction <maximumf>, %786, %cst_253 [0] : vector<8x1xf32> to vector<1xf32>
    %788 = vector.shape_cast %787 : vector<1xf32> to vector<1x1xf32>
    %789 = arith.negf %788 : vector<1x1xf32>
    %790 = math.exp %789 : vector<1x1xf32>
    %cst_254 = arith.constant 1.000000e+00 : f32
    %791 = vector.broadcast %cst_254 : f32 to vector<1x1xf32>
    %792 = arith.addf %791, %790 : vector<1x1xf32>
    %793 = arith.divf %791, %792 : vector<1x1xf32>
    %cst_255 = arith.constant 1.000000e+00 : f32
    %794 = vector.broadcast %cst_255 : f32 to vector<1x1xf32>
    %795 = arith.subf %794, %793 : vector<1x1xf32>
    %cst_256 = arith.constant 5.000000e+00 : f32
    %796 = vector.broadcast %cst_256 : f32 to vector<1x1xf32>
    %797 = arith.mulf %796, %795 : vector<1x1xf32>
    %cst_257 = arith.constant 9.99999993E-9 : f32
    %798 = vector.broadcast %cst_257 : f32 to vector<1x1xf32>
    %799 = arith.addf %797, %798 : vector<1x1xf32>
    %800 = tpu.reciprocal %799 {approx = true} : vector<1x1xf32> -> vector<1x1xf32>
    %801 = vector.broadcast %800 : vector<1x1xf32> to vector<8x1xf32>
    %802 = arith.mulf %786, %801 : vector<8x1xf32>
    %cst_258 = arith.constant dense<0xFF800000> : vector<1xf32>
    %803 = vector.multi_reduction <maximumf>, %802, %cst_258 [0] : vector<8x1xf32> to vector<1xf32>
    %804 = vector.shape_cast %803 : vector<1xf32> to vector<1x1xf32>
    %805 = vector.broadcast %804 : vector<1x1xf32> to vector<8x1xf32>
    %806 = arith.subf %802, %805 : vector<8x1xf32>
    %807 = math.exp %806 : vector<8x1xf32>
    %cst_259 = arith.constant dense<0.000000e+00> : vector<1xf32>
    %808 = vector.multi_reduction <add>, %807, %cst_259 [0] : vector<8x1xf32> to vector<1xf32>
    %809 = vector.shape_cast %808 : vector<1xf32> to vector<1x1xf32>
    %810 = tpu.reciprocal %809 {approx = true} : vector<1x1xf32> -> vector<1x1xf32>
    %811 = vector.broadcast %810 : vector<1x1xf32> to vector<8x1xf32>
    %812 = arith.mulf %807, %811 : vector<8x1xf32>
    %813 = arith.mulf %786, %812 : vector<8x1xf32>
    %cst_260 = arith.constant dense<0.000000e+00> : vector<1xf32>
    %814 = vector.multi_reduction <add>, %813, %cst_260 [0] : vector<8x1xf32> to vector<1xf32>
    %815 = vector.shape_cast %814 : vector<1xf32> to vector<1x1xf32>
    %c1 = arith.constant 1 : index
    %c0_261 = arith.constant 0 : index
    %c0_262 = arith.constant 0 : index
    %816 = vector.load %arg37[%c1, %c0_261, %c0_262] : memref<2x1x1xf32, #tpu.memory_space<vmem>>, vector<1x1x1xf32>
    %817 = vector.shape_cast %816 : vector<1x1x1xf32> to vector<1x1xf32>
    %818 = vector.shape_cast %815 : vector<1x1xf32> to vector<1x1x1xf32>
    tpu.vector_store %arg37[%c1, %c0_261, %c0_262], %818 {strides = array<i32>} : memref<2x1x1xf32, #tpu.memory_space<vmem>>, vector<1x1x1xf32>,
    return
  }
  func.func @transform_0(%arg0: i32) -> (i32, i32) {
    %c0_i32 = arith.constant 0 : i32
    %c0_i32_0 = arith.constant 0 : i32
    return %arg0, %c0_i32 : i32, i32
  }
  func.func @transform_1(%arg0: i32) -> (i32, i32) {
    %c0_i32 = arith.constant 0 : i32
    %c0_i32_0 = arith.constant 0 : i32
    %c0_i32_1 = arith.constant 0 : i32
    return %c0_i32, %c0_i32_0 : i32, i32
  }
  func.func @transform_2(%arg0: i32) -> (i32, i32) {
    %c0_i32 = arith.constant 0 : i32
    %c0_i32_0 = arith.constant 0 : i32
    %c0_i32_1 = arith.constant 0 : i32
    return %c0_i32, %c0_i32_0 : i32, i32
  }
  func.func @transform_3(%arg0: i32) -> (i32, i32) {
    %c0_i32 = arith.constant 0 : i32
    %c0_i32_0 = arith.constant 0 : i32
    %c0_i32_1 = arith.constant 0 : i32
    return %c0_i32, %c0_i32_0 : i32, i32
  }
  func.func @transform_4(%arg0: i32) -> (i32, i32) {
    %c0_i32 = arith.constant 0 : i32
    %c0_i32_0 = arith.constant 0 : i32
    %c0_i32_1 = arith.constant 0 : i32
    return %c0_i32, %c0_i32_0 : i32, i32
  }
  func.func @transform_5(%arg0: i32) -> (i32, i32) {
    %c0_i32 = arith.constant 0 : i32
    %c0_i32_0 = arith.constant 0 : i32
    %c0_i32_1 = arith.constant 0 : i32
    return %c0_i32, %c0_i32_0 : i32, i32
  }
  func.func @transform_6(%arg0: i32) -> (i32, i32) {
    %c0_i32 = arith.constant 0 : i32
    %c0_i32_0 = arith.constant 0 : i32
    %c0_i32_1 = arith.constant 0 : i32
    return %c0_i32, %c0_i32_0 : i32, i32
  }
  func.func @transform_7(%arg0: i32) -> (i32, i32) {
    %c0_i32 = arith.constant 0 : i32
    %c0_i32_0 = arith.constant 0 : i32
    %c0_i32_1 = arith.constant 0 : i32
    return %c0_i32, %c0_i32_0 : i32, i32
  }
  func.func @transform_8(%arg0: i32) -> (i32, i32) {
    %c0_i32 = arith.constant 0 : i32
    %c0_i32_0 = arith.constant 0 : i32
    %c0_i32_1 = arith.constant 0 : i32
    return %c0_i32, %c0_i32_0 : i32, i32
  }
  func.func @transform_9(%arg0: i32) -> (i32, i32) {
    %c0_i32 = arith.constant 0 : i32
    %c0_i32_0 = arith.constant 0 : i32
    %c0_i32_1 = arith.constant 0 : i32
    return %c0_i32, %c0_i32_0 : i32, i32
  }
  func.func @transform_10(%arg0: i32) -> (i32, i32) {
    %c0_i32 = arith.constant 0 : i32
    %c0_i32_0 = arith.constant 0 : i32
    %c0_i32_1 = arith.constant 0 : i32
    return %c0_i32, %c0_i32_0 : i32, i32
  }
  func.func @transform_11(%arg0: i32) -> (i32, i32) {
    %c0_i32 = arith.constant 0 : i32
    %c0_i32_0 = arith.constant 0 : i32
    %c0_i32_1 = arith.constant 0 : i32
    return %c0_i32, %c0_i32_0 : i32, i32
  }
  func.func @transform_12(%arg0: i32) -> (i32, i32) {
    %c0_i32 = arith.constant 0 : i32
    %c0_i32_0 = arith.constant 0 : i32
    %c0_i32_1 = arith.constant 0 : i32
    return %c0_i32, %c0_i32_0 : i32, i32
  }
  func.func @transform_13(%arg0: i32) -> (i32, i32) {
    %c0_i32 = arith.constant 0 : i32
    %c0_i32_0 = arith.constant 0 : i32
    %c0_i32_1 = arith.constant 0 : i32
    return %c0_i32, %c0_i32_0 : i32, i32
  }
  func.func @transform_14(%arg0: i32) -> (i32, i32) {
    %c0_i32 = arith.constant 0 : i32
    %c0_i32_0 = arith.constant 0 : i32
    %c0_i32_1 = arith.constant 0 : i32
    return %c0_i32, %c0_i32_0 : i32, i32
  }
  func.func @transform_15(%arg0: i32) -> (i32, i32) {
    %c0_i32 = arith.constant 0 : i32
    %c0_i32_0 = arith.constant 0 : i32
    %c0_i32_1 = arith.constant 0 : i32
    return %c0_i32, %c0_i32_0 : i32, i32
  }
  func.func @transform_16(%arg0: i32) -> (i32, i32) {
    %c0_i32 = arith.constant 0 : i32
    %c0_i32_0 = arith.constant 0 : i32
    %c0_i32_1 = arith.constant 0 : i32
    return %c0_i32, %c0_i32_0 : i32, i32
  }
  func.func @transform_17(%arg0: i32) -> (i32, i32) {
    %c0_i32 = arith.constant 0 : i32
    %c0_i32_0 = arith.constant 0 : i32
    %c0_i32_1 = arith.constant 0 : i32
    return %c0_i32, %c0_i32_0 : i32, i32
  }
  func.func @transform_18(%arg0: i32) -> (i32, i32) {
    %c0_i32 = arith.constant 0 : i32
    %c0_i32_0 = arith.constant 0 : i32
    %c0_i32_1 = arith.constant 0 : i32
    return %c0_i32, %c0_i32_0 : i32, i32
  }
  func.func @transform_19(%arg0: i32) -> (i32, i32) {
    %c0_i32 = arith.constant 0 : i32
    %c0_i32_0 = arith.constant 0 : i32
    %c0_i32_1 = arith.constant 0 : i32
    return %c0_i32, %c0_i32_0 : i32, i32
  }
  func.func @transform_20(%arg0: i32) -> (i32, i32) {
    %c0_i32 = arith.constant 0 : i32
    %c0_i32_0 = arith.constant 0 : i32
    %c0_i32_1 = arith.constant 0 : i32
    return %c0_i32, %c0_i32_0 : i32, i32
  }
  func.func @transform_21(%arg0: i32) -> (i32, i32) {
    %c0_i32 = arith.constant 0 : i32
    %c0_i32_0 = arith.constant 0 : i32
    %c0_i32_1 = arith.constant 0 : i32
    return %c0_i32, %c0_i32_0 : i32, i32
  }
  func.func @transform_22(%arg0: i32) -> (i32, i32) {
    %c0_i32 = arith.constant 0 : i32
    %c0_i32_0 = arith.constant 0 : i32
    %c0_i32_1 = arith.constant 0 : i32
    return %c0_i32, %c0_i32_0 : i32, i32
  }
  func.func @transform_23(%arg0: i32) -> (i32, i32) {
    %c0_i32 = arith.constant 0 : i32
    %c0_i32_0 = arith.constant 0 : i32
    %c0_i32_1 = arith.constant 0 : i32
    return %c0_i32, %c0_i32_0 : i32, i32
  }
  func.func @transform_24(%arg0: i32) -> (i32, i32) {
    %c0_i32 = arith.constant 0 : i32
    %c0_i32_0 = arith.constant 0 : i32
    %c0_i32_1 = arith.constant 0 : i32
    return %c0_i32, %c0_i32_0 : i32, i32
  }
  func.func @transform_25(%arg0: i32) -> (i32, i32) {
    %c0_i32 = arith.constant 0 : i32
    %c0_i32_0 = arith.constant 0 : i32
    %c0_i32_1 = arith.constant 0 : i32
    return %c0_i32, %c0_i32_0 : i32, i32
  }
  func.func @transform_26(%arg0: i32) -> (i32, i32) {
    %c0_i32 = arith.constant 0 : i32
    %c0_i32_0 = arith.constant 0 : i32
    %c0_i32_1 = arith.constant 0 : i32
    return %c0_i32, %c0_i32_0 : i32, i32
  }
  func.func @transform_27(%arg0: i32) -> (i32, i32) {
    %c0_i32 = arith.constant 0 : i32
    %c0_i32_0 = arith.constant 0 : i32
    %c0_i32_1 = arith.constant 0 : i32
    return %c0_i32, %c0_i32_0 : i32, i32
  }
  func.func @transform_28(%arg0: i32) -> (i32, i32) {
    %c0_i32 = arith.constant 0 : i32
    %c0_i32_0 = arith.constant 0 : i32
    %c0_i32_1 = arith.constant 0 : i32
    return %c0_i32, %c0_i32_0 : i32, i32
  }
  func.func @transform_29(%arg0: i32) -> (i32, i32) {
    %c0_i32 = arith.constant 0 : i32
    %c0_i32_0 = arith.constant 0 : i32
    %c0_i32_1 = arith.constant 0 : i32
    return %c0_i32, %c0_i32_0 : i32, i32
  }
  func.func @transform_30(%arg0: i32) -> (i32, i32) {
    %c0_i32 = arith.constant 0 : i32
    %c0_i32_0 = arith.constant 0 : i32
    %c0_i32_1 = arith.constant 0 : i32
    return %c0_i32, %c0_i32_0 : i32, i32
  }
  func.func @transform_31(%arg0: i32) -> (i32, i32) {
    %c0_i32 = arith.constant 0 : i32
    %c0_i32_0 = arith.constant 0 : i32
    %c0_i32_1 = arith.constant 0 : i32
    return %c0_i32, %c0_i32_0 : i32, i32
  }
  func.func @transform_32(%arg0: i32) -> (i32, i32) {
    %c0_i32 = arith.constant 0 : i32
    %c0_i32_0 = arith.constant 0 : i32
    %c0_i32_1 = arith.constant 0 : i32
    return %c0_i32, %c0_i32_0 : i32, i32
  }
  func.func @transform_33(%arg0: i32) -> (i32, i32) {
    %c0_i32 = arith.constant 0 : i32
    %c0_i32_0 = arith.constant 0 : i32
    %c0_i32_1 = arith.constant 0 : i32
    return %c0_i32, %c0_i32_0 : i32, i32
  }
  func.func @transform_34(%arg0: i32) -> (i32, i32) {
    %c0_i32 = arith.constant 0 : i32
    %c0_i32_0 = arith.constant 0 : i32
    %c0_i32_1 = arith.constant 0 : i32
    return %c0_i32, %c0_i32_0 : i32, i32
  }
  func.func @transform_35(%arg0: i32) -> (i32, i32) {
    %c0_i32 = arith.constant 0 : i32
    %c0_i32_0 = arith.constant 0 : i32
    %c0_i32_1 = arith.constant 0 : i32
    return %c0_i32, %c0_i32_0 : i32, i32
  }
  func.func @transform_36(%arg0: i32) -> (i32, i32, i32) {
    %c0_i32 = arith.constant 0 : i32
    %c0_i32_0 = arith.constant 0 : i32
    %c0_i32_1 = arith.constant 0 : i32
    return %arg0, %c0_i32, %c0_i32_0 : i32, i32, i32
  }
}

</mosaic_0001>

<bundles_post_ra>
// kernel: _lambda_.1
= control target key start
LH: loop header
LB: loop body
LE: loop exit
PB: predicated region body
PF: predicated region fallthrough
CT: control target
= control target key end

     0   :  { %s6038_s6 = smov 120   ;;  %s6039_s7 = smov 112   ;;  %vm154_vm0 = vcmask 64512   ;;  %vm278_vm1 = vcmask 130048   ;;  %vm280_vm2 = vcmask 195584   ;;  %vm418_vm3 = vcmask 261120   ;;  %s7192_s0 = inlined_call_operand.smem [shape: u32[37], index: -1, kind: input, shape index: {}] }
   0x1   :  { %s1_s5 = sld [smem:[%s7192_s0]]   ;;  %s6040_s8 = smov 104   ;;  %vm6054_vm4 = vmmov 0   ;;  %vm1109_vm8 = vcmask 121856   ;;  %vm1177_vm14 = vcmask 1041409   ;;  %vm1179_vm15 = vcmask 1042434  }
   0x2   :  { %s6041_s9 = smov 2   ;;  %s6042_s13 = smov 3  }
   0x3   :  { %s5344_s12 = sld [smem:[%s7192_s0 + %s6041_s9]]   ;;  %s6043_s17 = smov 6  }
   0x4   :  { %s5345_s16 = sld [smem:[%s7192_s0 + %s6042_s13]]   ;;  %s6044_s21 = smov 4  }
   0x5   :  { %s5348_s20 = sld [smem:[%s7192_s0 + %s6043_s17]]   ;;  %s6045_s25 = smov 5  }
   0x6   :  { %s5346_s24 = sld [smem:[%s7192_s0 + %s6044_s21]]   ;;  %s6046_s29 = smov 8  }
   0x7   :  { %v6097_v0 = vld [vmem:[%s1_s5] sm:$0xff]  ;;  %v6099_v1 = vld [vmem:[%s1_s5 + $0x8] sm:$0xff]  ;;  %s5347_s28 = sld [smem:[%s7192_s0 + %s6045_s25]]   ;;  %s6047_s3 = smov 7  }
   0x8   :  { %181 = vrot.lane.b32.xlu0 %v6097_v0, %s6038_s6  ;;  %308 = vrot.lane.b32.xlu1 %v6099_v1, %s6038_s6  ;;  %v155_v14 = vsel %vm154_vm0, %v6097_v0, 0.0  ;;  %v282_v15 = vsel %vm154_vm0, %v6099_v1, 0.0  ;;  %s6226_s2 = sld [smem:[%s7192_s0 + %s6046_s29]]   ;;  %s6048_s10 = smov 9  }
   0x9   :  { %s5349_s9 = sld [smem:[%s7192_s0 + %s6047_s3]]   ;;  %s6049_s14 = smov 12  }
   0xa   :  { %s5351_s13 = sld [smem:[%s7192_s0 + %s6048_s10]]   ;;  %s6050_s18 = smov 10  }
   0xb   :  { %s5354_s17 = sld [smem:[%s7192_s0 + %s6049_s14]]   ;;  %s6051_s22 = smov 11  }
   0xc   :  { %213 = vrot.lane.b32.xlu0 %v6097_v0, %s6039_s7  ;;  %245 = vrot.lane.b32.xlu1 %v6097_v0, %s6040_s8  ;;  %s5352_s21 = sld [smem:[%s7192_s0 + %s6050_s18]]   ;;  %s6052_s26 = smov 1  }
   0xd   :  { %s5353_s25 = sld [smem:[%s7192_s0 + %s6051_s22]]   ;;  %s6055_s1 = smov 13  }
   0xe   :  { %s6278_s30 = sld [smem:[%s7192_s0 + %s6052_s26]]   ;;  %s6056_s5 = smov 15  }
   0xf   :  { %s5355_s4 = sld [smem:[%s7192_s0 + %s6055_s1]]   ;;  %s6061_s18 = smov 88  }
  0x10   :  { %340 = vrot.lane.b32.xlu0 %v6099_v1, %s6039_s7  ;;  %372 = vrot.lane.b32.xlu1 %v6099_v1, %s6040_s8  ;;  %s5357_s11 = sld [smem:[%s7192_s0 + %s6056_s5]]   ;;  %s6062_s19 = smov 16  }
  0x11   :  { %s6065_s22 = smov 24   ;;  %s6066_s23 = smov 48  }
  0x12   :  { %s6077_s26 = smov 25   ;;  %s6078_s1 = smov 28  }
  0x13   :  { %s6079_s5 = smov 26  }
  0x7a   :  { %v182_v2 = vpop.permute.xlu0 %181  ;;  %v309_v3 = vpop.permute.xlu1 %308 }
  0x7b   :  { %v184_v4 = vsel %vm154_vm0, %v182_v2, 0.0  ;;  %v311_v5 = vsel %vm154_vm0, %v309_v3, 0.0 }
  0x7c   :  { %185 = vadd.xlane.f32.xlu0 %v184_v4 }
  0x7e   :  { %v214_v6 = vpop.permute.xlu0 %213  ;;  %v246_v7 = vpop.permute.xlu1 %245 }
  0x7f   :  { %v216_v8 = vsel %vm154_vm0, %v214_v6, 0.0  ;;  %v248_v9 = vsel %vm154_vm0, %v246_v7, 0.0 }
  0x80   :  { %312 = vadd.xlane.f32.xlu0 %v311_v5  ;;  %217 = vadd.xlane.f32.xlu1 %v216_v8 }
  0x82   :  { %v341_v10 = vpop.permute.xlu0 %340  ;;  %v373_v11 = vpop.permute.xlu1 %372 }
  0x83   :  { %v343_v12 = vsel %vm154_vm0, %v341_v10, 0.0  ;;  %v375_v13 = vsel %vm154_vm0, %v373_v11, 0.0 }
  0x84   :  { %249 = vadd.xlane.f32.xlu0 %v248_v9  ;;  %344 = vadd.xlane.f32.xlu1 %v343_v12 }
  0x88   :  { %376 = vadd.xlane.f32.xlu0 %v375_v13  ;;  %156 = vadd.xlane.f32.xlu1 %v155_v14 }
  0x8c   :  { %283 = vadd.xlane.f32.xlu0 %v282_v15 }
 0x105   :  { %v186_v16 = vpop.xlane.xlu0 %185 }
 0x106   :  { %v187_v17 = vrot.slane %v186_v16, 4 }
 0x108   :  { %v188_v18 = vadd.f32 %v187_v17, %v186_v16 }
 0x109   :  { %v218_v19 = vpop.xlane.xlu1 %217  ;;  %v313_v20 = vpop.xlane.xlu0 %312 }
 0x10a   :  { %v189_v21 = vrot.slane %v188_v18, 2  ;;  %v219_v22 = vrot.slane %v218_v19, 4  ;;  %v314_v23 = vrot.slane %v313_v20, 4 }
 0x10c   :  { %v190_v24 = vadd.f32 %v189_v21, %v188_v18  ;;  %v220_v25 = vadd.f32 %v219_v22, %v218_v19  ;;  %v315_v26 = vadd.f32 %v314_v23, %v313_v20 }
 0x10d   :  { %v345_v27 = vpop.xlane.xlu1 %344  ;;  %v250_v28 = vpop.xlane.xlu0 %249 }
 0x10e   :  { %v191_v29 = vrot.slane %v190_v24, 1  ;;  %v221_v30 = vrot.slane %v220_v25, 2  ;;  %v316_v31 = vrot.slane %v315_v26, 2  ;;  %v346_v32 = vrot.slane %v345_v27, 4 }
 0x10f   :  { %v251_v33 = vrot.slane %v250_v28, 4 }
 0x110   :  { %v192_v34 = vadd.f32 %v191_v29, %v190_v24  ;;  %v222_v35 = vadd.f32 %v221_v30, %v220_v25  ;;  %v317_v36 = vadd.f32 %v316_v31, %v315_v26  ;;  %v347_v37 = vadd.f32 %v346_v32, %v345_v27 }
 0x111   :  { %v252_v38 = vadd.f32 %v251_v33, %v250_v28  ;;  %v377_v39 = vpop.xlane.xlu0 %376  ;;  %v157_v50 = vpop.xlane.xlu1 %156 }
 0x112   :  { %v223_v40 = vrot.slane %v222_v35, 1  ;;  %v318_v41 = vrot.slane %v317_v36, 1  ;;  %v348_v42 = vrot.slane %v347_v37, 2  ;;  %v378_v43 = vrot.slane %v377_v39, 4 }
 0x113   :  { %v253_v44 = vrot.slane %v252_v38, 2  ;;  %v193_v45 = vmul.f32 0.015625, %v192_v34  ;;  %v158_v59 = vrot.slane %v157_v50, 4 }
 0x114   :  { %v224_v46 = vadd.f32 %v223_v40, %v222_v35  ;;  %v319_v47 = vadd.f32 %v318_v41, %v317_v36  ;;  %v349_v48 = vadd.f32 %v348_v42, %v347_v37  ;;  %v379_v49 = vadd.f32 %v378_v43, %v377_v39 }
 0x115   :  { %v254_v51 = vadd.f32 %v253_v44, %v252_v38  ;;  %v6124_v52 = vsub.f32 %v6097_v0, %v193_v45  ;;  %v284_v3 = vpop.xlane.xlu0 %283  ;;  %v159_v11 = vadd.f32 %v158_v59, %v157_v50 }
 0x116   :  { %v350_v53 = vrot.slane %v349_v48, 1  ;;  %v380_v54 = vrot.slane %v379_v49, 2  ;;  %v225_v55 = vmul.f32 0.015625, %v224_v46  ;;  %v320_v56 = vmul.f32 0.015625, %v319_v47  ;;  %v410_v46 = vld [vmem:[%s5344_s12 + $0x18] sm:$0xff]  ;;  %v409_v47 = vld [vmem:[%s5344_s12 + $0x10] sm:$0xff] }
 0x117   :  { %v255_v57 = vrot.slane %v254_v51, 1  ;;  %v195_v58 = vmul.f32 %v6124_v52, %v6124_v52  ;;  %v285_v12 = vrot.slane %v284_v3, 4  ;;  %v160_v18 = vrot.slane %v159_v11, 2  ;;  %5600 = vmatprep.subr.mxu1 %v410_v46 }
 0x118   :  { %v351_v60 = vadd.f32 %v350_v53, %v349_v48  ;;  %v381_v61 = vadd.f32 %v380_v54, %v379_v49  ;;  %v6129_v62 = vsub.f32 %v6097_v0, %v225_v55  ;;  %v6132_v63 = vsub.f32 %v6099_v1, %v320_v56  ;;  %5601 = vmatpush3.msra.mxu1 %v410_v46  ;;  %v408_v48 = vld [vmem:[%s5344_s12 + $0x8] sm:$0xff]  ;;  %v407_v49 = vld [vmem:[%s5344_s12] sm:$0xff]  ;;  %s6057_s12 = smov 96  }
 0x119   :  { %v256_v2 = vadd.f32 %v255_v57, %v254_v51  ;;  %197 = vrot.lane.b32.xlu1 %v195_v58, %s6038_s6  ;;  %v286_v19 = vadd.f32 %v285_v12, %v284_v3  ;;  %v161_v21 = vadd.f32 %v160_v18, %v159_v11  ;;  %5602 = vmatprep.subr.mxu1 %v409_v47 }
 0x11a   :  { %v382_v4 = vrot.slane %v381_v61, 1  ;;  %v227_v5 = vmul.f32 %v6129_v62, %v6129_v62  ;;  %v322_v6 = vmul.f32 %v6132_v63, %v6132_v63  ;;  %v352_v7 = vmul.f32 0.015625, %v351_v60  ;;  %5603 = vmatpush3.msra.mxu1 %v409_v47 }
 0x11b   :  { %v257_v8 = vmul.f32 0.015625, %v256_v2  ;;  %v287_v22 = vrot.slane %v286_v19, 2  ;;  %v162_v23 = vrot.slane %v161_v21, 1  ;;  %5604 = vmatprep.subr.mxu1 %v408_v48 }
 0x11c   :  { %v383_v9 = vadd.f32 %v382_v4, %v381_v61  ;;  %229 = vrot.lane.b32.xlu0 %v227_v5, %s6039_s7  ;;  %v6141_v10 = vsub.f32 %v6099_v1, %v352_v7  ;;  %5605 = vmatpush3.msra.mxu1 %v408_v48 }
 0x11d   :  { %324 = vrot.lane.b32.xlu1 %v322_v6, %s6038_s6  ;;  %v6145_v13 = vsub.f32 %v6097_v0, %v257_v8  ;;  %v288_v24 = vadd.f32 %v287_v22, %v286_v19  ;;  %v163_v26 = vadd.f32 %v162_v23, %v161_v21  ;;  %5606 = vmatprep.subr.mxu1 %v407_v49 }
 0x11e   :  { %v354_v14 = vmul.f32 %v6141_v10, %v6141_v10  ;;  %v384_v15 = vmul.f32 0.015625, %v383_v9  ;;  %5607 = vmatpush3.msra.mxu1 %v407_v49 }
 0x11f   :  { %v259_v16 = vmul.f32 %v6145_v13, %v6145_v13  ;;  %v289_v25 = vrot.slane %v288_v24, 1  ;;  %v164_v27 = vmul.f32 0.015625, %v163_v26 }
 0x120   :  { %356 = vrot.lane.b32.xlu0 %v354_v14, %s6039_s7  ;;  %v6153_v17 = vsub.f32 %v6099_v1, %v384_v15 }
 0x121   :  { %261 = vrot.lane.b32.xlu1 %v259_v16, %s6040_s8  ;;  %v290_v28 = vadd.f32 %v289_v25, %v288_v24  ;;  %v6160_v29 = vsub.f32 %v6097_v0, %v164_v27 }
 0x122   :  { %v386_v20 = vmul.f32 %v6153_v17, %v6153_v17 }
 0x123   :  { %v291_v30 = vmul.f32 0.015625, %v290_v28  ;;  %v166_v31 = vmul.f32 %v6160_v29, %v6160_v29 }
 0x125   :  { %388 = vrot.lane.b32.xlu1 %v386_v20, %s6040_s8  ;;  %v6165_v32 = vsub.f32 %v6099_v1, %v291_v30  ;;  %v167_v33 = vsel %vm154_vm0, %v166_v31, 0.0 }
 0x127   :  { %v293_v34 = vmul.f32 %v6165_v32, %v6165_v32 }
 0x129   :  { %v294_v35 = vsel %vm154_vm0, %v293_v34, 0.0 }
 0x13f   :  { %168 = vadd.xlane.f32.xlu0 %v167_v33 }
 0x143   :  { %295 = vadd.xlane.f32.xlu0 %v294_v35 }
 0x18b   :  { %v198_v36 = vpop.permute.xlu1 %197 }
 0x18c   :  { %v200_v0 = vsel %vm154_vm0, %v198_v36, 0.0 }
 0x18d   :  { %201 = vadd.xlane.f32.xlu1 %v200_v0 }
 0x18e   :  { %v230_v37 = vpop.permute.xlu0 %229 }
 0x18f   :  { %v325_v38 = vpop.permute.xlu1 %324  ;;  %v232_v39 = vsel %vm154_vm0, %v230_v37, 0.0 }
 0x190   :  { %233 = vadd.xlane.f32.xlu0 %v232_v39  ;;  %v327_v1 = vsel %vm154_vm0, %v325_v38, 0.0 }
 0x191   :  { %328 = vadd.xlane.f32.xlu1 %v327_v1 }
 0x192   :  { %v357_v40 = vpop.permute.xlu0 %356 }
 0x193   :  { %v262_v41 = vpop.permute.xlu1 %261  ;;  %v359_v42 = vsel %vm154_vm0, %v357_v40, 0.0 }
 0x194   :  { %v264_v43 = vsel %vm154_vm0, %v262_v41, 0.0 }
 0x195   :  { %360 = vadd.xlane.f32.xlu1 %v359_v42  ;;  %265 = vadd.xlane.f32.xlu0 %v264_v43 }
 0x197   :  { %v389_v44 = vpop.permute.xlu1 %388 }
 0x198   :  { %v391_v45 = vsel %vm154_vm0, %v389_v44, 0.0 }
 0x199   :  { %392 = vadd.xlane.f32.xlu0 %v391_v45 }
 0x1c8   :  { %v169_v50 = vpop.xlane.xlu0 %168 }
 0x1c9   :  { %v170_v53 = vrot.slane %v169_v50, 4 }
 0x1cb   :  { %v171_v55 = vadd.f32 %v170_v53, %v169_v50 }
 0x1cc   :  { %v296_v51 = vpop.xlane.xlu0 %295 }
 0x1cd   :  { %v297_v54 = vrot.slane %v296_v51, 4  ;;  %v172_v57 = vrot.slane %v171_v55, 2 }
 0x1cf   :  { %v298_v56 = vadd.f32 %v297_v54, %v296_v51  ;;  %v173_v59 = vadd.f32 %v172_v57, %v171_v55 }
 0x1d1   :  { %v299_v58 = vrot.slane %v298_v56, 2  ;;  %v174_v5 = vrot.slane %v173_v59, 1 }
 0x1d3   :  { %v300_v2 = vadd.f32 %v299_v58, %v298_v56  ;;  %v175_v16 = vadd.f32 %v174_v5, %v173_v59 }
 0x1d5   :  { %v301_v11 = vrot.slane %v300_v2, 1  ;;  %v176_v33 = vmul.f32 0.015625, %v175_v16 }
 0x1d7   :  { %v302_v25 = vadd.f32 %v301_v11, %v300_v2  ;;  %v177_v47 = vadd.f32 1e-05, %v176_v33 }
 0x1d9   :  { %v303_v39 = vmul.f32 0.015625, %v302_v25 }
 0x1db   :  { %v304_v54 = vadd.f32 1e-05, %v303_v39 }
 0x216   :  { %v202_v60 = vpop.xlane.xlu1 %201 }
 0x217   :  { %v203_v61 = vrot.slane %v202_v60, 4 }
 0x219   :  { %v204_v3 = vadd.f32 %v203_v61, %v202_v60  ;;  %v234_v4 = vpop.xlane.xlu0 %233 }
 0x21a   :  { %v235_v6 = vrot.slane %v234_v4, 4  ;;  %v329_v7 = vpop.xlane.xlu1 %328 }
 0x21b   :  { %v205_v8 = vrot.slane %v204_v3, 2  ;;  %v330_v9 = vrot.slane %v329_v7, 4 }
 0x21c   :  { %v236_v12 = vadd.f32 %v235_v6, %v234_v4 }
 0x21d   :  { %v206_v14 = vadd.f32 %v205_v8, %v204_v3  ;;  %v331_v15 = vadd.f32 %v330_v9, %v329_v7 }
 0x21e   :  { %v237_v18 = vrot.slane %v236_v12, 2  ;;  %v266_v19 = vpop.xlane.xlu0 %265  ;;  %v361_v20 = vpop.xlane.xlu1 %360 }
 0x21f   :  { %v207_v21 = vrot.slane %v206_v14, 1  ;;  %v332_v22 = vrot.slane %v331_v15, 2  ;;  %v267_v23 = vrot.slane %v266_v19, 4  ;;  %v362_v24 = vrot.slane %v361_v20, 4 }
 0x220   :  { %v238_v26 = vadd.f32 %v237_v18, %v236_v12 }
 0x221   :  { %v208_v27 = vadd.f32 %v207_v21, %v206_v14  ;;  %v333_v28 = vadd.f32 %v332_v22, %v331_v15  ;;  %v268_v30 = vadd.f32 %v267_v23, %v266_v19  ;;  %v363_v31 = vadd.f32 %v362_v24, %v361_v20 }
 0x222   :  { %v239_v34 = vrot.slane %v238_v26, 1  ;;  %v393_v35 = vpop.xlane.xlu0 %392 }
 0x223   :  { %v209_v36 = vmul.f32 0.015625, %v208_v27  ;;  %v334_v0 = vrot.slane %v333_v28, 1  ;;  %v269_v37 = vrot.slane %v268_v30, 2  ;;  %v364_v38 = vrot.slane %v363_v31, 2 }
 0x224   :  { %v240_v1 = vadd.f32 %v239_v34, %v238_v26  ;;  %v394_v40 = vrot.slane %v393_v35, 4 }
 0x225   :  { %v210_v41 = vadd.f32 1e-05, %v209_v36  ;;  %v335_v42 = vadd.f32 %v334_v0, %v333_v28  ;;  %v270_v43 = vadd.f32 %v269_v37, %v268_v30  ;;  %v365_v44 = vadd.f32 %v364_v38, %v363_v31 }
 0x226   :  { %v241_v45 = vmul.f32 0.015625, %v240_v1  ;;  %v395_v46 = vadd.f32 %v394_v40, %v393_v35 }
 0x227   :  { %v336_v48 = vmul.f32 0.015625, %v335_v42  ;;  %v271_v49 = vrot.slane %v270_v43, 1  ;;  %v366_v50 = vrot.slane %v365_v44, 1  ;;  %5918 = vrsqrt.f32 %v210_v41  ;;  %v548_v41 = vld [vmem:[%s5348_s20 + $0x18] sm:$0xff]  ;;  %v547_v42 = vld [vmem:[%s5348_s20 + $0x10] sm:$0xff] }
 0x228   :  { %v242_v51 = vadd.f32 1e-05, %v241_v45  ;;  %v396_v53 = vrot.slane %v395_v46, 2  ;;  %5611 = vmatprep.subr.mxu1 %v548_v41 }
 0x229   :  { %v272_v55 = vadd.f32 %v271_v49, %v270_v43  ;;  %v367_v56 = vadd.f32 %v366_v50, %v365_v44  ;;  %v337_v57 = vadd.f32 1e-05, %v336_v48  ;;  %v546_v43 = vld [vmem:[%s5348_s20 + $0x8] sm:$0xff]  ;;  %v545_v44 = vld [vmem:[%s5348_s20] sm:$0xff]  ;;  %s6063_s20 = smov 56  }
 0x22a   :  { %5920 = vrsqrt.f32 %v242_v51  ;;  %v397_v58 = vadd.f32 %v396_v53, %v395_v46  ;;  %v5382_v53 = vld [vmem:[%s5346_s24] ss:$0 sm:$0xff]  ;;  %s6067_s24 = smov 72  }
 0x22b   :  { %5922 = vrsqrt.f32 %v177_v47  ;;  %v273_v59 = vmul.f32 0.015625, %v272_v55  ;;  %v368_v60 = vmul.f32 0.015625, %v367_v56 }
 0x22c   :  { %v398_v61 = vrot.slane %v397_v58, 1  ;;  %5924 = vrsqrt.f32 %v304_v54 }
 0x22d   :  { %v274_v2 = vadd.f32 1e-05, %v273_v59  ;;  %v369_v3 = vadd.f32 1e-05, %v368_v60  ;;  %5926 = vrsqrt.f32 %v337_v57 }
 0x22e   :  { %v399_v4 = vadd.f32 %v398_v61, %v397_v58  ;;  %v5383_v58 = vld [vmem:[%s5347_s28] ss:$0 sm:$0xff] }
 0x22f   :  { %5928 = vrsqrt.f32 %v274_v2  ;;  %v666_v2 = vld [vmem:[%s6226_s2 + $0x78] sm:$0xff] }
 0x230   :  { %5930 = vrsqrt.f32 %v369_v3  ;;  %v400_v5 = vmul.f32 0.015625, %v399_v4  ;;  %5622 = vmatprep.subr.mxu0 %v666_v2  ;;  %v665_v3 = vld [vmem:[%s6226_s2 + $0x70] sm:$0xff]  ;;  %v664_v4 = vld [vmem:[%s6226_s2 + $0x68] sm:$0xff] }
 0x231   :  { %5623 = vmatpush3.msra.mxu0 %v666_v2 }
 0x232   :  { %v401_v6 = vadd.f32 1e-05, %v400_v5  ;;  %5624 = vmatprep.subr.mxu0 %v665_v3  ;;  %v663_v5 = vld [vmem:[%s6226_s2 + $0x60] sm:$0xff] }
 0x233   :  { %5625 = vmatpush3.msra.mxu0 %v665_v3 }
 0x234   :  { %5932 = vrsqrt.f32 %v401_v6  ;;  %v5919_v7 = vpop.eup %5918  ;;  %5626 = vmatprep.subr.mxu0 %v664_v4  ;;  %v662_v6 = vld [vmem:[%s6226_s2 + $0x58] sm:$0xff] }
 0x235   :  { %v212_v11 = vmul.f32 %v5919_v7, %v6124_v52  ;;  %5627 = vmatpush3.msra.mxu0 %v664_v4  ;;  %v661_v7 = vld [vmem:[%s6226_s2 + $0x50] sm:$0xff]  ;;  %v5391_v4 = vld [vmem:[%s5353_s25] ss:$0 sm:$0xff]  ;;  %s6068_s25 = smov 40  }
 0x236   :  { %5628 = vmatprep.subr.mxu0 %v663_v5 }
 0x237   :  { %v5921_v8 = vpop.eup %5920  ;;  %5629 = vmatpush3.msra.mxu0 %v663_v5 }
 0x238   :  { %v5923_v9 = vpop.eup %5922  ;;  %v244_v14 = vmul.f32 %v5921_v8, %v6129_v62  ;;  %5630 = vmatprep.subr.mxu0 %v662_v6  ;;  %v660_v8 = vld [vmem:[%s6226_s2 + $0x48] sm:$0xff] }
 0x239   :  { %v5925_v12 = vpop.eup %5924  ;;  %v179_v16 = vmul.f32 %v5923_v9, %v6160_v29  ;;  %5631 = vmatpush3.msra.mxu0 %v662_v6  ;;  %v659_v9 = vld [vmem:[%s6226_s2 + $0x40] sm:$0xff] }
 0x23a   :  { %v5927_v15 = vpop.eup %5926  ;;  %v306_v29 = vmul.f32 %v5925_v12, %v6165_v32  ;;  %5632 = vmatprep.subr.mxu0 %v661_v7  ;;  %v657_v12 = vld [vmem:[%s6226_s2 + $0x30] sm:$0xff] }
 0x23b   :  { %v277_v21 = vsel %vm154_vm0, %v179_v16, %v212_v11  ;;  %v339_v23 = vmul.f32 %v5927_v15, %v6132_v63  ;;  %v5379_v63 = vld [vmem:[%s5345_s16] ss:$0 sm:$0xff]  ;;  %5633 = vmatpush3.msra.mxu0 %v661_v7  ;;  %v658_v11 = vld [vmem:[%s6226_s2 + $0x38] sm:$0xff] }
 0x23c   :  { %v5929_v18 = vpop.eup %5928  ;;  %v279_v22 = vsel %vm278_vm1, %v277_v21, %v244_v14  ;;  %5634 = vmatprep.subr.mxu0 %v660_v8  ;;  %v656_v14 = vld [vmem:[%s6226_s2 + $0x28] sm:$0xff]  ;;  %v655_v15 = vld [vmem:[%s6226_s2 + $0x20] sm:$0xff]  ;;  %v654_v16 = vld [vmem:[%s6226_s2 + $0x18] sm:$0xff] }
 0x23d   :  { %v5931_v19 = vpop.eup %5930  ;;  %v276_v20 = vmul.f32 %v5929_v18, %v6145_v13  ;;  %v404_v13 = vsel %vm154_vm0, %v306_v29, %v339_v23  ;;  %5635 = vmatpush3.msra.mxu0 %v660_v8  ;;  %v653_v18 = vld [vmem:[%s6226_s2 + $0x10] sm:$0xff]  ;;  %v5384_v21 = vld [vmem:[%s5349_s9] ss:$0 sm:$0xff]  ;;  %v6053_v8 = vmov 0.0  }
 0x23e   :  { %v371_v62 = vmul.f32 %v5931_v19, %v6141_v10  ;;  %5636 = vmatprep.subr.mxu0 %v659_v9  ;;  %v652_v19 = vld [vmem:[%s6226_s2 + $0x8] sm:$0xff] }
 0x23f   :  { %v281_v52 = vsel %vm280_vm2, %v279_v22, %v276_v20  ;;  %5637 = vmatpush3.msra.mxu0 %v659_v9  ;;  %v651_v20 = vld [vmem:[%s6226_s2] sm:$0xff] }
 0x240   :  { %5608 = vmatprep.mubr.msk.f32.mxu1 %vm418_vm3, %v281_v52  ;;  %v405_v26 = vsel %vm278_vm1, %v404_v13, %v371_v62  ;;  %5638 = vmatprep.subr.mxu0 %v658_v11  ;;  %v6283_v9 = vld [vmem:[%s6278_s30] sm:$0xff] }
 0x241   :  { %v5933_v24 = vpop.eup %5932  ;;  %5639 = vmatpush3.msra.mxu0 %v658_v11  ;;  %v891_v11 = vlaneseq }
 0x242   :  { %v403_v25 = vmul.f32 %v5933_v24, %v6153_v17  ;;  %5640 = vmatprep.subr.mxu0 %v657_v12 }
 0x243   :  { %5641 = vmatpush3.msra.mxu0 %v657_v12  ;;  %v6297_v12 = vshrl.u32 %v891_v11, 7 }
 0x244   :  { %v406_v27 = vsel %vm280_vm2, %v405_v26, %v403_v25  ;;  %5642 = vmatprep.subr.mxu0 %v656_v14 }
 0x245   :  { %5609 = vmatmul.mubr.msk.f32.vlgmr.msra.gmra.mxu1 %vm418_vm3, %v406_v27  ;;  %5643 = vmatpush3.msra.mxu0 %v656_v14  ;;  %v5392_v14 = vld [vmem:[%s5355_s4] ss:$0 sm:$0xff]  ;;  %s6071_s4 = smov 18  }
 0x246   :  { %5612 = vmatpush3.msra.mxu1 %v548_v41  ;;  %5644 = vmatprep.subr.mxu0 %v655_v15  ;;  %s5360_s10 = sld [smem:[%s7192_s0 + %s6071_s4]]  }
 0x247   :  { %5613 = vmatprep.subr.mxu1 %v547_v42  ;;  %5645 = vmatpush3.msra.mxu0 %v655_v15  ;;  %v6300_v15 = vsub.s32 0, %v6297_v12  ;;  %s5370_s4 = sld [smem:[%s7192_s0 + %s6078_s1]]  }
 0x248   :  { %5614 = vmatpush3.msra.mxu1 %v547_v42  ;;  %5646 = vmatprep.subr.mxu0 %v654_v16 }
 0x249   :  { %5615 = vmatprep.subr.mxu1 %v546_v43  ;;  %5647 = vmatpush3.msra.mxu0 %v654_v16 }
 0x24a   :  { %5616 = vmatpush3.msra.mxu1 %v546_v43  ;;  %5648 = vmatprep.subr.mxu0 %v653_v18 }
 0x24b   :  { %5617 = vmatprep.subr.mxu1 %v545_v44  ;;  %5649 = vmatpush3.msra.mxu0 %v653_v18  ;;  %v6302_v18 = vld [vmem:[%s5357_s11] sm:$0xf]  ;;  %s6072_s11 = smov 19  }
 0x24c   :  { %5618 = vmatpush3.msra.mxu1 %v545_v44  ;;  %5650 = vmatprep.subr.mxu0 %v652_v19  ;;  %s5361_s15 = sld [smem:[%s7192_s0 + %s6072_s11]]  }
 0x24d   :  { %5651 = vmatpush3.msra.mxu0 %v652_v19  ;;  %s5368_s11 = sld [smem:[%s7192_s0 + %s6079_s5]]  }
 0x24e   :  { %5652 = vmatprep.subr.mxu0 %v651_v20 }
 0x24f   :  { %5653 = vmatpush3.msra.mxu0 %v651_v20 }
 0x250   :  { %5698 = vmatprep.subr.mxu0 %v6053_v8 }
 0x305   :  { %v5610_v10 = vpop.f32.mrf.mxu1 }
 0x306   :  { %v6199_v28 = vadd.f32 %v5610_v10, %v5379_v63 }
 0x307   :  { %v491_v32 = vpop.f32.mrf.mxu1 }
 0x308   :  { %v6201_v30 = vadd.f32 %v5379_v63, %v491_v32  ;;  %v505_v17 = vsel %vm418_vm3, %v6199_v28, 0.0 }
 0x309   :  { %506 = vadd.xlane.f32.xlu0 %v505_v17 }
 0x30a   :  { %v502_v31 = vsel %vm418_vm3, %v6201_v30, 0.0 }
 0x30b   :  { %503 = vadd.xlane.f32.xlu1 %v502_v31  ;;  %v5389_v31 = vld [vmem:[%s5351_s13] ss:$0 sm:$0xff]  ;;  %s6058_s13 = smov 14  }
 0x30c   :  { %s5356_s16 = sld [smem:[%s7192_s0 + %s6058_s13]]   ;;  %s6080_s13 = smov 27  }
 0x392   :  { %v507_v33 = vpop.xlane.xlu0 %506 }
 0x393   :  { %v510_v34 = vmul.f32 0.03125, %v507_v33 }
 0x394   :  { %v504_v35 = vpop.xlane.xlu1 %503 }
 0x395   :  { %v512_v36 = vsub.f32 %v6199_v28, %v510_v34  ;;  %v509_v0 = vmul.f32 0.03125, %v504_v35 }
 0x397   :  { %v511_v37 = vsub.f32 %v6201_v30, %v509_v0  ;;  %v514_v38 = vmul.f32 %v512_v36, %v512_v36 }
 0x399   :  { %v518_v39 = vsel %vm418_vm3, %v514_v38, 0.0  ;;  %v513_v1 = vmul.f32 %v511_v37, %v511_v37 }
 0x39a   :  { %519 = vadd.xlane.f32.xlu0 %v518_v39 }
 0x39b   :  { %v515_v40 = vsel %vm418_vm3, %v513_v1, 0.0 }
 0x39c   :  { %516 = vadd.xlane.f32.xlu1 %v515_v40 }
 0x423   :  { %v520_v45 = vpop.xlane.xlu0 %519 }
 0x424   :  { %v522_v46 = vmul.f32 0.03125, %v520_v45 }
 0x425   :  { %v517_v47 = vpop.xlane.xlu1 %516 }
 0x426   :  { %v524_v48 = vadd.f32 1e-05, %v522_v46  ;;  %v521_v49 = vmul.f32 0.03125, %v517_v47  ;;  %v798_v47 = vld [vmem:[%s5354_s17 + $0x18] sm:$0xff] }
 0x427   :  { %5657 = vmatprep.subr.mxu1 %v798_v47 }
 0x428   :  { %5934 = vrsqrt.f32 %v524_v48  ;;  %v523_v50 = vadd.f32 1e-05, %v521_v49  ;;  %v797_v48 = vld [vmem:[%s5354_s17 + $0x10] sm:$0xff]  ;;  %v796_v49 = vld [vmem:[%s5354_s17 + $0x8] sm:$0xff] }
 0x42a   :  { %5936 = vrsqrt.f32 %v523_v50  ;;  %v795_v50 = vld [vmem:[%s5354_s17] sm:$0xff]  ;;  %s6060_s17 = smov 64  }
 0x435   :  { %v5935_v51 = vpop.eup %5934 }
 0x436   :  { %v528_v54 = vmul.f32 %v5935_v51, %v512_v36 }
 0x437   :  { %v5937_v55 = vpop.eup %5936 }
 0x438   :  { %v527_v56 = vmul.f32 %v5937_v55, %v511_v37  ;;  %v536_v57 = vmul.f32 %v5382_v53, %v528_v54 }
 0x43a   :  { %v535_v59 = vmul.f32 %v5382_v53, %v527_v56  ;;  %v544_v61 = vadd.f32 %v5383_v58, %v536_v57 }
 0x43c   :  { %v543_v60 = vadd.f32 %v5383_v58, %v535_v59  ;;  %v5390_v59 = vld [vmem:[%s5352_s21] ss:$0 sm:$0xff]  ;;  %s6064_s21 = smov 80  }
 0x43e   :  { %5619 = vmatprep.mubr.msk.f32.mxu1 %vm418_vm3, %v543_v60 }
 0x43f   :  { %5620 = vmatmul.mubr.msk.f32.vlgmr.msra.gmra.mxu1 %vm418_vm3, %v544_v61 }
 0x440   :  { %5658 = vmatpush3.msra.mxu1 %v798_v47 }
 0x441   :  { %5659 = vmatprep.subr.mxu1 %v797_v48 }
 0x442   :  { %5660 = vmatpush3.msra.mxu1 %v797_v48  ;;  %v898_v48 = vadd.s32 4, %v6297_v12 }
 0x443   :  { %5661 = vmatprep.subr.mxu1 %v796_v49 }
 0x444   :  { %5662 = vmatpush3.msra.mxu1 %v796_v49 }
 0x445   :  { %5663 = vmatprep.subr.mxu1 %v795_v50 }
 0x446   :  { %5664 = vmatpush3.msra.mxu1 %v795_v50 }
 0x447   :  { %5668 = vmatprep.subr.mxu1 %v6053_v8 }
 0x4ff   :  { %v5621_v22 = vpop.f32.mrf.mxu1 }
 0x500   :  { %v634_v23 = vadd.f32 %v5621_v22, %v5384_v21  ;;  %v6310_v22 = vrot.slane %v6302_v18, %v6300_v15 }
 0x501   :  { %v628_v52 = vpop.f32.mrf.mxu1 }
 0x502   :  { %v5388_v62 = vmul.f32 -1.442695, %v634_v23  ;;  %v629_v29 = vadd.f32 %v5384_v21, %v628_v52  ;;  %v6322_v52 = vld [vmem:[%s5356_s16] sm:$0xf]  ;;  %s6073_s16 = smov 21  }
 0x504   :  { %5938 = vpow2.f32 %v5388_v62  ;;  %v5387_v24 = vmul.f32 -1.442695, %v629_v29 }
 0x506   :  { %5940 = vpow2.f32 %v5387_v24 }
 0x511   :  { %v5939_v25 = vpop.eup %5938 }
 0x512   :  { %v644_v13 = vadd.f32 1.0, %v5939_v25  ;;  %v6059_v25 = vmov 1966171168  }
 0x513   :  { %v5941_v26 = vpop.eup %5940 }
 0x514   :  { %v643_v27 = vadd.f32 1.0, %v5941_v26  ;;  %5942 = vrcp.f32 %v644_v13  ;;  %v1014_v13 = vunpack.c.l.s4 %v6059_v25 }
 0x516   :  { %5944 = vrcp.f32 %v643_v27  ;;  %v1015_v26 = vunpack.c.0.s8 %v1014_v13 }
 0x518   :  { %v6336_v27 = vsub.s32 %v1015_v26, %v6297_v12 }
 0x521   :  { %v5943_v63 = vpop.eup %5942 }
 0x522   :  { %v650_v17 = vmul.f32 %v5943_v63, %v634_v23  ;;  %v6338_v63 = vand.u32 127, %v891_v11 }
 0x523   :  { %v5945_v10 = vpop.eup %5944 }
 0x524   :  { %v649_v32 = vmul.f32 %v5945_v10, %v629_v29  ;;  %v6326_v29 = vrot.slane %v6322_v52, %v6300_v15  ;;  %v895_v10 = vadd.s32 7, %v6297_v12  ;;  %vm905_vm10 = vcmp.eq.s32.totalorder %v6338_v63, %v898_v48 }
 0x525   :  { %vm909_vm13 = vcmp.eq.s32.totalorder %v6338_v63, %v6297_v12 }
 0x526   :  { %5654 = vmatprep.mubr.f32.mxu0 %v649_v32  ;;  %v899_v32 = vadd.s32 3, %v6297_v12  ;;  %vm902_vm5 = vcmp.eq.s32.totalorder %v6338_v63, %v895_v10  ;;  %v6405_v10 = vsel %vm909_vm13, 1.0, %v6053_v8 }
 0x527   :  { %5655 = vmatmul.mubr.f32.vlgmr.msra.gmra.mxu0 %v650_v17 }
 0x528   :  { %5700 = vmatprep.mubr.msk.f32.mxu0 %vm6054_vm4, %v6053_v8  ;;  %vm906_vm6 = vcmp.eq.s32.totalorder %v6338_v63, %v899_v32 }
 0x5e7   :  { %v5656_v33 = vpop.f32.mrf.mxu0 }
 0x5e8   :  { %v746_v34 = vadd.f32 %v5656_v33, %v5389_v31 }
 0x5e9   :  { %v740_v35 = vpop.f32.mrf.mxu0 }
 0x5ea   :  { %v6251_v36 = vadd.f32 %v746_v34, %v6199_v28  ;;  %v741_v0 = vadd.f32 %v5389_v31, %v740_v35  ;;  %v896_v31 = vadd.s32 6, %v6297_v12 }
 0x5ec   :  { %v6254_v37 = vadd.f32 %v741_v0, %v6201_v30  ;;  %v756_v38 = vsel %vm418_vm3, %v6251_v36, 0.0  ;;  %vm903_vm7 = vcmp.eq.s32.totalorder %v6338_v63, %v896_v31 }
 0x5ed   :  { %757 = vadd.xlane.f32.xlu0 %v756_v38 }
 0x5ee   :  { %v753_v39 = vsel %vm418_vm3, %v6254_v37, 0.0 }
 0x5ef   :  { %754 = vadd.xlane.f32.xlu1 %v753_v39 }
 0x676   :  { %v758_v1 = vpop.xlane.xlu0 %757 }
 0x677   :  { %v760_v40 = vmul.f32 0.03125, %v758_v1  ;;  %v897_v1 = vadd.s32 5, %v6297_v12 }
 0x678   :  { %v755_v41 = vpop.xlane.xlu1 %754 }
 0x679   :  { %v762_v42 = vsub.f32 %v6251_v36, %v760_v40  ;;  %v759_v43 = vmul.f32 0.03125, %v755_v41  ;;  %vm904_vm9 = vcmp.eq.s32.totalorder %v6338_v63, %v897_v1  ;;  %v6412_v1 = vsub.s32 %v6338_v63, %v6297_v12 }
 0x67b   :  { %v761_v28 = vsub.f32 %v6254_v37, %v759_v43  ;;  %v764_v44 = vmul.f32 %v762_v42, %v762_v42 }
 0x67d   :  { %v768_v30 = vsel %vm418_vm3, %v764_v44, 0.0  ;;  %v763_v45 = vmul.f32 %v761_v28, %v761_v28  ;;  %v6357_v44 = vsel %vm906_vm6, 1.0, %v6053_v8  ;;  %vm1183_vm6 = vcmask 1044484  }
 0x67e   :  { %769 = vadd.xlane.f32.xlu0 %v768_v30 }
 0x67f   :  { %v765_v46 = vsel %vm418_vm3, %v763_v45, 0.0  ;;  %v6361_v45 = vsel %vm903_vm7, 1.0, %v6053_v8  ;;  %vm1185_vm7 = vcmask 1045509  }
 0x680   :  { %766 = vadd.xlane.f32.xlu1 %v765_v46 }
 0x707   :  { %v770_v51 = vpop.xlane.xlu0 %769 }
 0x708   :  { %v772_v53 = vmul.f32 0.03125, %v770_v51 }
 0x709   :  { %v767_v54 = vpop.xlane.xlu1 %766 }
 0x70a   :  { %v774_v55 = vadd.f32 1e-05, %v772_v53  ;;  %v771_v56 = vmul.f32 0.03125, %v767_v54 }
 0x70c   :  { %5946 = vrsqrt.f32 %v774_v55  ;;  %v773_v57 = vadd.f32 1e-05, %v771_v56 }
 0x70e   :  { %5948 = vrsqrt.f32 %v773_v57  ;;  %v6373_v57 = vsel %vm904_vm9, 1.0, %v6053_v8  ;;  %vm1187_vm9 = vcmask 1046534  }
 0x719   :  { %v5947_v58 = vpop.eup %5946 }
 0x71a   :  { %v778_v60 = vmul.f32 %v5947_v58, %v762_v42  ;;  %v6353_v42 = vsel %vm902_vm5, 1.0, %v6053_v8  ;;  %v900_v58 = vadd.s32 2, %v6297_v12  ;;  %vm1181_vm5 = vcmask 1043459  }
 0x71b   :  { %v5949_v61 = vpop.eup %5948 }
 0x71c   :  { %v777_v2 = vmul.f32 %v5949_v61, %v761_v28  ;;  %v786_v3 = vmul.f32 %v5390_v59, %v778_v60  ;;  %vm907_vm11 = vcmp.eq.s32.totalorder %v6338_v63, %v900_v58 }
 0x71e   :  { %v785_v5 = vmul.f32 %v5390_v59, %v777_v2  ;;  %v794_v7 = vadd.f32 %v5391_v4, %v786_v3  ;;  %v6382_v3 = vsel %vm905_vm10, 1.0, %v6053_v8  ;;  %vm1189_vm10 = vcmask 1047559  }
 0x720   :  { %v793_v6 = vadd.f32 %v5391_v4, %v785_v5  ;;  %v901_v4 = vadd.s32 1, %v6297_v12 }
 0x722   :  { %5665 = vmatprep.mubr.msk.f32.mxu1 %vm418_vm3, %v793_v6  ;;  %vm908_vm12 = vcmp.eq.s32.totalorder %v6338_v63, %v901_v4 }
 0x723   :  { %5666 = vmatmul.mubr.msk.f32.vlgmr.msra.gmra.mxu1 %vm418_vm3, %v794_v7 }
 0x724   :  { %5669 = vmatpush3.msra.mxu1 %v6283_v9  ;;  %5670 = vmatprep.mubr.msk.f32.mxu1 %vm6054_vm4, %v6053_v8 }
 0x725   :  { %5673 = vmatprep.subr.mxu1 %v6053_v8 }
 0x7e3   :  { %v5667_v16 = vpop.f32.mrf.mxu1 }
 0x7e4   :  { %v6304_v19 = vadd.f32 %v5667_v16, %v5392_v14 }
 0x7e5   :  { %v878_v20 = vpop.f32.mrf.mxu1 }
 0x7e6   :  { %v6306_v21 = vadd.f32 %v5392_v14, %v878_v20  ;;  %v6390_v14 = vsel %vm907_vm11, 1.0, %v6053_v8 }
 0x7e8   :  { %1135 = vrot.lane.b32.xlu1 %v6306_v21, %s6057_s12  ;;  %v937_v23 = vadd.f32 %v6310_v22, %v6306_v21  ;;  %v932_v24 = vadd.f32 %v6326_v29, %v6306_v21 }
 0x7ea   :  { %5671 = vmatmul.mubr.msk.f32.vlgmr.msra.gmra.mxu1 %vm154_vm0, %v937_v23 }
 0x7eb   :  { %5675 = vmatprep.mubr.msk.f32.mxu1 %vm6054_vm4, %v6053_v8 }
 0x85a   :  { %v1136_v62 = vpop.permute.xlu1 %1135 }
 0x85b   :  { %5674 = vmatpush3.xpose.msk.msra.mxu1 %vm154_vm0, %v1136_v62 }
 0x85c   :  { %5678 = vmatprep.subr.mxu1 %v6053_v8 }
 0x85e   :  { %5676 = vmatmul.mubr.msk.f32.vlgmr.msra.gmra.mxu1 %vm154_vm0, %v932_v24  ;;  %v6397_v24 = vsel %vm908_vm12, 1.0, %v6053_v8 }
 0x85f   :  { %5680 = vmatprep.mubr.msk.f32.mxu1 %vm6054_vm4, %v6053_v8 }
 0x8aa   :  { %v1007_v17 = vpop.f32.mrf.mxu1 }
 0x8ab   :  { %v1012_v33 = vcombine.high %v1007_v17, %v1007_v17  ;;  %v1019_v34 = vrot.slane %v1007_v17, %v6336_v27 }
 0x8ac   :  { %v5672_v35 = vpop.f32.mrf.mxu1 }
 0x8ad   :  { %v1026_v0 = vrot.slane %v1012_v33, %v6336_v27  ;;  %v1027_v38 = vcombine.high %v1019_v34, %v1019_v34  ;;  %v1035_v39 = vrot.slane %v1019_v34, %v6336_v27 }
 0x8af   :  { %v1042_v40 = vrot.slane %v1026_v0, %v6336_v27  ;;  %v1049_v41 = vrot.slane %v1027_v38, %v6336_v27  ;;  %v1057_v43 = vcombine.high %v1035_v39, %v1035_v39  ;;  %v1064_v28 = vrot.slane %v1035_v39, %v6300_v15 }
 0x8b0   :  { %v1028_v49 = vcombine.high %v1026_v0, %v1026_v0 }
 0x8b1   :  { %v1080_v30 = vrot.slane %v1042_v40, %v6300_v15  ;;  %v1068_v46 = vrot.slane %v1049_v41, %v6300_v15  ;;  %v1101_v47 = vmul.f32 %v6353_v42, %v1064_v28  ;;  %v1072_v54 = vrot.slane %v1057_v43, %v6300_v15 }
 0x8b2   :  { %v1059_v55 = vcombine.high %v1049_v41, %v1049_v41  ;;  %v1056_v2 = vrot.slane %v1028_v49, %v6336_v27  ;;  %v1058_v11 = vcombine.high %v1042_v40, %v1042_v40 }
 0x8b3   :  { %v1105_v50 = vmul.f32 %v6357_v44, %v1080_v30  ;;  %v1110_v51 = vsel %vm1109_vm8, %v1101_v47, 0.0  ;;  %v1102_v53 = vmul.f32 %v6361_v45, %v1068_v46  ;;  %v1103_v60 = vmul.f32 %v6373_v57, %v1072_v54 }
 0x8b4   :  { %1111 = vadd.xlane.f32.xlu0 %v1110_v51  ;;  %v1076_v61 = vrot.slane %v1059_v55, %v6300_v15  ;;  %v1084_v7 = vrot.slane %v1056_v2, %v6300_v15  ;;  %v1088_v23 = vrot.slane %v1058_v11, %v6300_v15  ;;  %v1060_v62 = vcombine.high %v1056_v2, %v1056_v2 }
 0x8b5   :  { %v1122_v56 = vsel %vm1109_vm8, %v1105_v50, 0.0  ;;  %v1113_v59 = vsel %vm1109_vm8, %v1102_v53, 0.0  ;;  %v1116_v5 = vsel %vm1109_vm8, %v1103_v60, 0.0 }
 0x8b6   :  { %1123 = vadd.xlane.f32.xlu1 %v1122_v56  ;;  %v1104_v6 = vmul.f32 %v6382_v3, %v1076_v61  ;;  %v1106_v20 = vmul.f32 %v6390_v14, %v1084_v7  ;;  %v1107_v13 = vmul.f32 %v6397_v24, %v1088_v23  ;;  %v1092_v26 = vrot.slane %v1060_v62, %v6300_v15 }
 0x8b8   :  { %1114 = vadd.xlane.f32.xlu0 %v1113_v59  ;;  %v1119_v16 = vsel %vm1109_vm8, %v1104_v6, 0.0  ;;  %v1125_v25 = vsel %vm1109_vm8, %v1106_v20, 0.0  ;;  %v1128_v32 = vsel %vm1109_vm8, %v1107_v13, 0.0  ;;  %v1108_v17 = vmul.f32 %v6405_v10, %v1092_v26 }
 0x8ba   :  { %v1131_v31 = vsel %vm1109_vm8, %v1108_v17, 0.0 }
 0x8bc   :  { %1117 = vadd.xlane.f32.xlu0 %v1116_v5  ;;  %v6431_v5 = vsub.s32 1, %v6297_v12 }
 0x8be   :  { %v1367_v6 = vrot.slane %v6302_v18, %v6431_v5  ;;  %v1358_v7 = vrot.slane %v6322_v52, %v6431_v5 }
 0x8c0   :  { %1120 = vadd.xlane.f32.xlu0 %v1119_v16 }
 0x8c4   :  { %1126 = vadd.xlane.f32.xlu0 %v1125_v25 }
 0x8c8   :  { %1129 = vadd.xlane.f32.xlu0 %v1128_v32 }
 0x8cc   :  { %1132 = vadd.xlane.f32.xlu0 %v1131_v31 }
 0x91e   :  { %v1263_v33 = vpop.f32.mrf.mxu1 }
 0x920   :  { %v5677_v34 = vpop.f32.mrf.mxu1 }
 0x93d   :  { %v1112_v35 = vpop.xlane.xlu0 %1111 }
 0x93e   :  { %v1148_v28 = vrot.slane %v1112_v35, %v6412_v1  ;;  %v6456_v35 = vld [vmem:[%s6278_s30 + $0x8] sm:$0xff] }
 0x93f   :  { %v1124_v46 = vpop.xlane.xlu1 %1123 }
 0x940   :  { %v1164_v51 = vrot.slane %v1124_v46, %v6412_v1 }
 0x941   :  { %v1115_v0 = vpop.xlane.xlu0 %1114 }
 0x942   :  { %v1152_v40 = vrot.slane %v1115_v0, %v6412_v1 }
 0x944   :  { %v1178_v47 = vsel %vm1177_vm14, %v1152_v40, %v1148_v28 }
 0x945   :  { %v1118_v38 = vpop.xlane.xlu0 %1117 }
 0x946   :  { %v1156_v41 = vrot.slane %v1118_v38, %v6412_v1 }
 0x948   :  { %v1180_v48 = vsel %vm1179_vm15, %v1156_v41, %v1178_v47 }
 0x949   :  { %v1121_v39 = vpop.xlane.xlu0 %1120 }
 0x94a   :  { %v1160_v30 = vrot.slane %v1121_v39, %v6412_v1 }
 0x94c   :  { %v1182_v63 = vsel %vm1181_vm5, %v1160_v30, %v1180_v48 }
 0x94d   :  { %v1127_v43 = vpop.xlane.xlu0 %1126  ;;  %v1184_v54 = vsel %vm1183_vm6, %v1164_v51, %v1182_v63 }
 0x94e   :  { %v1168_v50 = vrot.slane %v1127_v43, %v6412_v1 }
 0x950   :  { %v1186_v56 = vsel %vm1185_vm7, %v1168_v50, %v1184_v54 }
 0x951   :  { %v1130_v49 = vpop.xlane.xlu0 %1129 }
 0x952   :  { %v1172_v53 = vrot.slane %v1130_v49, %v6412_v1 }
 0x954   :  { %v1188_v59 = vsel %vm1187_vm9, %v1172_v53, %v1186_v56 }
 0x955   :  { %v1133_v55 = vpop.xlane.xlu0 %1132 }
 0x956   :  { %v1176_v58 = vrot.slane %v1133_v55, %v6412_v1 }
 0x958   :  { %v1190_v60 = vsel %vm1189_vm10, %v1176_v58, %v1188_v59 }
 0x959   :  { %v1264_v61 = vadd.f32 %v1263_v33, %v1190_v60 }
 0x95b   :  { %v1267_v2 = vmul.f32 0.35355338, %v1264_v61 }
 0x95d   :  { %v1268_v4 = vsel %vm154_vm0, %v1267_v2, -inf }
 0x95e   :  { %1269 = vmax.xlane.f32.xlu0 %v1268_v4 }
 0x974   :  { %1369 = vrot.lane.b32.xlu0 %v1367_v6, %s6046_s29 }
 0x978   :  { %1279 = vrot.lane.b32.xlu0 %v6306_v21, %s6060_s17 }
 0x97c   :  { %1360 = vrot.lane.b32.xlu0 %v1358_v7, %s6046_s29 }
 0x980   :  { %1573 = vrot.lane.b32.xlu0 %v6306_v21, %s6061_s18 }
 0x9e7   :  { %v1270_v11 = vpop.xlane.xlu0 %1269 }
 0x9e8   :  { %v1271_v16 = vsub.f32 %v1267_v2, %v1270_v11 }
 0x9ea   :  { %v1272_v20 = vmul.f32 1.442695, %v1271_v16 }
 0x9eb   :  { %v6443_v23 = vpop.permute.xlu0 %1369 }
 0x9ec   :  { %5950 = vpow2.f32 %v1272_v20  ;;  %v1372_v17 = vadd.f32 %v6443_v23, %v6306_v21 }
 0x9ef   :  { %v1280_v62 = vpop.permute.xlu0 %1279 }
 0x9f0   :  { %5679 = vmatpush3.msra.mxu1 %v1280_v62 }
 0x9f1   :  { %5683 = vmatprep.subr.mxu1 %v6053_v8 }
 0x9f3   :  { %v6446_v25 = vpop.permute.xlu0 %1360 }
 0x9f4   :  { %v1363_v13 = vadd.f32 %v6446_v25, %v6306_v21 }
 0x9f6   :  { %1571 = vrot.lane.b32.xlu0 %v1363_v13, %s6038_s6 }
 0x9f7   :  { %v1574_v0 = vpop.permute.xlu0 %1573 }
 0x9f9   :  { %v5951_v26 = vpop.eup %5950 }
 0x9fa   :  { %v1274_v32 = vsel %vm154_vm0, %v5951_v26, 0.0 }
 0x9fb   :  { %1275 = vadd.xlane.f32.xlu1 %v1274_v32 }
 0xa0c   :  { %1374 = vrot.lane.b32.xlu1 %v1372_v17, %s6038_s6 }
 0xa68   :  { %v1572_v39 = vpop.permute.xlu0 %1571 }
 0xa84   :  { %v1276_v31 = vpop.xlane.xlu1 %1275 }
 0xa85   :  { %5952 = vrcp.f32 %v1276_v31 }
 0xa88   :  { %v1375_v38 = vpop.permute.xlu1 %1374 }
 0xa92   :  { %v5953_v33 = vpop.eup %5952 }
 0xa93   :  { %v1278_v34 = vmul.f32 %v5953_v33, %v5951_v26 }
 0xa95   :  { %5681 = vmatmul.mubr.msk.f32.vlgmr.msra.gmra.mxu1 %vm154_vm0, %v1278_v34 }
 0xa96   :  { %5684 = vmatpush3.msra.mxu1 %v6456_v35  ;;  %5685 = vmatprep.mubr.msk.f32.mxu1 %vm6054_vm4, %v6053_v8 }
 0xa97   :  { %5688 = vmatprep.subr.mxu1 %v6053_v8 }
 0xa99   :  { %5686 = vmatmul.mubr.msk.f32.vlgmr.msra.gmra.mxu1 %vm154_vm0, %v1375_v38 }
 0xa9a   :  { %5689 = vmatpush3.xpose.msk.msra.mxu1 %vm154_vm0, %v1574_v0  ;;  %5690 = vmatprep.mubr.msk.f32.mxu1 %vm6054_vm4, %v6053_v8 }
 0xa9b   :  { %5693 = vmatprep.subr.mxu1 %v6053_v8 }
 0xa9d   :  { %5691 = vmatmul.mubr.msk.f32.vlgmr.msra.gmra.mxu1 %vm154_vm0, %v1572_v39 }
 0xa9e   :  { %5695 = vmatprep.mubr.msk.f32.mxu1 %vm6054_vm4, %v6053_v8 }
 0xb55   :  { %v6471_v40 = vpop.f32.mrf.mxu1 }
 0xb57   :  { %v5682_v41 = vpop.f32.mrf.mxu1 }
 0xb59   :  { %v1444_v43 = vpop.f32.mrf.mxu1 }
 0xb5a   :  { %v1449_v28 = vcombine.high %v1444_v43, %v1444_v43  ;;  %v1456_v30 = vrot.slane %v1444_v43, %v6336_v27 }
 0xb5b   :  { %v5687_v46 = vpop.f32.mrf.mxu1 }
 0xb5c   :  { %v1463_v47 = vrot.slane %v1449_v28, %v6336_v27  ;;  %v1464_v48 = vcombine.high %v1456_v30, %v1456_v30  ;;  %v1472_v49 = vrot.slane %v1456_v30, %v6336_v27 }
 0xb5d   :  { %v6476_v63 = vpop.f32.mrf.mxu1 }
 0xb5e   :  { %v1479_v50 = vrot.slane %v1463_v47, %v6336_v27  ;;  %v1486_v51 = vrot.slane %v1464_v48, %v6336_v27  ;;  %v1494_v53 = vcombine.high %v1472_v49, %v1472_v49  ;;  %v1465_v54 = vcombine.high %v1463_v47, %v1463_v47 }
 0xb5f   :  { %v5692_v55 = vpop.f32.mrf.mxu1  ;;  %v1501_v56 = vrot.slane %v1472_v49, %v6300_v15  ;;  %v6506_v47 = vsub.s32 2, %v6297_v12 }
 0xb60   :  { %v1505_v58 = vrot.slane %v1486_v51, %v6300_v15  ;;  %v1509_v59 = vrot.slane %v1494_v53, %v6300_v15  ;;  %v1517_v60 = vrot.slane %v1479_v50, %v6300_v15  ;;  %v1496_v61 = vcombine.high %v1486_v51, %v1486_v51 }
 0xb61   :  { %v1538_v2 = vmul.f32 %v6353_v42, %v1501_v56  ;;  %v1495_v4 = vcombine.high %v1479_v50, %v1479_v50  ;;  %v1493_v20 = vrot.slane %v1465_v54, %v6336_v27  ;;  %v1797_v48 = vrot.slane %v6302_v18, %v6506_v47 }
 0xb62   :  { %v1539_v6 = vmul.f32 %v6361_v45, %v1505_v58  ;;  %v1540_v11 = vmul.f32 %v6373_v57, %v1509_v59  ;;  %v1513_v16 = vrot.slane %v1496_v61, %v6300_v15  ;;  %v1542_v13 = vmul.f32 %v6357_v44, %v1517_v60 }
 0xb63   :  { %v1546_v7 = vsel %vm1109_vm8, %v1538_v2, 0.0  ;;  %v1525_v26 = vrot.slane %v1495_v4, %v6300_v15  ;;  %v1521_v31 = vrot.slane %v1493_v20, %v6300_v15  ;;  %v1497_v33 = vcombine.high %v1493_v20, %v1493_v20 }
 0xb64   :  { %1547 = vadd.xlane.f32.xlu0 %v1546_v7  ;;  %v1549_v62 = vsel %vm1109_vm8, %v1539_v6, 0.0  ;;  %v1552_v32 = vsel %vm1109_vm8, %v1540_v11, 0.0  ;;  %v1541_v17 = vmul.f32 %v6382_v3, %v1513_v16  ;;  %v1558_v34 = vsel %vm1109_vm8, %v1542_v13, 0.0 }
 0xb65   :  { %1550 = vadd.xlane.f32.xlu1 %v1549_v62  ;;  %v1544_v0 = vmul.f32 %v6397_v24, %v1525_v26  ;;  %v1543_v39 = vmul.f32 %v6390_v14, %v1521_v31  ;;  %v1529_v41 = vrot.slane %v1497_v33, %v6300_v15  ;;  %v1788_v49 = vrot.slane %v6322_v52, %v6506_v47 }
 0xb66   :  { %v1555_v38 = vsel %vm1109_vm8, %v1541_v17, 0.0 }
 0xb67   :  { %v1564_v43 = vsel %vm1109_vm8, %v1544_v0, 0.0  ;;  %v1561_v28 = vsel %vm1109_vm8, %v1543_v39, 0.0  ;;  %v1545_v30 = vmul.f32 %v6405_v10, %v1529_v41 }
 0xb68   :  { %1553 = vadd.xlane.f32.xlu0 %v1552_v32 }
 0xb69   :  { %1559 = vadd.xlane.f32.xlu1 %v1558_v34  ;;  %v1567_v46 = vsel %vm1109_vm8, %v1545_v30, 0.0 }
 0xb6c   :  { %1556 = vadd.xlane.f32.xlu0 %v1555_v38  ;;  %v6532_v38 = vld [vmem:[%s6278_s30 + $0x10] sm:$0xff] }
 0xb6d   :  { %1565 = vadd.xlane.f32.xlu1 %v1564_v43  ;;  %5699 = vmatpush3.msra.mxu0 %v6532_v38 }
 0xb6e   :  { %5708 = vmatprep.subr.mxu0 %v6053_v8 }
 0xb70   :  { %1562 = vadd.xlane.f32.xlu0 %v1561_v28 }
 0xb74   :  { %1568 = vadd.xlane.f32.xlu0 %v1567_v46 }
 0xb7e   :  { %1799 = vrot.lane.b32.xlu1 %v1797_v48, %s6062_s19 }
 0xb82   :  { %1790 = vrot.lane.b32.xlu1 %v1788_v49, %s6062_s19 }
 0xbed   :  { %v1548_v50 = vpop.xlane.xlu0 %1547 }
 0xbee   :  { %v1551_v51 = vpop.xlane.xlu1 %1550  ;;  %v1586_v55 = vrot.slane %v1548_v50, %v6412_v1 }
 0xbef   :  { %v1590_v53 = vrot.slane %v1551_v51, %v6412_v1 }
 0xbf1   :  { %v1554_v54 = vpop.xlane.xlu0 %1553  ;;  %v1615_v58 = vsel %vm1177_vm14, %v1590_v53, %v1586_v55 }
 0xbf2   :  { %v1594_v56 = vrot.slane %v1554_v54, %v6412_v1  ;;  %v1560_v59 = vpop.xlane.xlu1 %1559 }
 0xbf3   :  { %v1602_v6 = vrot.slane %v1560_v59, %v6412_v1 }
 0xbf4   :  { %v1616_v2 = vsel %vm1179_vm15, %v1594_v56, %v1615_v58 }
 0xbf5   :  { %v1557_v60 = vpop.xlane.xlu0 %1556 }
 0xbf6   :  { %v1598_v61 = vrot.slane %v1557_v60, %v6412_v1  ;;  %v1566_v11 = vpop.xlane.xlu1 %1565 }
 0xbf7   :  { %v1610_v13 = vrot.slane %v1566_v11, %v6412_v1 }
 0xbf8   :  { %v1617_v4 = vsel %vm1181_vm5, %v1598_v61, %v1616_v2 }
 0xbf9   :  { %v1563_v7 = vpop.xlane.xlu0 %1562  ;;  %v1618_v20 = vsel %vm1183_vm6, %v1602_v6, %v1617_v4 }
 0xbfa   :  { %v1606_v16 = vrot.slane %v1563_v7, %v6412_v1  ;;  %v6536_v39 = vpop.permute.xlu1 %1799 }
 0xbfb   :  { %v1802_v41 = vadd.f32 %v6536_v39, %v6306_v21 }
 0xbfc   :  { %v1619_v62 = vsel %vm1185_vm7, %v1606_v16, %v1618_v20 }
 0xbfd   :  { %v1569_v26 = vpop.xlane.xlu0 %1568  ;;  %v1620_v17 = vsel %vm1187_vm9, %v1610_v13, %v1619_v62 }
 0xbfe   :  { %v1614_v32 = vrot.slane %v1569_v26, %v6412_v1 }
 0xc00   :  { %v1621_v31 = vsel %vm1189_vm10, %v1614_v32, %v1620_v17 }
 0xc01   :  { %v1694_v33 = vadd.f32 %v6476_v63, %v1621_v31  ;;  %v6543_v63 = vpop.permute.xlu1 %1790 }
 0xc02   :  { %v1793_v43 = vadd.f32 %v6543_v63, %v6306_v21 }
 0xc03   :  { %v1697_v34 = vmul.f32 0.35355338, %v1694_v33 }
 0xc05   :  { %v1698_v0 = vsel %vm154_vm0, %v1697_v34, -inf }
 0xc06   :  { %1699 = vmax.xlane.f32.xlu0 %v1698_v0 }
 0xc1c   :  { %1804 = vrot.lane.b32.xlu0 %v1802_v41, %s6039_s7 }
 0xc20   :  { %1709 = vrot.lane.b32.xlu0 %v6306_v21, %s6063_s20 }
 0xc24   :  { %2003 = vrot.lane.b32.xlu0 %v6306_v21, %s6064_s21 }
 0xc28   :  { %2001 = vrot.lane.b32.xlu0 %v1793_v43, %s6039_s7 }
 0xc8f   :  { %v1700_v28 = vpop.xlane.xlu0 %1699 }
 0xc90   :  { %v1701_v30 = vsub.f32 %v1697_v34, %v1700_v28 }
 0xc92   :  { %v1702_v46 = vmul.f32 1.442695, %v1701_v30 }
 0xc93   :  { %v1805_v48 = vpop.permute.xlu0 %1804 }
 0xc94   :  { %5954 = vpow2.f32 %v1702_v46  ;;  %5701 = vmatmul.mubr.msk.f32.vlgmr.msra.gmra.mxu0 %vm154_vm0, %v1805_v48 }
 0xc95   :  { %5710 = vmatprep.mubr.msk.f32.mxu0 %vm6054_vm4, %v6053_v8 }
 0xc97   :  { %v1710_v49 = vpop.permute.xlu0 %1709 }
 0xc98   :  { %5694 = vmatpush3.msra.mxu1 %v1710_v49 }
 0xc99   :  { %5703 = vmatprep.subr.mxu1 %v6053_v8 }
 0xc9b   :  { %v2004_v55 = vpop.permute.xlu0 %2003 }
 0xc9f   :  { %v2002_v58 = vpop.permute.xlu0 %2001 }
 0xca1   :  { %v5955_v50 = vpop.eup %5954 }
 0xca2   :  { %v1704_v51 = vsel %vm154_vm0, %v5955_v50, 0.0 }
 0xca3   :  { %1705 = vadd.xlane.f32.xlu1 %v1704_v51 }
 0xd2c   :  { %v1706_v53 = vpop.xlane.xlu1 %1705 }
 0xd2d   :  { %5956 = vrcp.f32 %v1706_v53 }
 0xd3a   :  { %v5957_v54 = vpop.eup %5956 }
 0xd3b   :  { %v1708_v56 = vmul.f32 %v5957_v54, %v5955_v50 }
 0xd3d   :  { %5696 = vmatmul.mubr.msk.f32.vlgmr.msra.gmra.mxu1 %vm154_vm0, %v1708_v56 }
 0xd3e   :  { %5704 = vmatpush3.xpose.msk.msra.mxu1 %vm154_vm0, %v2004_v55  ;;  %5705 = vmatprep.mubr.msk.f32.mxu1 %vm6054_vm4, %v6053_v8 }
 0xd3f   :  { %5713 = vmatprep.subr.mxu1 %v6053_v8 }
 0xd41   :  { %5706 = vmatmul.mubr.msk.f32.vlgmr.msra.gmra.mxu1 %vm154_vm0, %v2002_v58 }
 0xd42   :  { %5715 = vmatprep.mubr.msk.f32.mxu1 %vm6054_vm4, %v6053_v8 }
 0xd54   :  { %v1874_v59 = vpop.f32.mrf.mxu0 }
 0xd55   :  { %v1879_v60 = vcombine.high %v1874_v59, %v1874_v59  ;;  %v1886_v61 = vrot.slane %v1874_v59, %v6336_v27 }
 0xd56   :  { %v5702_v2 = vpop.f32.mrf.mxu0 }
 0xd57   :  { %v1893_v4 = vrot.slane %v1879_v60, %v6336_v27  ;;  %v1894_v6 = vcombine.high %v1886_v61, %v1886_v61  ;;  %v1902_v7 = vrot.slane %v1886_v61, %v6336_v27 }
 0xd59   :  { %v1895_v11 = vcombine.high %v1893_v4, %v1893_v4  ;;  %v1916_v16 = vrot.slane %v1894_v6, %v6336_v27  ;;  %v1924_v20 = vcombine.high %v1902_v7, %v1902_v7  ;;  %v1931_v62 = vrot.slane %v1902_v7, %v6300_v15 }
 0xd5a   :  { %v1909_v41 = vrot.slane %v1893_v4, %v6336_v27  ;;  %v6594_v7 = vsub.s32 3, %v6297_v12 }
 0xd5b   :  { %v1935_v13 = vrot.slane %v1916_v16, %v6300_v15  ;;  %v1923_v26 = vrot.slane %v1895_v11, %v6336_v27  ;;  %v1939_v32 = vrot.slane %v1924_v20, %v6300_v15  ;;  %v1926_v17 = vcombine.high %v1916_v16, %v1916_v16 }
 0xd5c   :  { %v1968_v31 = vmul.f32 %v6353_v42, %v1931_v62  ;;  %v1947_v55 = vrot.slane %v1909_v41, %v6300_v15  ;;  %v1925_v56 = vcombine.high %v1909_v41, %v1909_v41  ;;  %v2227_v11 = vrot.slane %v6302_v18, %v6594_v7 }
 0xd5d   :  { %v1969_v33 = vmul.f32 %v6361_v45, %v1935_v13  ;;  %v1951_v34 = vrot.slane %v1923_v26, %v6300_v15  ;;  %v1927_v0 = vcombine.high %v1923_v26, %v1923_v26  ;;  %v1970_v28 = vmul.f32 %v6373_v57, %v1939_v32 }
 0xd5e   :  { %v1976_v43 = vsel %vm1109_vm8, %v1968_v31, 0.0  ;;  %v1943_v49 = vrot.slane %v1926_v17, %v6300_v15  ;;  %v1972_v60 = vmul.f32 %v6357_v44, %v1947_v55  ;;  %v1955_v61 = vrot.slane %v1925_v56, %v6300_v15 }
 0xd5f   :  { %1977 = vadd.xlane.f32.xlu0 %v1976_v43  ;;  %v1979_v30 = vsel %vm1109_vm8, %v1969_v33, 0.0  ;;  %v1973_v46 = vmul.f32 %v6390_v14, %v1951_v34  ;;  %v1959_v48 = vrot.slane %v1927_v0, %v6300_v15  ;;  %v1982_v53 = vsel %vm1109_vm8, %v1970_v28, 0.0 }
 0xd60   :  { %1980 = vadd.xlane.f32.xlu1 %v1979_v30  ;;  %v1971_v54 = vmul.f32 %v6382_v3, %v1943_v49  ;;  %v1988_v2 = vsel %vm1109_vm8, %v1972_v60, 0.0  ;;  %v1974_v4 = vmul.f32 %v6397_v24, %v1955_v61  ;;  %v2218_v16 = vrot.slane %v6322_v52, %v6594_v7 }
 0xd61   :  { %v1991_v50 = vsel %vm1109_vm8, %v1973_v46, 0.0  ;;  %v1975_v51 = vmul.f32 %v6405_v10, %v1959_v48 }
 0xd62   :  { %v1985_v59 = vsel %vm1109_vm8, %v1971_v54, 0.0  ;;  %v1994_v6 = vsel %vm1109_vm8, %v1974_v4, 0.0  ;;  %v6621_v4 = vld [vmem:[%s6278_s30 + $0x18] sm:$0xff]  ;;  %s6070_s30 = smov 20  }
 0xd63   :  { %1992 = vadd.xlane.f32.xlu0 %v1991_v50  ;;  %v1997_v58 = vsel %vm1109_vm8, %v1975_v51, 0.0  ;;  %5714 = vmatpush3.msra.mxu1 %v6621_v4  ;;  %s5362_s3 = sld [smem:[%s7192_s0 + %s6070_s30]]  }
 0xd64   :  { %1983 = vadd.xlane.f32.xlu1 %v1982_v53  ;;  %5723 = vmatprep.subr.mxu1 %v6053_v8  ;;  %s5367_s30 = sld [smem:[%s7192_s0 + %s6077_s26]]  }
 0xd67   :  { %1998 = vadd.xlane.f32.xlu0 %v1997_v58 }
 0xd68   :  { %1986 = vadd.xlane.f32.xlu1 %v1985_v59 }
 0xd6c   :  { %1989 = vadd.xlane.f32.xlu1 %v1988_v2 }
 0xd70   :  { %1995 = vadd.xlane.f32.xlu1 %v1994_v6 }
 0xd81   :  { %2229 = vrot.lane.b32.xlu1 %v2227_v11, %s6065_s22 }
 0xd85   :  { %2220 = vrot.lane.b32.xlu1 %v2218_v16, %s6065_s22 }
 0xde8   :  { %v1978_v13 = vpop.xlane.xlu0 %1977 }
 0xde9   :  { %v1981_v20 = vpop.xlane.xlu1 %1980  ;;  %v2016_v31 = vrot.slane %v1978_v13, %v6412_v1 }
 0xdea   :  { %v2020_v32 = vrot.slane %v1981_v20, %v6412_v1 }
 0xdec   :  { %v1993_v34 = vpop.xlane.xlu0 %1992  ;;  %v2045_v52 = vsel %vm1177_vm14, %v2020_v32, %v2016_v31 }
 0xded   :  { %v1984_v62 = vpop.xlane.xlu1 %1983  ;;  %v2036_v48 = vrot.slane %v1993_v34, %v6412_v1 }
 0xdee   :  { %v2024_v17 = vrot.slane %v1984_v62, %v6412_v1 }
 0xdf0   :  { %v2046_v41 = vsel %vm1179_vm15, %v2024_v17, %v2045_v52  ;;  %v1999_v49 = vpop.xlane.xlu0 %1998 }
 0xdf1   :  { %v1987_v26 = vpop.xlane.xlu1 %1986  ;;  %v2044_v54 = vrot.slane %v1999_v49, %v6412_v1 }
 0xdf2   :  { %v2028_v18 = vrot.slane %v1987_v26, %v6412_v1 }
 0xdf4   :  { %v2047_v43 = vsel %vm1181_vm5, %v2028_v18, %v2046_v41 }
 0xdf5   :  { %v1990_v33 = vpop.xlane.xlu1 %1989 }
 0xdf6   :  { %v2032_v0 = vrot.slane %v1990_v33, %v6412_v1 }
 0xdf8   :  { %v2048_v30 = vsel %vm1183_vm6, %v2032_v0, %v2047_v43  ;;  %v2661_v43 = vadd.f32 %v6310_v22, %v6304_v19 }
 0xdf9   :  { %v1996_v28 = vpop.xlane.xlu1 %1995  ;;  %v2049_v51 = vsel %vm1185_vm7, %v2036_v48, %v2048_v30 }
 0xdfa   :  { %v2040_v46 = vrot.slane %v1996_v28, %v6412_v1 }
 0xdfc   :  { %v2050_v53 = vsel %vm1187_vm9, %v2040_v46, %v2049_v51 }
 0xdfd   :  { %v6613_v50 = vpop.f32.mrf.mxu1  ;;  %v2051_v56 = vsel %vm1189_vm10, %v2044_v54, %v2050_v53  ;;  %v6625_v6 = vpop.permute.xlu1 %2229 }
 0xdfe   :  { %v2232_v11 = vadd.f32 %v6625_v6, %v6306_v21 }
 0xdff   :  { %v5697_v55 = vpop.f32.mrf.mxu1 }
 0xe01   :  { %v2123_v58 = vpop.f32.mrf.mxu1  ;;  %v6632_v16 = vpop.permute.xlu1 %2220 }
 0xe02   :  { %v2124_v59 = vadd.f32 %v2123_v58, %v2051_v56  ;;  %v2223_v20 = vadd.f32 %v6632_v16, %v6306_v21 }
 0xe03   :  { %v5707_v60 = vpop.f32.mrf.mxu1 }
 0xe04   :  { %v2127_v61 = vmul.f32 0.35355338, %v2124_v59 }
 0xe06   :  { %v2128_v2 = vsel %vm154_vm0, %v2127_v61, -inf }
 0xe07   :  { %2129 = vmax.xlane.f32.xlu0 %v2128_v2 }
 0xe1d   :  { %2234 = vrot.lane.b32.xlu0 %v2232_v11, %s6040_s8 }
 0xe21   :  { %2139 = vrot.lane.b32.xlu0 %v6306_v21, %s6066_s23 }
 0xe25   :  { %2433 = vrot.lane.b32.xlu0 %v6306_v21, %s6067_s24 }
 0xe29   :  { %2431 = vrot.lane.b32.xlu0 %v2223_v20, %s6040_s8 }
 0xe90   :  { %v2130_v62 = vpop.xlane.xlu0 %2129 }
 0xe91   :  { %v2131_v13 = vsub.f32 %v2127_v61, %v2130_v62 }
 0xe93   :  { %v2132_v26 = vmul.f32 1.442695, %v2131_v13 }
 0xe94   :  { %v2235_v32 = vpop.permute.xlu0 %2234 }
 0xe95   :  { %5958 = vpow2.f32 %v2132_v26  ;;  %5716 = vmatmul.mubr.msk.f32.vlgmr.msra.gmra.mxu1 %vm154_vm0, %v2235_v32 }
 0xe96   :  { %5725 = vmatprep.mubr.msk.f32.mxu1 %vm6054_vm4, %v6053_v8 }
 0xe98   :  { %v2140_v17 = vpop.permute.xlu0 %2139 }
 0xe99   :  { %5709 = vmatpush3.msra.mxu0 %v2140_v17 }
 0xe9a   :  { %5718 = vmatprep.subr.mxu0 %v6053_v8 }
 0xe9c   :  { %v2434_v0 = vpop.permute.xlu0 %2433 }
 0xea0   :  { %v2432_v41 = vpop.permute.xlu0 %2431 }
 0xea2   :  { %v5959_v31 = vpop.eup %5958 }
 0xea3   :  { %v2134_v18 = vsel %vm154_vm0, %v5959_v31, 0.0 }
 0xea4   :  { %2135 = vadd.xlane.f32.xlu1 %v2134_v18 }
 0xf2d   :  { %v2136_v33 = vpop.xlane.xlu1 %2135 }
 0xf2e   :  { %5960 = vrcp.f32 %v2136_v33 }
 0xf3b   :  { %v5961_v34 = vpop.eup %5960 }
 0xf3c   :  { %v2138_v52 = vmul.f32 %v5961_v34, %v5959_v31 }
 0xf3e   :  { %5711 = vmatmul.mubr.msk.f32.vlgmr.msra.gmra.mxu0 %vm154_vm0, %v2138_v52 }
 0xf3f   :  { %5719 = vmatpush3.xpose.msk.msra.mxu0 %vm154_vm0, %v2434_v0  ;;  %5720 = vmatprep.mubr.msk.f32.mxu0 %vm6054_vm4, %v6053_v8 }
 0xf40   :  { %5728 = vmatprep.subr.mxu0 %v6053_v8 }
 0xf42   :  { %5721 = vmatmul.mubr.msk.f32.vlgmr.msra.gmra.mxu0 %vm154_vm0, %v2432_v41 }
 0xf43   :  { %5729 = vmatpush3.msra.mxu0 %v6283_v9  ;;  %5730 = vmatprep.mubr.msk.f32.mxu0 %vm6054_vm4, %v6053_v8 }
 0xf44   :  { %5738 = vmatprep.subr.mxu0 %v6053_v8 }
 0xf46   :  { %5731 = vmatmul.mubr.msk.f32.vlgmr.msra.gmra.mxu0 %vm154_vm0, %v2661_v43 }
 0xf47   :  { %5740 = vmatprep.mubr.msk.f32.mxu0 %vm6054_vm4, %v6053_v8 }
 0xf55   :  { %v2304_v28 = vpop.f32.mrf.mxu1 }
 0xf56   :  { %v2309_v30 = vcombine.high %v2304_v28, %v2304_v28  ;;  %v2316_v46 = vrot.slane %v2304_v28, %v6336_v27 }
 0xf57   :  { %v5717_v48 = vpop.f32.mrf.mxu1 }
 0xf58   :  { %v2323_v9 = vrot.slane %v2309_v30, %v6336_v27  ;;  %v2324_v49 = vcombine.high %v2316_v46, %v2316_v46  ;;  %v2332_v51 = vrot.slane %v2316_v46, %v6336_v27 }
 0xf5a   :  { %v2325_v53 = vcombine.high %v2323_v9, %v2323_v9  ;;  %v2346_v22 = vrot.slane %v2324_v49, %v6336_v27  ;;  %v2354_v54 = vcombine.high %v2332_v51, %v2332_v51  ;;  %v2361_v55 = vrot.slane %v2332_v51, %v6300_v15 }
 0xf5b   :  { %v2339_v62 = vrot.slane %v2323_v9, %v6336_v27 }
 0xf5c   :  { %v2365_v56 = vrot.slane %v2346_v22, %v6300_v15  ;;  %v2353_v58 = vrot.slane %v2325_v53, %v6336_v27  ;;  %v2369_v59 = vrot.slane %v2354_v54, %v6300_v15  ;;  %v2356_v60 = vcombine.high %v2346_v22, %v2346_v22 }
 0xf5d   :  { %v2398_v61 = vmul.f32 %v6353_v42, %v2361_v55  ;;  %v2377_v41 = vrot.slane %v2339_v62, %v6300_v15  ;;  %v2355_v43 = vcombine.high %v2339_v62, %v2339_v62 }
 0xf5e   :  { %v2399_v2 = vmul.f32 %v6361_v45, %v2365_v56  ;;  %v2381_v11 = vrot.slane %v2353_v58, %v6300_v15  ;;  %v2357_v20 = vcombine.high %v2353_v58, %v2353_v58  ;;  %v2400_v26 = vmul.f32 %v6373_v57, %v2369_v59 }
 0xf5f   :  { %v2406_v13 = vsel %vm1109_vm8, %v2398_v61, 0.0  ;;  %v2373_v18 = vrot.slane %v2356_v60, %v6300_v15  ;;  %v2402_v46 = vmul.f32 %v6357_v44, %v2377_v41  ;;  %v2385_v48 = vrot.slane %v2355_v43, %v6300_v15 }
 0xf60   :  { %2407 = vadd.xlane.f32.xlu0 %v2406_v13  ;;  %v2409_v32 = vsel %vm1109_vm8, %v2399_v2, 0.0  ;;  %v2403_v17 = vmul.f32 %v6390_v14, %v2381_v11  ;;  %v2389_v31 = vrot.slane %v2357_v20, %v6300_v15  ;;  %v2412_v0 = vsel %vm1109_vm8, %v2400_v26, 0.0 }
 0xf61   :  { %2410 = vadd.xlane.f32.xlu1 %v2409_v32  ;;  %v2401_v52 = vmul.f32 %v6382_v3, %v2373_v18  ;;  %v2418_v9 = vsel %vm1109_vm8, %v2402_v46, 0.0  ;;  %v2404_v49 = vmul.f32 %v6397_v24, %v2385_v48 }
 0xf62   :  { %v2421_v33 = vsel %vm1109_vm8, %v2403_v17, 0.0  ;;  %v2405_v34 = vmul.f32 %v6405_v10, %v2389_v31 }
 0xf63   :  { %v2415_v30 = vsel %vm1109_vm8, %v2401_v52, 0.0  ;;  %v2424_v51 = vsel %vm1109_vm8, %v2404_v49, 0.0 }
 0xf64   :  { %2422 = vadd.xlane.f32.xlu0 %v2421_v33  ;;  %v2427_v28 = vsel %vm1109_vm8, %v2405_v34, 0.0 }
 0xf65   :  { %2413 = vadd.xlane.f32.xlu1 %v2412_v0 }
 0xf68   :  { %2428 = vadd.xlane.f32.xlu0 %v2427_v28 }
 0xf69   :  { %2416 = vadd.xlane.f32.xlu1 %v2415_v30 }
 0xf6d   :  { %2419 = vadd.xlane.f32.xlu1 %v2418_v9 }
 0xf71   :  { %2425 = vadd.xlane.f32.xlu1 %v2424_v51 }
 0xfe9   :  { %v2408_v54 = vpop.xlane.xlu0 %2407 }
 0xfea   :  { %v2411_v53 = vpop.xlane.xlu1 %2410  ;;  %v2446_v59 = vrot.slane %v2408_v54, %v6412_v1 }
 0xfeb   :  { %v2450_v56 = vrot.slane %v2411_v53, %v6412_v1 }
 0xfed   :  { %v2423_v2 = vpop.xlane.xlu0 %2422  ;;  %v2475_v20 = vsel %vm1177_vm14, %v2450_v56, %v2446_v59 }
 0xfee   :  { %v2414_v22 = vpop.xlane.xlu1 %2413  ;;  %v2466_v31 = vrot.slane %v2423_v2, %v6412_v1 }
 0xfef   :  { %v2454_v58 = vrot.slane %v2414_v22, %v6412_v1 }
 0xff1   :  { %v2476_v62 = vsel %vm1179_vm15, %v2454_v58, %v2475_v20  ;;  %v2429_v18 = vpop.xlane.xlu0 %2428 }
 0xff2   :  { %v2417_v55 = vpop.xlane.xlu1 %2416  ;;  %v2474_v52 = vrot.slane %v2429_v18, %v6412_v1 }
 0xff3   :  { %v2458_v60 = vrot.slane %v2417_v55, %v6412_v1 }
 0xff5   :  { %v2477_v13 = vsel %vm1181_vm5, %v2458_v60, %v2476_v62 }
 0xff6   :  { %v2420_v61 = vpop.xlane.xlu1 %2419 }
 0xff7   :  { %v2462_v11 = vrot.slane %v2420_v61, %v6412_v1 }
 0xff9   :  { %v2478_v32 = vsel %vm1183_vm6, %v2462_v11, %v2477_v13 }
 0xffa   :  { %v2426_v26 = vpop.xlane.xlu1 %2425  ;;  %v2479_v34 = vsel %vm1185_vm7, %v2466_v31, %v2478_v32 }
 0xffb   :  { %v2470_v17 = vrot.slane %v2426_v26, %v6412_v1 }
 0xffd   :  { %v2480_v0 = vsel %vm1187_vm9, %v2470_v17, %v2479_v34 }
 0xffe   :  { %v6700_v33 = vpop.f32.mrf.mxu0  ;;  %v2481_v43 = vsel %vm1189_vm10, %v2474_v52, %v2480_v0 }
0x1000   :  { %v5712_v41 = vpop.f32.mrf.mxu0 }
0x1002   :  { %v2553_v28 = vpop.f32.mrf.mxu0 }
0x1003   :  { %v2554_v30 = vadd.f32 %v2553_v28, %v2481_v43 }
0x1004   :  { %v5722_v46 = vpop.f32.mrf.mxu0 }
0x1005   :  { %v2557_v48 = vmul.f32 0.35355338, %v2554_v30 }
0x1006   :  { %v2731_v9 = vpop.f32.mrf.mxu0 }
0x1007   :  { %v2558_v49 = vsel %vm154_vm0, %v2557_v48, -inf  ;;  %v2743_v53 = vrot.slane %v2731_v9, %v6336_v27  ;;  %v2736_v22 = vcombine.high %v2731_v9, %v2731_v9 }
0x1008   :  { %v5732_v51 = vpop.f32.mrf.mxu0  ;;  %2559 = vmax.xlane.f32.xlu1 %v2558_v49 }
0x1009   :  { %v2759_v54 = vrot.slane %v2743_v53, %v6336_v27  ;;  %v2750_v55 = vrot.slane %v2736_v22, %v6336_v27  ;;  %v2751_v28 = vcombine.high %v2743_v53, %v2743_v53 }
0x100b   :  { %v2781_v56 = vcombine.high %v2759_v54, %v2759_v54  ;;  %v2788_v58 = vrot.slane %v2759_v54, %v6300_v15  ;;  %v2766_v59 = vrot.slane %v2750_v55, %v6336_v27  ;;  %v2773_v30 = vrot.slane %v2751_v28, %v6336_v27 }
0x100c   :  { %v2752_v46 = vcombine.high %v2750_v55, %v2750_v55 }
0x100d   :  { %v2825_v60 = vmul.f32 %v6353_v42, %v2788_v58  ;;  %v2796_v61 = vrot.slane %v2781_v56, %v6300_v15  ;;  %v2804_v11 = vrot.slane %v2766_v59, %v6300_v15  ;;  %v2782_v20 = vcombine.high %v2766_v59, %v2766_v59 }
0x100e   :  { %v2792_v9 = vrot.slane %v2773_v30, %v6300_v15  ;;  %v2780_v22 = vrot.slane %v2752_v46, %v6336_v27 }
0x100f   :  { %v2833_v2 = vsel %vm1109_vm8, %v2825_v60, 0.0  ;;  %v2829_v13 = vmul.f32 %v6357_v44, %v2804_v11  ;;  %v2812_v26 = vrot.slane %v2782_v20, %v6300_v15  ;;  %v3072_v11 = vadd.f32 %v6443_v23, %v6304_v19 }
0x1010   :  { %v2826_v49 = vmul.f32 %v6361_v45, %v2792_v9  ;;  %v2808_v58 = vrot.slane %v2780_v22, %v6300_v15  ;;  %v2784_v59 = vcombine.high %v2780_v22, %v2780_v22  ;;  %v2660_v23 = vadd.f32 %v6326_v29, %v6304_v19 }
0x1011   :  { %v2845_v32 = vsel %vm1109_vm8, %v2829_v13, 0.0  ;;  %v2831_v17 = vmul.f32 %v6397_v24, %v2812_v26 }
0x1012   :  { %v2836_v54 = vsel %vm1109_vm8, %v2826_v49, 0.0  ;;  %v2830_v55 = vmul.f32 %v6390_v14, %v2808_v58  ;;  %v2816_v60 = vrot.slane %v2784_v59, %v6300_v15 }
0x1013   :  { %v2851_v31 = vsel %vm1109_vm8, %v2831_v17, 0.0 }
0x1019   :  { %2569 = vrot.lane.b32.xlu1 %v6306_v21, %s6068_s25  ;;  %v2827_v21 = vmul.f32 %v6373_v57, %v2796_v61  ;;  %v2848_v61 = vsel %vm1109_vm8, %v2830_v55, 0.0 }
0x101b   :  { %v2839_v62 = vsel %vm1109_vm8, %v2827_v21, 0.0 }
0x103d   :  { %2834 = vadd.xlane.f32.xlu1 %v2833_v2  ;;  %v2832_v2 = vmul.f32 %v6405_v10, %v2816_v60 }
0x103f   :  { %v2854_v21 = vsel %vm1109_vm8, %v2832_v2, 0.0 }
0x1041   :  { %2840 = vadd.xlane.f32.xlu1 %v2839_v62 }
0x1045   :  { %2846 = vadd.xlane.f32.xlu1 %v2845_v32 }
0x1049   :  { %2852 = vadd.xlane.f32.xlu1 %v2851_v31 }
0x1091   :  { %v2560_v18 = vpop.xlane.xlu1 %2559 }
0x1092   :  { %v2561_v34 = vsub.f32 %v2557_v48, %v2560_v18  ;;  %v2783_v48 = vcombine.high %v2773_v30, %v2773_v30 }
0x1094   :  { %v2562_v0 = vmul.f32 1.442695, %v2561_v34  ;;  %v2800_v51 = vrot.slane %v2783_v48, %v6300_v15 }
0x1095   :  { %v2570_v52 = vpop.permute.xlu1 %2569 }
0x1096   :  { %5962 = vpow2.f32 %v2562_v0  ;;  %5724 = vmatpush3.msra.mxu1 %v2570_v52  ;;  %v2828_v56 = vmul.f32 %v6382_v3, %v2800_v51 }
0x1097   :  { %5733 = vmatprep.subr.mxu1 %v6053_v8 }
0x1098   :  { %v2842_v53 = vsel %vm1109_vm8, %v2828_v56, 0.0 }
0x10a3   :  { %v5963_v41 = vpop.eup %5962 }
0x10a4   :  { %v2564_v43 = vsel %vm154_vm0, %v5963_v41, 0.0 }
0x10a5   :  { %2565 = vadd.xlane.f32.xlu0 %v2564_v43 }
0x10bb   :  { %2858 = vrot.lane.b32.xlu0 %v6304_v19, %s6057_s12 }
0x10c6   :  { %v2835_v32 = vpop.xlane.xlu1 %2834 }
0x10c7   :  { %v2871_v18 = vrot.slane %v2835_v32, %v6412_v1 }
0x10ca   :  { %v2841_v17 = vpop.xlane.xlu1 %2840 }
0x10cb   :  { %v2879_v52 = vrot.slane %v2841_v17, %v6412_v1 }
0x10ce   :  { %v2847_v0 = vpop.xlane.xlu1 %2846 }
0x10cf   :  { %v2887_v30 = vrot.slane %v2847_v0, %v6412_v1 }
0x10d2   :  { %v2853_v9 = vpop.xlane.xlu1 %2852 }
0x10d3   :  { %v2895_v22 = vrot.slane %v2853_v9, %v6412_v1 }
0x10da   :  { %2837 = vadd.xlane.f32.xlu0 %v2836_v54 }
0x10de   :  { %2843 = vadd.xlane.f32.xlu0 %v2842_v53 }
0x10e2   :  { %2849 = vadd.xlane.f32.xlu0 %v2848_v61 }
0x10e6   :  { %2855 = vadd.xlane.f32.xlu0 %v2854_v21 }
0x10fc   :  { %3074 = vrot.lane.b32.xlu0 %v3072_v11, %s6038_s6 }
0x1100   :  { %3273 = vrot.lane.b32.xlu0 %v6304_v19, %s6061_s18 }
0x112e   :  { %v2566_v20 = vpop.xlane.xlu0 %2565 }
0x112f   :  { %5964 = vrcp.f32 %v2566_v20 }
0x1132   :  { %v2859_v26 = vpop.permute.xlu0 %2858 }
0x113c   :  { %v5965_v62 = vpop.eup %5964 }
0x113d   :  { %v2568_v13 = vmul.f32 %v5965_v62, %v5963_v41 }
0x113f   :  { %5726 = vmatmul.mubr.msk.f32.vlgmr.msra.gmra.mxu1 %vm154_vm0, %v2568_v13 }
0x1140   :  { %5734 = vmatpush3.xpose.msk.msra.mxu1 %vm154_vm0, %v2859_v26  ;;  %5735 = vmatprep.mubr.msk.f32.mxu1 %vm6054_vm4, %v6053_v8 }
0x1141   :  { %5743 = vmatprep.subr.mxu1 %v6053_v8 }
0x1143   :  { %5736 = vmatmul.mubr.msk.f32.vlgmr.msra.gmra.mxu1 %vm154_vm0, %v2660_v23 }
0x1144   :  { %5744 = vmatpush3.msra.mxu1 %v6456_v35  ;;  %5745 = vmatprep.mubr.msk.f32.mxu1 %vm6054_vm4, %v6053_v8 }
0x1145   :  { %5753 = vmatprep.subr.mxu1 %v6053_v8 }
0x1163   :  { %v2838_v31 = vpop.xlane.xlu0 %2837 }
0x1164   :  { %v2875_v34 = vrot.slane %v2838_v31, %v6412_v1 }
0x1166   :  { %v2900_v29 = vsel %vm1177_vm14, %v2875_v34, %v2871_v18 }
0x1167   :  { %v2844_v41 = vpop.xlane.xlu0 %2843  ;;  %v2901_v43 = vsel %vm1179_vm15, %v2879_v52, %v2900_v29 }
0x1168   :  { %v2883_v35 = vrot.slane %v2844_v41, %v6412_v1 }
0x116a   :  { %v2902_v28 = vsel %vm1181_vm5, %v2883_v35, %v2901_v43 }
0x116b   :  { %v2850_v46 = vpop.xlane.xlu0 %2849  ;;  %v2903_v49 = vsel %vm1183_vm6, %v2887_v30, %v2902_v28 }
0x116c   :  { %v2891_v48 = vrot.slane %v2850_v46, %v6412_v1 }
0x116e   :  { %v2904_v51 = vsel %vm1185_vm7, %v2891_v48, %v2903_v49 }
0x116f   :  { %v2856_v54 = vpop.xlane.xlu0 %2855  ;;  %v2905_v58 = vsel %vm1187_vm9, %v2895_v22, %v2904_v51 }
0x1170   :  { %v2899_v56 = vrot.slane %v2856_v54, %v6412_v1 }
0x1172   :  { %v2906_v59 = vsel %vm1189_vm10, %v2899_v56, %v2905_v58 }
0x1173   :  { %v3075_v53 = vpop.permute.xlu0 %3074 }
0x1174   :  { %5746 = vmatmul.mubr.msk.f32.vlgmr.msra.gmra.mxu1 %vm154_vm0, %v3075_v53 }
0x1175   :  { %5755 = vmatprep.mubr.msk.f32.mxu1 %vm6054_vm4, %v6053_v8 }
0x11ff   :  { %v6778_v55 = vpop.f32.mrf.mxu1 }
0x1201   :  { %v5727_v60 = vpop.f32.mrf.mxu1 }
0x1202   :  { %v3486_v60 = vadd.f32 %v6536_v39, %v6304_v19  ;;  %v3071_v39 = vadd.f32 %v6446_v25, %v6304_v19 }
0x1203   :  { %v2979_v61 = vpop.f32.mrf.mxu1 }
0x1204   :  { %v2980_v2 = vadd.f32 %v2979_v61, %v2906_v59 }
0x1205   :  { %v5737_v21 = vpop.f32.mrf.mxu1 }
0x1206   :  { %v2983_v11 = vmul.f32 0.35355338, %v2980_v2 }
0x1208   :  { %v2984_v20 = vsel %vm154_vm0, %v2983_v11, -inf }
0x1209   :  { %2985 = vmax.xlane.f32.xlu1 %v2984_v20 }
0x121a   :  { %2995 = vrot.lane.b32.xlu1 %v6304_v19, %s6060_s17  ;;  %s6081_s17 = smov 30  }
0x1234   :  { %v3144_v62 = vpop.f32.mrf.mxu1 }
0x1235   :  { %v3149_v13 = vcombine.high %v3144_v62, %v3144_v62  ;;  %v3156_v26 = vrot.slane %v3144_v62, %v6336_v27 }
0x1236   :  { %v5747_v23 = vpop.f32.mrf.mxu1 }
0x1237   :  { %v3163_v32 = vrot.slane %v3149_v13, %v6336_v27  ;;  %v3164_v17 = vcombine.high %v3156_v26, %v3156_v26  ;;  %v3172_v31 = vrot.slane %v3156_v26, %v6336_v27 }
0x1239   :  { %v3186_v18 = vrot.slane %v3164_v17, %v6336_v27  ;;  %v3194_v34 = vcombine.high %v3172_v31, %v3172_v31  ;;  %v3165_v0 = vcombine.high %v3163_v32, %v3163_v32  ;;  %v3201_v29 = vrot.slane %v3172_v31, %v6300_v15 }
0x123a   :  { %v3179_v26 = vrot.slane %v3163_v32, %v6336_v27 }
0x123b   :  { %v3209_v52 = vrot.slane %v3194_v34, %v6300_v15  ;;  %v3196_v41 = vcombine.high %v3186_v18, %v3186_v18  ;;  %v3238_v35 = vmul.f32 %v6353_v42, %v3201_v29  ;;  %v3193_v46 = vrot.slane %v3165_v0, %v6336_v27 }
0x123c   :  { %v3205_v23 = vrot.slane %v3186_v18, %v6300_v15  ;;  %v3217_v17 = vrot.slane %v3179_v26, %v6300_v15  ;;  %v3195_v31 = vcombine.high %v3179_v26, %v3179_v26  ;;  %v3274_v18 = vpop.permute.xlu0 %3273 }
0x123d   :  { %v3246_v43 = vsel %vm1109_vm8, %v3238_v35, 0.0  ;;  %v3240_v28 = vmul.f32 %v6373_v57, %v3209_v52  ;;  %v3213_v30 = vrot.slane %v3196_v41, %v6300_v15  ;;  %v3221_v49 = vrot.slane %v3193_v46, %v6300_v15 }
0x123e   :  { %3247 = vadd.xlane.f32.xlu0 %v3246_v43  ;;  %v3197_v51 = vcombine.high %v3193_v46, %v3193_v46  ;;  %v3242_v0 = vmul.f32 %v6357_v44, %v3217_v17  ;;  %v3225_v29 = vrot.slane %v3195_v31, %v6300_v15 }
0x123f   :  { %v3252_v9 = vsel %vm1109_vm8, %v3240_v28, 0.0  ;;  %v3241_v48 = vmul.f32 %v6382_v3, %v3213_v30  ;;  %v3243_v54 = vmul.f32 %v6390_v14, %v3221_v49 }
0x1240   :  { %v3229_v56 = vrot.slane %v3197_v51, %v6300_v15  ;;  %v3258_v25 = vsel %vm1109_vm8, %v3242_v0, 0.0  ;;  %v3244_v52 = vmul.f32 %v6397_v24, %v3225_v29 }
0x1241   :  { %v3255_v22 = vsel %vm1109_vm8, %v3241_v48, 0.0  ;;  %v3261_v58 = vsel %vm1109_vm8, %v3243_v54, 0.0 }
0x1242   :  { %3253 = vadd.xlane.f32.xlu0 %v3252_v9  ;;  %v3245_v59 = vmul.f32 %v6405_v10, %v3229_v56  ;;  %v3264_v32 = vsel %vm1109_vm8, %v3244_v52, 0.0 }
0x1244   :  { %v3267_v53 = vsel %vm1109_vm8, %v3245_v59, 0.0 }
0x1246   :  { %3256 = vadd.xlane.f32.xlu0 %v3255_v22 }
0x124a   :  { %3262 = vadd.xlane.f32.xlu0 %v3261_v58 }
0x124e   :  { %3268 = vadd.xlane.f32.xlu0 %v3267_v53 }
0x1264   :  { %3488 = vrot.lane.b32.xlu0 %v3486_v60, %s6039_s7 }
0x1268   :  { %3687 = vrot.lane.b32.xlu0 %v6304_v19, %s6064_s21  ;;  %s6082_s21 = smov 29  }
0x1292   :  { %v2986_v61 = vpop.xlane.xlu1 %2985 }
0x1293   :  { %v2987_v2 = vsub.f32 %v2983_v11, %v2986_v61  ;;  %v3239_v11 = vmul.f32 %v6361_v45, %v3205_v23 }
0x1295   :  { %v2988_v21 = vmul.f32 1.442695, %v2987_v2  ;;  %v3249_v34 = vsel %vm1109_vm8, %v3239_v11, 0.0 }
0x1296   :  { %v2996_v20 = vpop.permute.xlu1 %2995 }
0x1297   :  { %5966 = vpow2.f32 %v2988_v21  ;;  %5739 = vmatpush3.msra.mxu0 %v2996_v20 }
0x1298   :  { %5748 = vmatprep.subr.mxu0 %v6053_v8 }
0x12a4   :  { %v5967_v62 = vpop.eup %5966 }
0x12a5   :  { %v2990_v13 = vsel %vm154_vm0, %v5967_v62, 0.0 }
0x12a6   :  { %2991 = vadd.xlane.f32.xlu1 %v2990_v13 }
0x12b7   :  { %3271 = vrot.lane.b32.xlu1 %v3071_v39, %s6038_s6  ;;  %s6076_s6 = smov 23  }
0x12c7   :  { %v3248_v41 = vpop.xlane.xlu0 %3247 }
0x12c8   :  { %v3286_v54 = vrot.slane %v3248_v41, %v6412_v1 }
0x12cb   :  { %v3254_v35 = vpop.xlane.xlu0 %3253 }
0x12cc   :  { %v3294_v58 = vrot.slane %v3254_v35, %v6412_v1 }
0x12cf   :  { %v3257_v28 = vpop.xlane.xlu0 %3256 }
0x12d3   :  { %v3263_v30 = vpop.xlane.xlu0 %3262 }
0x12d4   :  { %v3306_v21 = vrot.slane %v3263_v30, %v6412_v1 }
0x12d7   :  { %v3269_v48 = vpop.xlane.xlu0 %3268 }
0x12d8   :  { %v3314_v26 = vrot.slane %v3269_v48, %v6412_v1 }
0x12db   :  { %3250 = vadd.xlane.f32.xlu1 %v3249_v34  ;;  %v3489_v51 = vpop.permute.xlu0 %3488 }
0x12df   :  { %3259 = vadd.xlane.f32.xlu1 %v3258_v25 }
0x12e3   :  { %3265 = vadd.xlane.f32.xlu1 %v3264_v32 }
0x132f   :  { %v2992_v43 = vpop.xlane.xlu1 %2991 }
0x1330   :  { %5968 = vrcp.f32 %v2992_v43 }
0x1333   :  { %v3272_v49 = vpop.permute.xlu1 %3271 }
0x133d   :  { %v5969_v46 = vpop.eup %5968 }
0x133e   :  { %v2994_v9 = vmul.f32 %v5969_v46, %v5967_v62 }
0x1340   :  { %5741 = vmatmul.mubr.msk.f32.vlgmr.msra.gmra.mxu0 %vm154_vm0, %v2994_v9 }
0x1341   :  { %5749 = vmatpush3.xpose.msk.msra.mxu0 %vm154_vm0, %v3274_v18  ;;  %5750 = vmatprep.mubr.msk.f32.mxu0 %vm6054_vm4, %v6053_v8 }
0x1342   :  { %5758 = vmatprep.subr.mxu0 %v6053_v8 }
0x1344   :  { %5751 = vmatmul.mubr.msk.f32.vlgmr.msra.gmra.mxu0 %vm154_vm0, %v3272_v49 }
0x1345   :  { %5759 = vmatpush3.msra.mxu0 %v6532_v38  ;;  %5760 = vmatprep.mubr.msk.f32.mxu0 %vm6054_vm4, %v6053_v8  ;;  %v3298_v38 = vrot.slane %v3257_v28, %v6412_v1 }
0x1346   :  { %5768 = vmatprep.subr.mxu0 %v6053_v8 }
0x1348   :  { %5761 = vmatmul.mubr.msk.f32.vlgmr.msra.gmra.mxu0 %vm154_vm0, %v3489_v51 }
0x1349   :  { %5770 = vmatprep.mubr.msk.f32.mxu0 %vm6054_vm4, %v6053_v8 }
0x1364   :  { %v3251_v22 = vpop.xlane.xlu1 %3250 }
0x1365   :  { %v3290_v56 = vrot.slane %v3251_v22, %v6412_v1 }
0x1367   :  { %v3315_v59 = vsel %vm1177_vm14, %v3290_v56, %v3286_v54 }
0x1368   :  { %v3316_v53 = vsel %vm1179_vm15, %v3294_v58, %v3315_v59  ;;  %v3260_v60 = vpop.xlane.xlu1 %3259 }
0x1369   :  { %v3317_v61 = vsel %vm1181_vm5, %v3298_v38, %v3316_v53  ;;  %v3302_v2 = vrot.slane %v3260_v60, %v6412_v1 }
0x136b   :  { %v3318_v20 = vsel %vm1183_vm6, %v3302_v2, %v3317_v61 }
0x136c   :  { %v3266_v62 = vpop.xlane.xlu1 %3265  ;;  %v3319_v13 = vsel %vm1185_vm7, %v3306_v21, %v3318_v20 }
0x136d   :  { %v3310_v39 = vrot.slane %v3266_v62, %v6412_v1 }
0x136f   :  { %v3320_v23 = vsel %vm1187_vm9, %v3310_v39, %v3319_v13 }
0x1370   :  { %v3321_v11 = vsel %vm1189_vm10, %v3314_v26, %v3320_v23  ;;  %v3900_v23 = vadd.f32 %v6625_v6, %v6304_v19  ;;  %v3485_v6 = vadd.f32 %v6543_v63, %v6304_v19 }
0x1400   :  { %v6851_v17 = vpop.f32.mrf.mxu0 }
0x1402   :  { %v5742_v31 = vpop.f32.mrf.mxu0 }
0x1404   :  { %v3393_v34 = vpop.f32.mrf.mxu0 }
0x1405   :  { %v3394_v0 = vadd.f32 %v3393_v34, %v3321_v11 }
0x1406   :  { %v5752_v29 = vpop.f32.mrf.mxu0 }
0x1407   :  { %v3397_v25 = vmul.f32 0.35355338, %v3394_v0 }
0x1408   :  { %v3558_v52 = vpop.f32.mrf.mxu0 }
0x1409   :  { %v3563_v32 = vcombine.high %v3558_v52, %v3558_v52  ;;  %v3570_v18 = vrot.slane %v3558_v52, %v6336_v27  ;;  %v3398_v41 = vsel %vm154_vm0, %v3397_v25, -inf }
0x140a   :  { %3399 = vmax.xlane.f32.xlu1 %v3398_v41  ;;  %v5762_v35 = vpop.f32.mrf.mxu0 }
0x140b   :  { %v3577_v43 = vrot.slane %v3563_v32, %v6336_v27  ;;  %v3578_v28 = vcombine.high %v3570_v18, %v3570_v18  ;;  %v3586_v30 = vrot.slane %v3570_v18, %v6336_v27 }
0x140d   :  { %v3600_v46 = vrot.slane %v3578_v28, %v6336_v27  ;;  %v3608_v9 = vcombine.high %v3586_v30, %v3586_v30  ;;  %v3579_v48 = vcombine.high %v3577_v43, %v3577_v43  ;;  %v3615_v49 = vrot.slane %v3586_v30, %v6300_v15 }
0x140e   :  { %v3593_v32 = vrot.slane %v3577_v43, %v6336_v27 }
0x140f   :  { %v3623_v51 = vrot.slane %v3608_v9, %v6300_v15  ;;  %v3610_v22 = vcombine.high %v3600_v46, %v3600_v46  ;;  %v3652_v54 = vmul.f32 %v6353_v42, %v3615_v49  ;;  %v3607_v59 = vrot.slane %v3579_v48, %v6336_v27 }
0x1410   :  { %v3619_v18 = vrot.slane %v3600_v46, %v6300_v15  ;;  %v3631_v41 = vrot.slane %v3593_v32, %v6300_v15  ;;  %v3609_v35 = vcombine.high %v3593_v32, %v3593_v32  ;;  %v3688_v46 = vpop.permute.xlu0 %3687 }
0x1411   :  { %v3660_v56 = vsel %vm1109_vm8, %v3652_v54, 0.0  ;;  %v3654_v58 = vmul.f32 %v6373_v57, %v3623_v51  ;;  %v3627_v38 = vrot.slane %v3610_v22, %v6300_v15  ;;  %v3635_v61 = vrot.slane %v3607_v59, %v6300_v15 }
0x1412   :  { %3661 = vadd.xlane.f32.xlu0 %v3660_v56  ;;  %v3611_v2 = vcombine.high %v3607_v59, %v3607_v59  ;;  %v3656_v30 = vmul.f32 %v6357_v44, %v3631_v41  ;;  %v3639_v9 = vrot.slane %v3609_v35, %v6300_v15 }
0x1413   :  { %v3666_v53 = vsel %vm1109_vm8, %v3654_v58, 0.0  ;;  %v3655_v60 = vmul.f32 %v6382_v3, %v3627_v38  ;;  %v3657_v20 = vmul.f32 %v6390_v14, %v3635_v61 }
0x1414   :  { %v3643_v62 = vrot.slane %v3611_v2, %v6300_v15  ;;  %v3672_v63 = vsel %vm1109_vm8, %v3656_v30, 0.0  ;;  %v3658_v48 = vmul.f32 %v6397_v24, %v3639_v9 }
0x1415   :  { %v3669_v21 = vsel %vm1109_vm8, %v3655_v60, 0.0  ;;  %v3675_v13 = vsel %vm1109_vm8, %v3657_v20, 0.0 }
0x1416   :  { %3667 = vadd.xlane.f32.xlu0 %v3666_v53  ;;  %v3659_v39 = vmul.f32 %v6405_v10, %v3643_v62  ;;  %v3678_v43 = vsel %vm1109_vm8, %v3658_v48, 0.0 }
0x1418   :  { %v3681_v26 = vsel %vm1109_vm8, %v3659_v39, 0.0 }
0x141a   :  { %3670 = vadd.xlane.f32.xlu0 %v3669_v21 }
0x141b   :  { %3409 = vrot.lane.b32.xlu1 %v6304_v19, %s6063_s20  ;;  %s7127_s20 = sld [smem:[%s7192_s0 + %s6081_s17]]  }
0x141e   :  { %3676 = vadd.xlane.f32.xlu0 %v3675_v13 }
0x1422   :  { %3682 = vadd.xlane.f32.xlu0 %v3681_v26 }
0x1438   :  { %3902 = vrot.lane.b32.xlu0 %v3900_v23, %s6040_s8 }
0x143c   :  { %4101 = vrot.lane.b32.xlu0 %v6304_v19, %s6067_s24  ;;  %s5371_s24 = sld [smem:[%s7192_s0 + %s6082_s21]]  }
0x1493   :  { %v3400_v11 = vpop.xlane.xlu1 %3399 }
0x1494   :  { %v3401_v31 = vsub.f32 %v3397_v25, %v3400_v11  ;;  %v3653_v25 = vmul.f32 %v6361_v45, %v3619_v18 }
0x1496   :  { %v3402_v34 = vmul.f32 1.442695, %v3401_v31  ;;  %v3663_v28 = vsel %vm1109_vm8, %v3653_v25, 0.0 }
0x1497   :  { %v3410_v0 = vpop.permute.xlu1 %3409 }
0x1498   :  { %5970 = vpow2.f32 %v3402_v34  ;;  %5754 = vmatpush3.msra.mxu1 %v3410_v0 }
0x1499   :  { %5763 = vmatprep.subr.mxu1 %v6053_v8 }
0x149b   :  { %v3662_v49 = vpop.xlane.xlu0 %3661 }
0x149c   :  { %v3700_v2 = vrot.slane %v3662_v49, %v6412_v1 }
0x149f   :  { %v3668_v51 = vpop.xlane.xlu0 %3667 }
0x14a0   :  { %v3708_v20 = vrot.slane %v3668_v51, %v6412_v1 }
0x14a3   :  { %v3671_v54 = vpop.xlane.xlu0 %3670 }
0x14a5   :  { %v5971_v29 = vpop.eup %5970 }
0x14a6   :  { %v3404_v52 = vsel %vm154_vm0, %v5971_v29, 0.0 }
0x14a7   :  { %3405 = vadd.xlane.f32.xlu1 %v3404_v52  ;;  %v3677_v56 = vpop.xlane.xlu0 %3676 }
0x14a8   :  { %v3720_v11 = vrot.slane %v3677_v56, %v6412_v1 }
0x14ab   :  { %v3683_v59 = vpop.xlane.xlu0 %3682 }
0x14ac   :  { %v3728_v52 = vrot.slane %v3683_v59, %v6412_v1 }
0x14af   :  { %v3903_v60 = vpop.permute.xlu0 %3902 }
0x14b8   :  { %3685 = vrot.lane.b32.xlu1 %v3485_v6, %s6039_s7 }
0x14dc   :  { %3664 = vadd.xlane.f32.xlu1 %v3663_v28 }
0x14e0   :  { %3673 = vadd.xlane.f32.xlu1 %v3672_v63 }
0x14e4   :  { %3679 = vadd.xlane.f32.xlu1 %v3678_v43 }
0x1530   :  { %v3406_v22 = vpop.xlane.xlu1 %3405 }
0x1531   :  { %5972 = vrcp.f32 %v3406_v22 }
0x1534   :  { %v3686_v53 = vpop.permute.xlu1 %3685 }
0x153e   :  { %v5973_v58 = vpop.eup %5972 }
0x153f   :  { %v3408_v38 = vmul.f32 %v5973_v58, %v5971_v29 }
0x1541   :  { %5756 = vmatmul.mubr.msk.f32.vlgmr.msra.gmra.mxu1 %vm154_vm0, %v3408_v38 }
0x1542   :  { %5764 = vmatpush3.xpose.msk.msra.mxu1 %vm154_vm0, %v3688_v46  ;;  %5765 = vmatprep.mubr.msk.f32.mxu1 %vm6054_vm4, %v6053_v8 }
0x1543   :  { %5773 = vmatprep.subr.mxu1 %v6053_v8 }
0x1545   :  { %5766 = vmatmul.mubr.msk.f32.vlgmr.msra.gmra.mxu1 %vm154_vm0, %v3686_v53 }
0x1546   :  { %5774 = vmatpush3.msra.mxu1 %v6621_v4  ;;  %5775 = vmatprep.mubr.msk.f32.mxu1 %vm6054_vm4, %v6053_v8  ;;  %v3712_v4 = vrot.slane %v3671_v54, %v6412_v1 }
0x1547   :  { %5783 = vmatprep.subr.mxu1 %v6053_v8 }
0x1549   :  { %5776 = vmatmul.mubr.msk.f32.vlgmr.msra.gmra.mxu1 %vm154_vm0, %v3903_v60 }
0x154a   :  { %5785 = vmatprep.mubr.msk.f32.mxu1 %vm6054_vm4, %v6053_v8 }
0x1565   :  { %v3665_v61 = vpop.xlane.xlu1 %3664 }
0x1566   :  { %v3704_v21 = vrot.slane %v3665_v61, %v6412_v1 }
0x1568   :  { %v3729_v62 = vsel %vm1177_vm14, %v3704_v21, %v3700_v2 }
0x1569   :  { %v3730_v13 = vsel %vm1179_vm15, %v3708_v20, %v3729_v62  ;;  %v3674_v39 = vpop.xlane.xlu1 %3673 }
0x156a   :  { %v3716_v26 = vrot.slane %v3674_v39, %v6412_v1  ;;  %v3731_v23 = vsel %vm1181_vm5, %v3712_v4, %v3730_v13 }
0x156c   :  { %v3732_v31 = vsel %vm1183_vm6, %v3716_v26, %v3731_v23 }
0x156d   :  { %v3680_v34 = vpop.xlane.xlu1 %3679  ;;  %v3733_v0 = vsel %vm1185_vm7, %v3720_v11, %v3732_v31 }
0x156e   :  { %v3724_v29 = vrot.slane %v3680_v34, %v6412_v1 }
0x1570   :  { %v3734_v6 = vsel %vm1187_vm9, %v3724_v29, %v3733_v0 }
0x1571   :  { %v3735_v32 = vsel %vm1189_vm10, %v3728_v52, %v3734_v6  ;;  %v3899_v6 = vadd.f32 %v6632_v16, %v6304_v19 }
0x1601   :  { %v6924_v18 = vpop.f32.mrf.mxu1 }
0x1603   :  { %v5757_v25 = vpop.f32.mrf.mxu1 }
0x1605   :  { %v3807_v41 = vpop.f32.mrf.mxu1 }
0x1606   :  { %v3808_v35 = vadd.f32 %v3807_v41, %v3735_v32 }
0x1607   :  { %v5767_v28 = vpop.f32.mrf.mxu1 }
0x1608   :  { %v3811_v30 = vmul.f32 0.35355338, %v3808_v35 }
0x1609   :  { %v3972_v9 = vpop.f32.mrf.mxu1 }
0x160a   :  { %v3977_v63 = vcombine.high %v3972_v9, %v3972_v9  ;;  %v3984_v48 = vrot.slane %v3972_v9, %v6336_v27  ;;  %v3812_v43 = vsel %vm154_vm0, %v3811_v30, -inf }
0x160b   :  { %3813 = vmax.xlane.f32.xlu1 %v3812_v43  ;;  %v5777_v46 = vpop.f32.mrf.mxu1 }
0x160c   :  { %v3991_v49 = vrot.slane %v3977_v63, %v6336_v27  ;;  %v3992_v51 = vcombine.high %v3984_v48, %v3984_v48  ;;  %v4000_v22 = vrot.slane %v3984_v48, %v6336_v27  ;;  %v4102_v46 = vpop.permute.xlu0 %4101 }
0x160e   :  { %v4014_v54 = vrot.slane %v3992_v51, %v6336_v27  ;;  %v4022_v56 = vcombine.high %v4000_v22, %v4000_v22  ;;  %v3993_v58 = vcombine.high %v3991_v49, %v3991_v49  ;;  %v4029_v38 = vrot.slane %v4000_v22, %v6300_v15 }
0x1610   :  { %v4037_v59 = vrot.slane %v4022_v56, %v6300_v15  ;;  %v4024_v53 = vcombine.high %v4014_v54, %v4014_v54  ;;  %v4066_v60 = vmul.f32 %v6353_v42, %v4029_v38  ;;  %v4021_v20 = vrot.slane %v3993_v58, %v6336_v27 }
0x1611   :  { %v4033_v32 = vrot.slane %v4014_v54, %v6300_v15 }
0x1612   :  { %v4074_v61 = vsel %vm1109_vm8, %v4066_v60, 0.0  ;;  %v4068_v2 = vmul.f32 %v6373_v57, %v4037_v59  ;;  %v4041_v21 = vrot.slane %v4024_v53, %v6300_v15  ;;  %v4049_v13 = vrot.slane %v4021_v20, %v6300_v15 }
0x1613   :  { %4075 = vadd.xlane.f32.xlu0 %v4074_v61  ;;  %v4025_v39 = vcombine.high %v4021_v20, %v4021_v20  ;;  %v4067_v25 = vmul.f32 %v6361_v45, %v4033_v32 }
0x1614   :  { %v4080_v4 = vsel %vm1109_vm8, %v4068_v2, 0.0  ;;  %v4069_v62 = vmul.f32 %v6382_v3, %v4041_v21  ;;  %v4071_v42 = vmul.f32 %v6390_v14, %v4049_v13 }
0x1615   :  { %v4057_v23 = vrot.slane %v4025_v39, %v6300_v15  ;;  %v4077_v28 = vsel %vm1109_vm8, %v4067_v25, 0.0 }
0x1616   :  { %v4083_v26 = vsel %vm1109_vm8, %v4069_v62, 0.0  ;;  %v4089_v57 = vsel %vm1109_vm8, %v4071_v42, 0.0 }
0x1617   :  { %4081 = vadd.xlane.f32.xlu0 %v4080_v4  ;;  %v4073_v11 = vmul.f32 %v6405_v10, %v4057_v23  ;;  %v4007_v10 = vrot.slane %v3991_v49, %v6336_v27 }
0x1619   :  { %v4095_v3 = vsel %vm1109_vm8, %v4073_v11, 0.0  ;;  %v4045_v41 = vrot.slane %v4007_v10, %v6300_v15  ;;  %v4023_v35 = vcombine.high %v4007_v10, %v4007_v10 }
0x161b   :  { %4084 = vadd.xlane.f32.xlu0 %v4083_v26  ;;  %v4053_v9 = vrot.slane %v4023_v35, %v6300_v15 }
0x161c   :  { %3823 = vrot.lane.b32.xlu1 %v6304_v19, %s6066_s23  ;;  %s5366_s23 = sld [smem:[%s7192_s0 + %s6065_s22]]  }
0x161d   :  { %v4072_v63 = vmul.f32 %v6397_v24, %v4053_v9 }
0x161f   :  { %4090 = vadd.xlane.f32.xlu0 %v4089_v57  ;;  %v4092_v27 = vsel %vm1109_vm8, %v4072_v63, 0.0 }
0x1623   :  { %4096 = vadd.xlane.f32.xlu0 %v4095_v3 }
0x1694   :  { %v3814_v31 = vpop.xlane.xlu1 %3813 }
0x1695   :  { %v3815_v34 = vsub.f32 %v3811_v30, %v3814_v31  ;;  %v4070_v30 = vmul.f32 %v6357_v44, %v4045_v41 }
0x1697   :  { %v3816_v0 = vmul.f32 1.442695, %v3815_v34  ;;  %v4086_v16 = vsel %vm1109_vm8, %v4070_v30, 0.0 }
0x1698   :  { %v3824_v29 = vpop.permute.xlu1 %3823 }
0x1699   :  { %5974 = vpow2.f32 %v3816_v0  ;;  %5769 = vmatpush3.msra.mxu0 %v3824_v29 }
0x169a   :  { %5778 = vmatprep.subr.mxu0 %v6053_v8 }
0x169c   :  { %v4076_v24 = vpop.xlane.xlu0 %4075 }
0x169d   :  { %v4114_v54 = vrot.slane %v4076_v24, %v6412_v1 }
0x16a0   :  { %v4082_v49 = vpop.xlane.xlu0 %4081 }
0x16a1   :  { %v4122_v59 = vrot.slane %v4082_v49, %v6412_v1 }
0x16a4   :  { %v4085_v56 = vpop.xlane.xlu0 %4084 }
0x16a5   :  { %v4126_v60 = vrot.slane %v4085_v56, %v6412_v1 }
0x16a6   :  { %v5975_v14 = vpop.eup %5974 }
0x16a7   :  { %v3818_v52 = vsel %vm154_vm0, %v5975_v14, 0.0 }
0x16a8   :  { %3819 = vadd.xlane.f32.xlu1 %v3818_v52  ;;  %v4091_v61 = vpop.xlane.xlu0 %4090 }
0x16a9   :  { %v4134_v13 = vrot.slane %v4091_v61, %v6412_v1 }
0x16ac   :  { %v4097_v39 = vpop.xlane.xlu0 %4096 }
0x16ad   :  { %v4142_v57 = vrot.slane %v4097_v39, %v6412_v1  ;;  %v4469_v39 = vld [vmem:[%s5362_s3 + $0x18] sm:$0xff] }
0x16b9   :  { %4099 = vrot.lane.b32.xlu1 %v3899_v6, %s6040_s8  ;;  %s5358_s8 = sld [smem:[%s7192_s0 + %s6062_s19]]  }
0x16bf   :  { %v4328_v63 = vld [vmem:[%s5358_s8] sm:$0xff] }
0x16dd   :  { %4078 = vadd.xlane.f32.xlu1 %v4077_v28 }
0x16e1   :  { %4087 = vadd.xlane.f32.xlu1 %v4086_v16 }
0x16e5   :  { %4093 = vadd.xlane.f32.xlu1 %v4092_v27 }
0x1731   :  { %v3820_v48 = vpop.xlane.xlu1 %3819 }
0x1732   :  { %5976 = vrcp.f32 %v3820_v48 }
0x1735   :  { %v4100_v44 = vpop.permute.xlu1 %4099 }
0x173f   :  { %v5977_v45 = vpop.eup %5976 }
0x1740   :  { %v3822_v43 = vmul.f32 %v5977_v45, %v5975_v14 }
0x1742   :  { %5771 = vmatmul.mubr.msk.f32.vlgmr.msra.gmra.mxu0 %vm154_vm0, %v3822_v43 }
0x1743   :  { %5779 = vmatpush3.xpose.msk.msra.mxu0 %vm154_vm0, %v4102_v46  ;;  %5780 = vmatprep.mubr.msk.f32.mxu0 %vm6054_vm4, %v6053_v8 }
0x1746   :  { %5781 = vmatmul.mubr.msk.f32.vlgmr.msra.gmra.mxu0 %vm154_vm0, %v4100_v44 }
0x1766   :  { %v4079_v51 = vpop.xlane.xlu1 %4078 }
0x1767   :  { %v4118_v22 = vrot.slane %v4079_v51, %v6412_v1 }
0x1769   :  { %v4143_v58 = vsel %vm1177_vm14, %v4118_v22, %v4114_v54  ;;  %vm4651_vm14 = vcmask 1040384  }
0x176a   :  { %v4088_v38 = vpop.xlane.xlu1 %4087  ;;  %v4144_v53 = vsel %vm1179_vm15, %v4122_v59, %v4143_v58  ;;  %vm4582_vm15 = vcmask 1041408  }
0x176b   :  { %v4130_v2 = vrot.slane %v4088_v38, %v6412_v1  ;;  %v4145_v21 = vsel %vm1181_vm5, %v4126_v60, %v4144_v53  ;;  %vm4736_vm5 = vcmask 1042432  }
0x176d   :  { %v4146_v4 = vsel %vm1183_vm6, %v4130_v2, %v4145_v21  ;;  %vm4780_vm6 = vcmask 1043456  }
0x176e   :  { %v4094_v20 = vpop.xlane.xlu1 %4093  ;;  %v4147_v42 = vsel %vm1185_vm7, %v4134_v13, %v4146_v4  ;;  %vm4671_vm7 = vcmask 1046528  }
0x176f   :  { %v4138_v62 = vrot.slane %v4094_v20, %v6412_v1 }
0x1771   :  { %v4148_v23 = vsel %vm1187_vm9, %v4138_v62, %v4147_v42  ;;  %v4467_v42 = vld [vmem:[%s5362_s3 + $0x8] sm:$0xff]  ;;  %vm4712_vm9 = vcmask 1045504  }
0x1772   :  { %v4149_v3 = vsel %vm1189_vm10, %v4142_v57, %v4148_v23  ;;  %v4466_v23 = vld [vmem:[%s5362_s3] sm:$0xff]  ;;  %vm4756_vm10 = vcmask 1044480  }
0x1802   :  { %v3895_v26 = vpop.f32.mrf.mxu0 }
0x1804   :  { %v5772_v11 = vpop.f32.mrf.mxu0 }
0x1806   :  { %v4221_v31 = vpop.f32.mrf.mxu0 }
0x1807   :  { %v4222_v34 = vadd.f32 %v4221_v31, %v4149_v3 }
0x1808   :  { %v5782_v0 = vpop.f32.mrf.mxu0 }
0x1809   :  { %v4225_v29 = vmul.f32 0.35355338, %v4222_v34 }
0x180b   :  { %v4226_v14 = vsel %vm154_vm0, %v4225_v29, -inf }
0x180c   :  { %4227 = vmax.xlane.f32.xlu1 %v4226_v14  ;;  %v5438_v14 = vld [vmem:[%s5360_s10] ss:$0 sm:$0xff]  ;;  %s6087_s10 = smov 34  }
0x180d   :  { %s5376_s14 = sld [smem:[%s7192_s0 + %s6087_s10]]  }
0x181d   :  { %4237 = vrot.lane.b32.xlu1 %v6304_v19, %s6068_s25 }
0x1821   :  { %2650 = vrot.lane.b32.xlu1 %v6700_v33, %s6062_s19 }
0x1825   :  { %4314 = vrot.lane.b32.xlu1 %v6924_v18, %s6046_s29 }
0x1829   :  { %4318 = vrot.lane.b32.xlu1 %v3895_v26, %s6062_s19  ;;  %v4468_v26 = vld [vmem:[%s5362_s3 + $0x10] sm:$0xff]  ;;  %s5363_s19 = sld [smem:[%s7192_s0 + %s6073_s16]]   ;;  %s6086_s3 = smov 33  }
0x182a   :  { %s5369_s16 = sld [smem:[%s7192_s0 + %s6080_s13]]  }
0x182b   :  { %s5375_s9 = sld [smem:[%s7192_s0 + %s6086_s3]]  }
0x1895   :  { %v4228_v1 = vpop.xlane.xlu1 %4227 }
0x1896   :  { %v4229_v52 = vsub.f32 %v4225_v29, %v4228_v1 }
0x1898   :  { %v4230_v6 = vmul.f32 1.442695, %v4229_v52 }
0x1899   :  { %v4238_v10 = vpop.permute.xlu1 %4237 }
0x189a   :  { %5978 = vpow2.f32 %v4230_v6  ;;  %5784 = vmatpush3.msra.mxu1 %v4238_v10 }
0x189d   :  { %v2651_v28 = vpop.permute.xlu1 %2650 }
0x18a1   :  { %v4315_v45 = vpop.permute.xlu1 %4314 }
0x18a2   :  { %v4325_v46 = vsel %vm154_vm0, %v6851_v17, %v4315_v45  ;;  %v4835_v45 = vld [vmem:[%s5366_s23 + $0x18] sm:$0xff] }
0x18a3   :  { %5810 = vmatprep.subr.mxu0 %v4835_v45 }
0x18a4   :  { %5811 = vmatpush3.msra.mxu0 %v4835_v45 }
0x18a5   :  { %v4319_v43 = vpop.permute.xlu1 %4318 }
0x18a6   :  { %v4326_v44 = vsel %vm278_vm1, %v4325_v46, %v4319_v43  ;;  %v4834_v43 = vld [vmem:[%s5366_s23 + $0x10] sm:$0xff]  ;;  %v4833_v46 = vld [vmem:[%s5366_s23 + $0x8] sm:$0xff] }
0x18a7   :  { %v5979_v32 = vpop.eup %5978  ;;  %5812 = vmatprep.subr.mxu0 %v4834_v43 }
0x18a8   :  { %v4232_v25 = vsel %vm154_vm0, %v5979_v32, 0.0  ;;  %5813 = vmatpush3.msra.mxu0 %v4834_v43 }
0x18a9   :  { %4233 = vadd.xlane.f32.xlu0 %v4232_v25  ;;  %5814 = vmatprep.subr.mxu0 %v4833_v46 }
0x18aa   :  { %5815 = vmatpush3.msra.mxu0 %v4833_v46 }
0x18bf   :  { %2646 = vrot.lane.b32.xlu0 %v6613_v50, %s6046_s29  ;;  %v4331_v50 = vld [vmem:[%s5358_s8 + $0x18] sm:$0xff]  ;;  %s6069_s29 = smov 17  }
0x18c0   :  { %5788 = vmatprep.subr.mxu1 %v4331_v50  ;;  %s5359_s28 = sld [smem:[%s7192_s0 + %s6069_s29]]  }
0x18c1   :  { %s5365_s29 = sld [smem:[%s7192_s0 + %s6076_s6]]  }
0x18c3   :  { %2654 = vrot.lane.b32.xlu0 %v6778_v55, %s6065_s22  ;;  %v4330_v55 = vld [vmem:[%s5358_s8 + $0x10] sm:$0xff] }
0x18c6   :  { %v5435_v51 = vld [vmem:[%s5359_s28] ss:$0 sm:$0xff]  ;;  %s6085_s28 = smov 32  }
0x18c7   :  { %s5374_s2 = sld [smem:[%s7192_s0 + %s6085_s28]]  }
0x1932   :  { %v4234_v19 = vpop.xlane.xlu0 %4233 }
0x1933   :  { %5980 = vrcp.f32 %v4234_v19 }
0x1936   :  { %v2647_v33 = vpop.permute.xlu0 %2646 }
0x1937   :  { %v2657_v18 = vsel %vm154_vm0, %v6471_v40, %v2647_v33  ;;  %v4329_v40 = vld [vmem:[%s5358_s8 + $0x8] sm:$0xff]  ;;  %s6084_s8 = smov 35  }
0x1938   :  { %v2658_v9 = vsel %vm278_vm1, %v2657_v18, %v2651_v28  ;;  %v5440_v18 = vld [vmem:[%s5363_s19] ss:$0 sm:$0xff]  ;;  %s5377_s27 = sld [smem:[%s7192_s0 + %s6084_s8]]  }
0x193a   :  { %v2655_v35 = vpop.permute.xlu0 %2654 }
0x193b   :  { %v2659_v16 = vsel %vm280_vm2, %v2658_v9, %v2655_v35 }
0x1940   :  { %v5981_v41 = vpop.eup %5980 }
0x1941   :  { %v4236_v30 = vmul.f32 %v5981_v41, %v5979_v32  ;;  %v5439_v32 = vld [vmem:[%s5361_s15] ss:$0 sm:$0xff]  ;;  %s6088_s15 = smov 36  }
0x1942   :  { %s5378_s18 = sld [smem:[%s7192_s0 + %s6088_s15]]  }
0x1943   :  { %5786 = vmatmul.mubr.msk.f32.vlgmr.msra.gmra.mxu1 %vm154_vm0, %v4236_v30 }
0x1944   :  { %5796 = vmatprep.mubr.msk.f32.mxu1 %vm418_vm3, %v2659_v16  ;;  %5789 = vmatpush3.msra.mxu1 %v4331_v50 }
0x1945   :  { %5790 = vmatprep.subr.mxu1 %v4330_v55 }
0x1946   :  { %5791 = vmatpush3.msra.mxu1 %v4330_v55 }
0x1947   :  { %5792 = vmatprep.subr.mxu1 %v4329_v40 }
0x1948   :  { %5793 = vmatpush3.msra.mxu1 %v4329_v40 }
0x1949   :  { %5794 = vmatprep.subr.mxu1 %v4328_v63 }
0x194a   :  { %5795 = vmatpush3.msra.mxu1 %v4328_v63 }
0x194b   :  { %5799 = vmatprep.subr.mxu1 %v4469_v39 }
0x1a03   :  { %v4309_v27 = vpop.f32.mrf.mxu1 }
0x1a04   :  { %4322 = vrot.lane.b32.xlu0 %v4309_v27, %s6065_s22  ;;  %s6074_s22 = smov 22  }
0x1a05   :  { %v5787_v48 = vpop.f32.mrf.mxu1  ;;  %s5364_s25 = sld [smem:[%s7192_s0 + %s6074_s22]]  }
0x1a76   :  { %v4323_v24 = vpop.permute.xlu0 %4322 }
0x1a77   :  { %v4327_v49 = vsel %vm280_vm2, %v4326_v44, %v4323_v24  ;;  %v4832_v44 = vld [vmem:[%s5366_s23] sm:$0xff]  ;;  %v4591_v24 = vadd.s32 8, %v6297_v12 }
0x1a78   :  { %5797 = vmatmul.mubr.msk.f32.vlgmr.msra.gmra.mxu1 %vm418_vm3, %v4327_v49  ;;  %5816 = vmatprep.subr.mxu0 %v4832_v44 }
0x1a79   :  { %5800 = vmatpush3.msra.mxu1 %v4469_v39  ;;  %5817 = vmatpush3.msra.mxu0 %v4832_v44  ;;  %v4603_v49 = vand.u32 7, %v4591_v24 }
0x1a7a   :  { %5801 = vmatprep.subr.mxu1 %v4468_v26 }
0x1a7b   :  { %5802 = vmatpush3.msra.mxu1 %v4468_v26  ;;  %v4792_v26 = vsub.s32 4, %v6297_v12 }
0x1a7c   :  { %5803 = vmatprep.subr.mxu1 %v4467_v42 }
0x1a7d   :  { %5804 = vmatpush3.msra.mxu1 %v4467_v42 }
0x1a7e   :  { %5805 = vmatprep.subr.mxu1 %v4466_v23 }
0x1a7f   :  { %5806 = vmatpush3.msra.mxu1 %v4466_v23 }
0x1b38   :  { %v5798_v22 = vpop.f32.mrf.mxu1 }
0x1b39   :  { %v4417_v54 = vadd.f32 %v5798_v22, %v5435_v51  ;;  %v4638_v22 = vadd.s32 4294967295, %v4603_v49 }
0x1b3a   :  { %v4411_v56 = vpop.f32.mrf.mxu1 }
0x1b3b   :  { %v7017_v58 = vadd.f32 %v4417_v54, %v6251_v36  ;;  %v4412_v17 = vadd.f32 %v5435_v51, %v4411_v56  ;;  %v4596_v51 = vand.u32 7, %v6297_v12  ;;  %v4723_v54 = vadd.s32 1, %v4603_v49 }
0x1b3c   :  { %vm4640_vm0 = vcmp.ge.s32.totalorder %v4638_v22, 0 }
0x1b3d   :  { %v7020_v38 = vadd.f32 %v4412_v17, %v6254_v37  ;;  %v4427_v59 = vsel %vm418_vm3, %v7017_v58, 0.0  ;;  %v4637_v56 = vadd.s32 4294967295, %v4596_v51  ;;  %v4722_v17 = vadd.s32 1, %v4596_v51 }
0x1b3e   :  { %4428 = vadd.xlane.f32.xlu0 %v4427_v59  ;;  %v4767_v59 = vadd.s32 2, %v4603_v49  ;;  %vm4727_vm1 = vcmp.lt.s32.totalorder %v4723_v54, 8 }
0x1b3f   :  { %v4424_v53 = vsel %vm418_vm3, %v7020_v38, 0.0  ;;  %vm4639_vm2 = vcmp.ge.s32.totalorder %v4637_v56, 0  ;;  %vm4726_vm4 = vcmp.lt.s32.totalorder %v4722_v17, 8 }
0x1b40   :  { %4425 = vadd.xlane.f32.xlu1 %v4424_v53  ;;  %v4766_v53 = vadd.s32 2, %v4596_v51  ;;  %vm4771_vm8 = vcmp.lt.s32.totalorder %v4767_v59, 8 }
0x1b41   :  { %v5452_v39 = vsel %vm4771_vm8, 1.0, %v6053_v8 }
0x1b42   :  { %vm4770_vm11 = vcmp.lt.s32.totalorder %v4766_v53, 8 }
0x1bc7   :  { %v4429_v60 = vpop.xlane.xlu0 %4428 }
0x1bc8   :  { %v4431_v61 = vmul.f32 0.03125, %v4429_v60  ;;  %v4616_v60 = vld [vmem:[%s5364_s25] sm:$0x1f] }
0x1bc9   :  { %v4426_v2 = vpop.xlane.xlu1 %4425  ;;  %v4793_v12 = vrot.slane %v4616_v60, %v4792_v26 }
0x1bca   :  { %v4433_v21 = vsub.f32 %v7017_v58, %v4431_v61  ;;  %v4430_v20 = vmul.f32 0.03125, %v4426_v2  ;;  %v5448_v61 = vsel %vm4640_vm0, 1.0, %v6053_v8  ;;  %v5450_v2 = vsel %vm4727_vm1, 1.0, %v6053_v8 }
0x1bcb   :  { %v4738_v42 = vrot.slane %v5450_v2, 5  ;;  %vm5244_vm0 = vcmask 7168  }
0x1bcc   :  { %v4432_v36 = vsub.f32 %v7020_v38, %v4430_v20  ;;  %v4435_v4 = vmul.f32 %v4433_v21, %v4433_v21  ;;  %v4618_v20 = vadd.s32 4294967294, %v4603_v49 }
0x1bce   :  { %v4439_v37 = vsel %vm418_vm3, %v4435_v4, 0.0  ;;  %v4434_v62 = vmul.f32 %v4432_v36, %v4432_v36  ;;  %v5449_v4 = vsel %vm4726_vm4, 1.0, %v6053_v8  ;;  %vm4620_vm13 = vcmp.ge.s32.totalorder %v4618_v20, 0 }
0x1bcf   :  { %4440 = vadd.xlane.f32.xlu1 %v4439_v37  ;;  %v4664_v37 = vrot.slane %v4616_v60, %v6431_v5  ;;  %v6075_v5 = vmov 1.0  }
0x1bd0   :  { %v4436_v13 = vsel %vm418_vm3, %v4434_v62, 0.0  ;;  %v7067_v62 = vrot.slane %v4616_v60, %v6506_v47  ;;  %v4693_v47 = vrot.slane %v6075_v5, 6 }
0x1bd1   :  { %4437 = vadd.xlane.f32.xlu0 %v4436_v13  ;;  %v4653_v13 = vrot.slane %v5448_v61, 7 }
0x1c58   :  { %v4441_v57 = vpop.xlane.xlu1 %4440 }
0x1c59   :  { %v4443_v11 = vmul.f32 0.03125, %v4441_v57 }
0x1c5a   :  { %v4438_v3 = vpop.xlane.xlu0 %4437 }
0x1c5b   :  { %v4445_v31 = vadd.f32 1e-05, %v4443_v11  ;;  %v4442_v34 = vmul.f32 0.03125, %v4438_v3  ;;  %v4737_v11 = vrot.slane %v5449_v4, 5  ;;  %v5451_v3 = vsel %vm4770_vm11, 1.0, %v6053_v8 }
0x1c5d   :  { %5982 = vrsqrt.f32 %v4445_v31  ;;  %v4444_v0 = vadd.f32 1e-05, %v4442_v34  ;;  %v4782_v34 = vrot.slane %v5452_v39, 4 }
0x1c5f   :  { %5984 = vrsqrt.f32 %v4444_v0 }
0x1c6a   :  { %v5983_v29 = vpop.eup %5982 }
0x1c6b   :  { %v4449_v1 = vmul.f32 %v5983_v29, %v4433_v21  ;;  %v4617_v21 = vadd.s32 4294967294, %v4596_v51  ;;  %v4749_v29 = vrot.slane %v4616_v60, %v6594_v7  ;;  %v4634_v7 = vrot.slane %v4616_v60, %v6300_v15 }
0x1c6c   :  { %v5985_v52 = vpop.eup %5984 }
0x1c6d   :  { %v4448_v6 = vmul.f32 %v5985_v52, %v4432_v36  ;;  %v4457_v10 = vmul.f32 %v5438_v14, %v4449_v1  ;;  %v5447_v36 = vsel %vm4639_vm2, 1.0, %v6053_v8  ;;  %vm4619_vm12 = vcmp.ge.s32.totalorder %v4617_v21, 0 }
0x1c6e   :  { %v4652_v57 = vrot.slane %v5447_v36, 7  ;;  %v5445_v52 = vsel %vm4619_vm12, 1.0, %v6053_v8 }
0x1c6f   :  { %v4456_v25 = vmul.f32 %v5438_v14, %v4448_v6  ;;  %v4465_v33 = vadd.f32 %v5439_v32, %v4457_v10  ;;  %v5446_v6 = vsel %vm4620_vm13, 1.0, %v6053_v8 }
0x1c70   :  { %v4654_v10 = vsel %vm4651_vm14, %v4652_v57, %v4653_v13 }
0x1c71   :  { %v4464_v19 = vadd.f32 %v5439_v32, %v4456_v25  ;;  %v4781_v32 = vrot.slane %v5451_v3, 4 }
0x1c73   :  { %5807 = vmatprep.mubr.msk.f32.mxu1 %vm418_vm3, %v4464_v19  ;;  %v4739_v19 = vsel %vm4736_vm5, %v4737_v11, %v4738_v42 }
0x1c74   :  { %5808 = vmatmul.mubr.msk.f32.vlgmr.msra.gmra.mxu1 %vm418_vm3, %v4465_v33 }
0x1d34   :  { %v5809_v41 = vpop.f32.mrf.mxu1 }
0x1d35   :  { %v7044_v35 = vadd.f32 %v5809_v41, %v5440_v18 }
0x1d36   :  { %v4549_v28 = vpop.f32.mrf.mxu1 }
0x1d37   :  { %v5444_v30 = vmul.f32 -1.442695, %v7044_v35  ;;  %v7047_v9 = vadd.f32 %v5440_v18, %v4549_v28 }
0x1d39   :  { %5986 = vpow2.f32 %v5444_v30  ;;  %v5443_v16 = vmul.f32 -1.442695, %v7047_v9 }
0x1d3b   :  { %5988 = vpow2.f32 %v5443_v16 }
0x1d46   :  { %v5987_v50 = vpop.eup %5986 }
0x1d47   :  { %v4565_v55 = vadd.f32 1.0, %v5987_v50  ;;  %v4783_v50 = vsel %vm4780_vm6, %v4781_v32, %v4782_v34 }
0x1d48   :  { %v5989_v40 = vpop.eup %5988 }
0x1d49   :  { %5990 = vrcp.f32 %v4565_v55  ;;  %v4564_v63 = vadd.f32 1.0, %v5989_v40 }
0x1d4b   :  { %5992 = vrcp.f32 %v4564_v63 }
0x1d56   :  { %v5991_v27 = vpop.eup %5990 }
0x1d57   :  { %4574 = vrot.lane.b32.xlu1 %v5991_v27, %s6057_s12 }
0x1d58   :  { %v5993_v48 = vpop.eup %5992 }
0x1d59   :  { %4572 = vrot.lane.b32.xlu0 %v5993_v48, %s6057_s12  ;;  %s6083_s12 = smov 31  }
0x1d5a   :  { %s5373_s7 = sld [smem:[%s7192_s0 + %s6083_s12]]  }
0x1dc9   :  { %v4575_v23 = vpop.permute.xlu1 %4574 }
0x1dca   :  { %v4579_v31 = vmul.f32 %v4575_v23, %v7044_v35 }
0x1dcb   :  { %v4573_v0 = vpop.permute.xlu0 %4572 }
0x1dcc   :  { %v4584_v14 = vrot.slane %v4579_v31, 6  ;;  %v4578_v1 = vmul.f32 %v4573_v0, %v7047_v9 }
0x1dce   :  { %v4590_v25 = vsel %vm4582_vm15, %v4584_v14, 0.0  ;;  %v4583_v33 = vrot.slane %v4578_v1, 6 }
0x1dcf   :  { %v4660_v18 = vmul.f32 %v4653_v13, %v4590_v25  ;;  %v4701_v41 = vmul.f32 %v4693_v47, %v4590_v25  ;;  %v4745_v35 = vmul.f32 %v4738_v42, %v4590_v25  ;;  %v4789_v28 = vmul.f32 %v4782_v34, %v4590_v25 }
0x1dd0   :  { %v4585_v30 = vsel %vm4582_vm15, %v4583_v33, %v4584_v14  ;;  %v4589_v9 = vsel %vm4582_vm15, 0.0, %v4583_v33 }
0x1dd1   :  { %v4667_v16 = vmul.f32 %v4664_v37, %v4660_v18  ;;  %v4708_v8 = vmul.f32 %v7067_v62, %v4701_v41  ;;  %v4629_v55 = vmul.f32 %v5445_v52, %v4589_v9  ;;  %v4630_v40 = vmul.f32 %v5446_v6, %v4585_v30 }
0x1dd2   :  { %v4658_v63 = vmul.f32 %v4652_v57, %v4589_v9  ;;  %v4659_v27 = vmul.f32 %v4654_v10, %v4585_v30  ;;  %v4752_v43 = vmul.f32 %v4749_v29, %v4745_v35  ;;  %v4796_v46 = vmul.f32 %v4793_v12, %v4789_v28 }
0x1dd3   :  { %v4675_v48 = vrot.slane %v4667_v16, 1  ;;  %v4716_v45 = vrot.slane %v4708_v8, 2  ;;  %v4635_v15 = vmul.f32 %v4634_v7, %v4629_v55  ;;  %v4636_v44 = vmul.f32 %v4634_v7, %v4630_v40  ;;  %v5456_v40 = vld [vmem:[%s5367_s30] ss:$0 sm:$0xff] }
0x1dd4   :  { %v4665_v24 = vmul.f32 %v4664_v37, %v4658_v63  ;;  %v4666_v49 = vmul.f32 %v4664_v37, %v4659_v27  ;;  %v4699_v51 = vmul.f32 %v4693_v47, %v4589_v9  ;;  %v4700_v22 = vmul.f32 %v4693_v47, %v4585_v30 }
0x1dd5   :  { %v4743_v54 = vmul.f32 %v4737_v11, %v4589_v9  ;;  %v4744_v56 = vmul.f32 %v4739_v19, %v4585_v30  ;;  %v4787_v53 = vmul.f32 %v4781_v32, %v4589_v9  ;;  %v4788_v60 = vmul.f32 %v4783_v50, %v4585_v30  ;;  %v5453_v32 = vld [vmem:[%s5365_s29] ss:$0 sm:$0xff] }
0x1dd6   :  { %v4672_v17 = vrot.slane %v4665_v24, 1  ;;  %v4673_v59 = vrot.slane %v4666_v49, 1  ;;  %v4706_v61 = vmul.f32 %v7067_v62, %v4699_v51  ;;  %v4707_v2 = vmul.f32 %v7067_v62, %v4700_v22 }
0x1dd7   :  { %v4750_v21 = vmul.f32 %v4749_v29, %v4743_v54  ;;  %v4751_v20 = vmul.f32 %v4749_v29, %v4744_v56  ;;  %v4794_v37 = vmul.f32 %v4793_v12, %v4787_v53  ;;  %v4795_v13 = vmul.f32 %v4793_v12, %v4788_v60  ;;  %v4973_v53 = vld [vmem:[%s5370_s4 + $0x18] sm:$0xff]  ;;  %v4972_v60 = vld [vmem:[%s5370_s4 + $0x10] sm:$0xff] }
0x1dd8   :  { %v4674_v36 = vsel %vm4671_vm7, %v4672_v17, %v4673_v59  ;;  %v4676_v4 = vsel %vm4671_vm7, %v4673_v59, %v4675_v48  ;;  %v4713_v42 = vrot.slane %v4706_v61, 2  ;;  %v4714_v23 = vrot.slane %v4707_v2, 2  ;;  %5821 = vmatprep.subr.mxu1 %v4973_v53  ;;  %v4971_v61 = vld [vmem:[%s5370_s4 + $0x8] sm:$0xff]  ;;  %v4970_v2 = vld [vmem:[%s5370_s4] sm:$0xff] }
0x1dd9   :  { %v4679_v39 = vadd.f32 %v4674_v36, %v4635_v15  ;;  %v4680_v26 = vadd.f32 %v4676_v4, %v4636_v44  ;;  %v4760_v57 = vrot.slane %v4752_v43, 3  ;;  %v4757_v11 = vrot.slane %v4750_v21, 3  ;;  %5822 = vmatpush3.msra.mxu1 %v4973_v53 }
0x1dda   :  { %v4758_v62 = vrot.slane %v4751_v20, 3  ;;  %v4715_v3 = vsel %vm4712_vm9, %v4713_v42, %v4714_v23  ;;  %v4800_v31 = vrot.slane %v4794_v37, 4  ;;  %v4801_v5 = vrot.slane %v4795_v13, 4  ;;  %5823 = vmatprep.subr.mxu1 %v4972_v60 }
0x1ddb   :  { %v4717_v47 = vsel %vm4712_vm9, %v4714_v23, %v4716_v45  ;;  %v4720_v34 = vadd.f32 %v4715_v3, %v4679_v39  ;;  %v4803_v29 = vrot.slane %v4796_v46, 4  ;;  %5824 = vmatpush3.msra.mxu1 %v4972_v60 }
0x1ddc   :  { %v4721_v0 = vadd.f32 %v4717_v47, %v4680_v26  ;;  %v4759_v14 = vsel %vm4756_vm10, %v4757_v11, %v4758_v62  ;;  %v4761_v1 = vsel %vm4756_vm10, %v4758_v62, %v4760_v57  ;;  %v4802_v6 = vsel %vm4780_vm6, %v4800_v31, %v4801_v5  ;;  %5825 = vmatprep.subr.mxu1 %v4971_v61  ;;  %v5459_v26 = vld [vmem:[%s5368_s11] ss:$0 sm:$0xff]  ;;  %v5091_v47 = vld [vmem:[%s7127_s20 + $0x78] sm:$0xff] }
0x1ddd   :  { %v4764_v12 = vadd.f32 %v4759_v14, %v4720_v34  ;;  %v4804_v10 = vsel %vm4780_vm6, %v4801_v5, %v4803_v29  ;;  %5826 = vmatpush3.msra.mxu1 %v4971_v61  ;;  %v5460_v62 = vld [vmem:[%s5369_s16] ss:$0 sm:$0xff]  ;;  %5832 = vmatprep.subr.mxu0 %v5091_v47  ;;  %v5090_v34 = vld [vmem:[%s7127_s20 + $0x70] sm:$0xff]  ;;  %v5087_v14 = vld [vmem:[%s7127_s20 + $0x58] sm:$0xff] }
0x1dde   :  { %v4765_v52 = vadd.f32 %v4761_v1, %v4721_v0  ;;  %5827 = vmatprep.subr.mxu1 %v4970_v2  ;;  %v5089_v0 = vld [vmem:[%s7127_s20 + $0x68] sm:$0xff]  ;;  %v5088_v29 = vld [vmem:[%s7127_s20 + $0x60] sm:$0xff]  ;;  %v5086_v1 = vld [vmem:[%s7127_s20 + $0x50] sm:$0xff] }
0x1ddf   :  { %v4807_v25 = vadd.f32 %v4802_v6, %v4764_v12  ;;  %5828 = vmatpush3.msra.mxu1 %v4970_v2  ;;  %v5085_v12 = vld [vmem:[%s7127_s20 + $0x48] sm:$0xff]  ;;  %v5083_v6 = vld [vmem:[%s7127_s20 + $0x38] sm:$0xff] }
0x1de0   :  { %v4808_v19 = vadd.f32 %v4804_v10, %v4765_v52  ;;  %v5084_v52 = vld [vmem:[%s7127_s20 + $0x40] sm:$0xff]  ;;  %v5082_v10 = vld [vmem:[%s7127_s20 + $0x30] sm:$0xff] }
0x1de1   :  { %v4816_v33 = vadd.f32 %v5453_v32, %v4807_v25  ;;  %v5080_v25 = vld [vmem:[%s7127_s20 + $0x20] sm:$0xff] }
0x1de2   :  { %v4817_v18 = vadd.f32 %v5453_v32, %v4808_v19  ;;  %v5081_v32 = vld [vmem:[%s7127_s20 + $0x28] sm:$0xff]  ;;  %v5079_v19 = vld [vmem:[%s7127_s20 + $0x18] sm:$0xff] }
0x1de3   :  { %v5454_v41 = vmul.f32 -1.442695, %v4816_v33 }
0x1de4   :  { %v5455_v35 = vmul.f32 -1.442695, %v4817_v18 }
0x1de5   :  { %5994 = vpow2.f32 %v5454_v41  ;;  %v5076_v41 = vld [vmem:[%s7127_s20] sm:$0xff] }
0x1de6   :  { %5996 = vpow2.f32 %v5455_v35  ;;  %v5461_v35 = vld [vmem:[%s5371_s24] ss:$0 sm:$0xff] }
0x1df2   :  { %v5995_v28 = vpop.eup %5994 }
0x1df3   :  { %v5997_v7 = vpop.eup %5996  ;;  %v4824_v30 = vadd.f32 1.0, %v5995_v28 }
0x1df4   :  { %v4825_v9 = vadd.f32 1.0, %v5997_v7 }
0x1df5   :  { %5998 = vrcp.f32 %v4824_v30 }
0x1df6   :  { %6000 = vrcp.f32 %v4825_v9 }
0x1e02   :  { %v5999_v16 = vpop.eup %5998 }
0x1e03   :  { %v6001_v8 = vpop.eup %6000  ;;  %v4830_v50 = vmul.f32 %v5999_v16, %v4816_v33  ;;  %v5078_v33 = vld [vmem:[%s7127_s20 + $0x10] sm:$0xff] }
0x1e04   :  { %v4831_v55 = vmul.f32 %v6001_v8, %v4817_v18  ;;  %v5077_v18 = vld [vmem:[%s7127_s20 + $0x8] sm:$0xff] }
0x1e05   :  { %5818 = vmatprep.mubr.msk.f32.mxu0 %vm418_vm3, %v4830_v50 }
0x1e06   :  { %5819 = vmatmul.mubr.msk.f32.vlgmr.msra.gmra.mxu0 %vm418_vm3, %v4831_v55 }
0x1e07   :  { %5833 = vmatpush3.msra.mxu0 %v5091_v47  ;;  %v5469_v47 = vld [vmem:[%s5376_s14] ss:$0 sm:$0xff] }
0x1e08   :  { %5834 = vmatprep.subr.mxu0 %v5090_v34 }
0x1e09   :  { %5835 = vmatpush3.msra.mxu0 %v5090_v34 }
0x1e0a   :  { %5836 = vmatprep.subr.mxu0 %v5089_v0 }
0x1e0b   :  { %5837 = vmatpush3.msra.mxu0 %v5089_v0 }
0x1e0c   :  { %5838 = vmatprep.subr.mxu0 %v5088_v29 }
0x1e0d   :  { %5839 = vmatpush3.msra.mxu0 %v5088_v29 }
0x1e0e   :  { %5840 = vmatprep.subr.mxu0 %v5087_v14 }
0x1e0f   :  { %5841 = vmatpush3.msra.mxu0 %v5087_v14 }
0x1e10   :  { %5842 = vmatprep.subr.mxu0 %v5086_v1 }
0x1e11   :  { %5843 = vmatpush3.msra.mxu0 %v5086_v1 }
0x1e12   :  { %5844 = vmatprep.subr.mxu0 %v5085_v12 }
0x1e13   :  { %5845 = vmatpush3.msra.mxu0 %v5085_v12 }
0x1e14   :  { %5846 = vmatprep.subr.mxu0 %v5084_v52 }
0x1e15   :  { %5847 = vmatpush3.msra.mxu0 %v5084_v52 }
0x1e16   :  { %5848 = vmatprep.subr.mxu0 %v5083_v6 }
0x1e17   :  { %5849 = vmatpush3.msra.mxu0 %v5083_v6 }
0x1e18   :  { %5850 = vmatprep.subr.mxu0 %v5082_v10 }
0x1e19   :  { %5851 = vmatpush3.msra.mxu0 %v5082_v10 }
0x1e1a   :  { %5852 = vmatprep.subr.mxu0 %v5081_v32 }
0x1e1b   :  { %5853 = vmatpush3.msra.mxu0 %v5081_v32 }
0x1e1c   :  { %5854 = vmatprep.subr.mxu0 %v5080_v25 }
0x1e1d   :  { %5855 = vmatpush3.msra.mxu0 %v5080_v25 }
0x1e1e   :  { %5856 = vmatprep.subr.mxu0 %v5079_v19 }
0x1e1f   :  { %5857 = vmatpush3.msra.mxu0 %v5079_v19 }
0x1e20   :  { %5858 = vmatprep.subr.mxu0 %v5078_v33 }
0x1e21   :  { %5859 = vmatpush3.msra.mxu0 %v5078_v33 }
0x1e22   :  { %5860 = vmatprep.subr.mxu0 %v5077_v18 }
0x1e23   :  { %5861 = vmatpush3.msra.mxu0 %v5077_v18 }
0x1e24   :  { %5862 = vmatprep.subr.mxu0 %v5076_v41 }
0x1e25   :  { %5863 = vmatpush3.msra.mxu0 %v5076_v41 }
0x1ec6   :  { %v5820_v63 = vpop.f32.mrf.mxu0 }
0x1ec7   :  { %v4921_v27 = vadd.f32 %v5820_v63, %v5456_v40 }
0x1ec8   :  { %v4915_v48 = vpop.f32.mrf.mxu0 }
0x1ec9   :  { %v7100_v45 = vadd.f32 %v4921_v27, %v7017_v58  ;;  %v4916_v43 = vadd.f32 %v5456_v40, %v4915_v48 }
0x1ecb   :  { %v7103_v46 = vadd.f32 %v4916_v43, %v7020_v38  ;;  %v4931_v15 = vsel %vm418_vm3, %v7100_v45, 0.0 }
0x1ecc   :  { %4932 = vadd.xlane.f32.xlu0 %v4931_v15 }
0x1ecd   :  { %v4928_v44 = vsel %vm418_vm3, %v7103_v46, 0.0 }
0x1ece   :  { %4929 = vadd.xlane.f32.xlu1 %v4928_v44  ;;  %v5466_v44 = vld [vmem:[%s5373_s7] ss:$0 sm:$0xff] }
0x1f55   :  { %v4933_v24 = vpop.xlane.xlu0 %4932 }
0x1f56   :  { %v4935_v49 = vmul.f32 0.03125, %v4933_v24 }
0x1f57   :  { %v4930_v51 = vpop.xlane.xlu1 %4929 }
0x1f58   :  { %v4937_v22 = vsub.f32 %v7100_v45, %v4935_v49  ;;  %v4934_v54 = vmul.f32 0.03125, %v4930_v51 }
0x1f5a   :  { %v4936_v58 = vsub.f32 %v7103_v46, %v4934_v54  ;;  %v4939_v56 = vmul.f32 %v4937_v22, %v4937_v22 }
0x1f5c   :  { %v4943_v38 = vsel %vm418_vm3, %v4939_v56, 0.0  ;;  %v4938_v17 = vmul.f32 %v4936_v58, %v4936_v58 }
0x1f5d   :  { %4944 = vadd.xlane.f32.xlu1 %v4943_v38 }
0x1f5e   :  { %v4940_v59 = vsel %vm418_vm3, %v4938_v17, 0.0 }
0x1f5f   :  { %4941 = vadd.xlane.f32.xlu0 %v4940_v59 }
0x1fe6   :  { %v4945_v21 = vpop.xlane.xlu1 %4944 }
0x1fe7   :  { %v4947_v20 = vmul.f32 0.03125, %v4945_v21 }
0x1fe8   :  { %v4942_v36 = vpop.xlane.xlu0 %4941 }
0x1fe9   :  { %v4949_v4 = vadd.f32 1e-05, %v4947_v20  ;;  %v4946_v37 = vmul.f32 0.03125, %v4942_v36 }
0x1feb   :  { %6002 = vrsqrt.f32 %v4949_v4  ;;  %v4948_v13 = vadd.f32 1e-05, %v4946_v37 }
0x1fed   :  { %6004 = vrsqrt.f32 %v4948_v13 }
0x1ff8   :  { %v6003_v39 = vpop.eup %6002 }
0x1ff9   :  { %v4953_v42 = vmul.f32 %v6003_v39, %v4937_v22 }
0x1ffa   :  { %v6005_v23 = vpop.eup %6004 }
0x1ffb   :  { %v4952_v57 = vmul.f32 %v6005_v23, %v4936_v58  ;;  %v4961_v11 = vmul.f32 %v5459_v26, %v4953_v42 }
0x1ffd   :  { %v4960_v3 = vmul.f32 %v5459_v26, %v4952_v57  ;;  %v4969_v5 = vadd.f32 %v5460_v62, %v4961_v11  ;;  %v5467_v57 = vld [vmem:[%s5374_s2] ss:$0 sm:$0xff] }
0x1fff   :  { %v4968_v31 = vadd.f32 %v5460_v62, %v4960_v3  ;;  %v5468_v3 = vld [vmem:[%s5375_s9] ss:$0 sm:$0xff] }
0x2001   :  { %5829 = vmatprep.mubr.msk.f32.mxu1 %vm418_vm3, %v4968_v31 }
0x2002   :  { %5830 = vmatmul.mubr.msk.f32.vlgmr.msra.gmra.mxu1 %vm418_vm3, %v4969_v5 }
0x20c2   :  { %v5831_v28 = vpop.f32.mrf.mxu1 }
0x20c3   :  { %v5059_v7 = vadd.f32 %v5831_v28, %v5461_v35 }
0x20c4   :  { %v5053_v30 = vpop.f32.mrf.mxu1 }
0x20c5   :  { %v5465_v9 = vmul.f32 -1.442695, %v5059_v7  ;;  %v5054_v16 = vadd.f32 %v5461_v35, %v5053_v30 }
0x20c7   :  { %6006 = vpow2.f32 %v5465_v9  ;;  %v5464_v8 = vmul.f32 -1.442695, %v5054_v16 }
0x20c9   :  { %6008 = vpow2.f32 %v5464_v8 }
0x20d4   :  { %v6007_v50 = vpop.eup %6006 }
0x20d5   :  { %v5069_v55 = vadd.f32 1.0, %v6007_v50 }
0x20d6   :  { %v6009_v40 = vpop.eup %6008 }
0x20d7   :  { %v5068_v63 = vadd.f32 1.0, %v6009_v40  ;;  %6010 = vrcp.f32 %v5069_v55 }
0x20d9   :  { %6012 = vrcp.f32 %v5068_v63 }
0x20e4   :  { %v6011_v27 = vpop.eup %6010 }
0x20e5   :  { %v5075_v15 = vmul.f32 %v6011_v27, %v5059_v7 }
0x20e6   :  { %v6013_v48 = vpop.eup %6012 }
0x20e7   :  { %v5074_v43 = vmul.f32 %v6013_v48, %v5054_v16 }
0x20e9   :  { %5864 = vmatprep.mubr.f32.mxu0 %v5074_v43 }
0x20ea   :  { %5865 = vmatmul.mubr.f32.vlgmr.msra.gmra.mxu0 %v5075_v15 }
0x21aa   :  { %v5866_v24 = vpop.f32.mrf.mxu0 }
0x21ab   :  { %v5171_v49 = vadd.f32 %v5866_v24, %v5466_v44 }
0x21ac   :  { %v5165_v51 = vpop.f32.mrf.mxu0 }
0x21ad   :  { %v5175_v22 = vadd.f32 %v5171_v49, %v7100_v45  ;;  %v5166_v54 = vadd.f32 %v5466_v44, %v5165_v51 }
0x21af   :  { %v5174_v58 = vadd.f32 %v5166_v54, %v7103_v46  ;;  %v5181_v56 = vsel %vm418_vm3, %v5175_v22, 0.0  ;;  %v78_v46 = vstv %s5377_s27 }
0x21b0   :  { %5182 = vadd.xlane.f32.xlu1 %v5181_v56  ;;  %79 = vst [vmem:[#allocation2] sm:$0x1] %v78_v46 }
0x21b1   :  { %v5178_v38 = vsel %vm418_vm3, %v5174_v58, 0.0 }
0x21b2   :  { %5179 = vadd.xlane.f32.xlu0 %v5178_v38 }
0x21b7   :  { %v5470_v6 = vld [vmem:[#allocation2] ss:$0 sm:$0xff] }
0x2239   :  { %v5183_v17 = vpop.xlane.xlu1 %5182 }
0x223a   :  { %v5185_v59 = vmul.f32 0.03125, %v5183_v17 }
0x223b   :  { %v5180_v53 = vpop.xlane.xlu0 %5179 }
0x223c   :  { %v5187_v60 = vsub.f32 %v5175_v22, %v5185_v59  ;;  %v5184_v61 = vmul.f32 0.03125, %v5180_v53 }
0x223e   :  { %v5186_v2 = vsub.f32 %v5174_v58, %v5184_v61  ;;  %v5189_v21 = vmul.f32 %v5187_v60, %v5187_v60 }
0x2240   :  { %v5193_v20 = vsel %vm418_vm3, %v5189_v21, 0.0  ;;  %v5188_v36 = vmul.f32 %v5186_v2, %v5186_v2 }
0x2241   :  { %5194 = vadd.xlane.f32.xlu1 %v5193_v20 }
0x2242   :  { %v5190_v45 = vsel %vm418_vm3, %v5188_v36, 0.0 }
0x2243   :  { %5191 = vadd.xlane.f32.xlu0 %v5190_v45 }
0x22ca   :  { %v5195_v4 = vpop.xlane.xlu1 %5194 }
0x22cb   :  { %v5197_v37 = vmul.f32 0.03125, %v5195_v4 }
0x22cc   :  { %v5192_v13 = vpop.xlane.xlu0 %5191 }
0x22cd   :  { %v5199_v39 = vadd.f32 1e-05, %v5197_v37  ;;  %v5196_v26 = vmul.f32 0.03125, %v5192_v13 }
0x22cf   :  { %6014 = vrsqrt.f32 %v5199_v39  ;;  %v5198_v42 = vadd.f32 1e-05, %v5196_v26 }
0x22d1   :  { %6016 = vrsqrt.f32 %v5198_v42 }
0x22dc   :  { %v6015_v23 = vpop.eup %6014 }
0x22dd   :  { %v5203_v11 = vmul.f32 %v6015_v23, %v5187_v60 }
0x22de   :  { %v6017_v62 = vpop.eup %6016 }
0x22df   :  { %v5211_v31 = vmul.f32 %v5467_v57, %v5203_v11  ;;  %v5202_v5 = vmul.f32 %v6017_v62, %v5186_v2 }
0x22e1   :  { %v5219_v34 = vadd.f32 %v5468_v3, %v5211_v31  ;;  %v5210_v0 = vmul.f32 %v5467_v57, %v5202_v5 }
0x22e3   :  { %v5228_v29 = vmul.f32 %v5469_v47, %v5219_v34  ;;  %v5218_v14 = vadd.f32 %v5468_v3, %v5210_v0 }
0x22e5   :  { %v5232_v1 = vsel %vm418_vm3, %v5228_v29, 0.0  ;;  %v5227_v12 = vmul.f32 %v5469_v47, %v5218_v14 }
0x22e6   :  { %5233 = vadd.xlane.f32.xlu1 %v5232_v1 }
0x22e7   :  { %v5229_v52 = vsel %vm418_vm3, %v5227_v12, 0.0  ;;  %vm5290_vm3 = vcmask 0  }
0x22e8   :  { %5230 = vadd.xlane.f32.xlu0 %v5229_v52 }
0x236f   :  { %v5234_v10 = vpop.xlane.xlu1 %5233 }
0x2370   :  { %v7171_v32 = vadd.f32 %v5470_v6, %v5234_v10 }
0x2371   :  { %v5231_v25 = vpop.xlane.xlu0 %5230 }
0x2372   :  { %v5292_v19 = vsel %vm5244_vm0, %v7171_v32, -inf  ;;  %v7175_v33 = vadd.f32 %v5470_v6, %v5231_v25 }
0x2373   :  { %v5293_v18 = vrot.slane %v5292_v19, 4 }
0x2374   :  { %v5245_v41 = vsel %vm5244_vm0, %v7175_v33, -inf }
0x2375   :  { %v5294_v35 = vmax.f32 %v5292_v19, %v5293_v18  ;;  %v5246_v28 = vrot.slane %v5245_v41, 4 }
0x2377   :  { %v5295_v7 = vrot.slane %v5294_v35, 2  ;;  %v5247_v30 = vmax.f32 %v5245_v41, %v5246_v28 }
0x2379   :  { %v5296_v9 = vmax.f32 %v5294_v35, %v5295_v7  ;;  %v5248_v16 = vrot.slane %v5247_v30, 2 }
0x237b   :  { %v5297_v8 = vrot.slane %v5296_v9, 1  ;;  %v5249_v50 = vmax.f32 %v5247_v30, %v5248_v16 }
0x237d   :  { %v5298_v55 = vmax.f32 %v5296_v9, %v5297_v8  ;;  %v5250_v40 = vrot.slane %v5249_v50, 1 }
0x237f   :  { %v5472_v63 = vmul.f32 -1.442695, %v5298_v55  ;;  %v5251_v27 = vmax.f32 %v5249_v50, %v5250_v40 }
0x2381   :  { %6018 = vpow2.f32 %v5472_v63  ;;  %v5471_v48 = vmul.f32 -1.442695, %v5251_v27 }
0x2383   :  { %6020 = vpow2.f32 %v5471_v48 }
0x238e   :  { %v6019_v43 = vpop.eup %6018 }
0x238f   :  { %v5302_v15 = vadd.f32 1.0, %v6019_v43 }
0x2390   :  { %v6021_v44 = vpop.eup %6020 }
0x2391   :  { %6022 = vrcp.f32 %v5302_v15  ;;  %v5255_v24 = vadd.f32 1.0, %v6021_v44 }
0x2393   :  { %6024 = vrcp.f32 %v5255_v24 }
0x239e   :  { %v6023_v49 = vpop.eup %6022 }
0x239f   :  { %v5305_v51 = vsub.f32 1.0, %v6023_v49 }
0x23a0   :  { %v6025_v22 = vpop.eup %6024 }
0x23a1   :  { %v5306_v54 = vmul.f32 5.0, %v5305_v51  ;;  %v5258_v58 = vsub.f32 1.0, %v6025_v22 }
0x23a3   :  { %v5307_v56 = vadd.f32 1e-08, %v5306_v54  ;;  %v5259_v38 = vmul.f32 5.0, %v5258_v58 }
0x23a5   :  { %6026 = vrcp.f32 %v5307_v56  ;;  %v5260_v17 = vadd.f32 1e-08, %v5259_v38 }
0x23a7   :  { %6028 = vrcp.f32 %v5260_v17 }
0x23b2   :  { %v6027_v59 = vpop.eup %6026 }
0x23b3   :  { %v5309_v53 = vmul.f32 %v6027_v59, %v7171_v32 }
0x23b4   :  { %v6029_v60 = vpop.eup %6028 }
0x23b5   :  { %v5310_v61 = vsel %vm5244_vm0, %v5309_v53, -inf  ;;  %v5262_v2 = vmul.f32 %v6029_v60, %v7175_v33 }
0x23b6   :  { %v5311_v21 = vrot.slane %v5310_v61, 4 }
0x23b7   :  { %v5263_v20 = vsel %vm5244_vm0, %v5262_v2, -inf }
0x23b8   :  { %v5312_v36 = vmax.f32 %v5310_v61, %v5311_v21  ;;  %v5264_v45 = vrot.slane %v5263_v20, 4 }
0x23ba   :  { %v5313_v46 = vrot.slane %v5312_v36, 2  ;;  %v5265_v4 = vmax.f32 %v5263_v20, %v5264_v45 }
0x23bc   :  { %v5314_v37 = vmax.f32 %v5312_v36, %v5313_v46  ;;  %v5266_v13 = vrot.slane %v5265_v4, 2 }
0x23be   :  { %v5315_v39 = vrot.slane %v5314_v37, 1  ;;  %v5267_v26 = vmax.f32 %v5265_v4, %v5266_v13 }
0x23c0   :  { %v5316_v42 = vmax.f32 %v5314_v37, %v5315_v39  ;;  %v5268_v23 = vrot.slane %v5267_v26, 1 }
0x23c2   :  { %v5317_v57 = vsub.f32 %v5309_v53, %v5316_v42  ;;  %v5269_v11 = vmax.f32 %v5267_v26, %v5268_v23 }
0x23c4   :  { %v5318_v62 = vmul.f32 1.442695, %v5317_v57  ;;  %v5270_v3 = vsub.f32 %v5262_v2, %v5269_v11 }
0x23c6   :  { %6030 = vpow2.f32 %v5318_v62  ;;  %v5271_v31 = vmul.f32 1.442695, %v5270_v3 }
0x23c8   :  { %6032 = vpow2.f32 %v5271_v31 }
0x23d3   :  { %v6031_v5 = vpop.eup %6030 }
0x23d4   :  { %v5320_v47 = vsel %vm5244_vm0, %v6031_v5, 0.0 }
0x23d5   :  { %v6033_v34 = vpop.eup %6032  ;;  %v5321_v0 = vrot.slane %v5320_v47, 4 }
0x23d6   :  { %v5273_v29 = vsel %vm5244_vm0, %v6033_v34, 0.0 }
0x23d7   :  { %v5322_v14 = vadd.f32 %v5321_v0, %v5320_v47  ;;  %v5274_v1 = vrot.slane %v5273_v29, 4 }
0x23d9   :  { %v5323_v12 = vrot.slane %v5322_v14, 2  ;;  %v5275_v52 = vadd.f32 %v5274_v1, %v5273_v29 }
0x23db   :  { %v5324_v6 = vadd.f32 %v5323_v12, %v5322_v14  ;;  %v5276_v10 = vrot.slane %v5275_v52, 2 }
0x23dd   :  { %v5325_v25 = vrot.slane %v5324_v6, 1  ;;  %v5277_v19 = vadd.f32 %v5276_v10, %v5275_v52 }
0x23df   :  { %v5326_v18 = vadd.f32 %v5325_v25, %v5324_v6  ;;  %v5278_v41 = vrot.slane %v5277_v19, 1 }
0x23e1   :  { %6034 = vrcp.f32 %v5326_v18  ;;  %v5279_v35 = vadd.f32 %v5278_v41, %v5277_v19 }
0x23e3   :  { %6036 = vrcp.f32 %v5279_v35 }
0x23ee   :  { %v6035_v28 = vpop.eup %6034 }
0x23ef   :  { %v5328_v7 = vmul.f32 %v6035_v28, %v6031_v5 }
0x23f0   :  { %v6037_v30 = vpop.eup %6036 }
0x23f1   :  { %v5329_v9 = vmul.f32 %v5328_v7, %v7171_v32  ;;  %v5281_v16 = vmul.f32 %v6037_v30, %v6033_v34 }
0x23f3   :  { %v5330_v8 = vsel %vm5244_vm0, %v5329_v9, 0.0  ;;  %v5282_v50 = vmul.f32 %v5281_v16, %v7175_v33 }
0x23f4   :  { %v5331_v55 = vrot.slane %v5330_v8, 4 }
0x23f5   :  { %v5283_v40 = vsel %vm5244_vm0, %v5282_v50, 0.0 }
0x23f6   :  { %v5332_v63 = vadd.f32 %v5331_v55, %v5330_v8  ;;  %v5284_v27 = vrot.slane %v5283_v40, 4 }
0x23f8   :  { %v5333_v48 = vrot.slane %v5332_v63, 2  ;;  %v5285_v43 = vadd.f32 %v5284_v27, %v5283_v40 }
0x23fa   :  { %v5334_v15 = vadd.f32 %v5333_v48, %v5332_v63  ;;  %v5286_v44 = vrot.slane %v5285_v43, 2 }
0x23fc   :  { %v5335_v32 = vrot.slane %v5334_v15, 1  ;;  %v5287_v24 = vadd.f32 %v5286_v44, %v5285_v43 }
0x23fe   :  { %v5336_v49 = vadd.f32 %v5335_v32, %v5334_v15  ;;  %v5288_v51 = vrot.slane %v5287_v24, 1 }
0x2400   :  { %5473 = vst.msk [vmem:[%s5378_s18 + $0x1] sm:$0x1] %vm5290_vm3, %v5336_v49  ;;  %v5289_v33 = vadd.f32 %v5288_v51, %v5287_v24 }
0x2402   :  { %5291 = vst.msk [vmem:[%s5378_s18] sm:$0x1] %vm5290_vm3, %v5289_v33 }

</bundles_post_ra>
